<compile_context>
chip_gen: v5e
topology: v5e:2x2
jax: 0.10.0
libtpu: 0.0.40
codegen_flags: <defaults>
</compile_context>

<pallas_src>
import jax
import jax.numpy as jnp
from jax.experimental import pallas as pl
from jax.experimental.pallas import tpu as pltpu


def _round_up(x, m):
    return (x + m - 1) // m * m


# --------------------------------------------------------------------------------------
# Fused Pallas kernel (built per shape so H / W / pad are static closures)
# --------------------------------------------------------------------------------------
def _make_bottleneck_kernel(H, W, pad, compute_dtype):
    HW = H * W

    def kernel(x_ref, w1_ref, b1_ref, w2_ref, b2_ref, w3_ref, b3_ref,
               wm_ref, o_ref, h1_ref):
        # --- conv1 (1x1) + folded BN1 + ReLU (f32 accumulate) ---
        x = x_ref[...]
        h1 = jnp.dot(x, w1_ref[...], preferred_element_type=jnp.float32)
        h1 = jnp.maximum(h1 + b1_ref[...], 0.0)

        # --- stash h1 in a zero-haloed flat scratch: rows [0,pad) and [pad+HW, 2*pad+HW)
        #     are zero (handles the h +/- 1 image boundary of the 3x3 conv). ---
        zeros_halo = jnp.zeros((pad, h1_ref.shape[1]), h1_ref.dtype)
        h1_ref[pl.ds(0, pad), :] = zeros_halo
        h1_ref[pl.ds(pad + HW, pad), :] = zeros_halo
        h1_ref[pl.ds(pad, HW), :] = h1.astype(h1_ref.dtype)

        # Per-pixel W-boundary masks for the dx = -1 / dx = +1 taps.
        wm = wm_ref[...]
        mask_l = wm[:, 0:1] > 0.5          # valid when w >= 1
        mask_r = wm[:, 1:2] > 0.5          # valid when w <= W - 2

        # --- conv2 (3x3, padding=1) as 9 accumulating taps + folded BN2 + ReLU ---
        acc = None
        for i in range(3):                  # kernel row    -> dy = i - 1
            for j in range(3):              # kernel column -> dx = j - 1
                off = pad + (i - 1) * W + (j - 1)          # static offset
                a = h1_ref[pl.ds(off, HW), :]
                if j == 0:
                    a = jnp.where(mask_l, a, 0)
                elif j == 2:
                    a = jnp.where(mask_r, a, 0)
                t = jnp.dot(a, w2_ref[i * 3 + j],
                            preferred_element_type=jnp.float32)
                acc = t if acc is None else acc + t
        h2 = jnp.maximum(acc + b2_ref[...], 0.0)

        # --- conv3 (1x1) + folded BN3 + residual add + ReLU ---
        h3 = jnp.dot(h2.astype(compute_dtype), w3_ref[...],
                     preferred_element_type=jnp.float32)
        h3 = h3 + b3_ref[...]
        o_ref[...] = jnp.maximum(h3 + x.astype(jnp.float32), 0.0).astype(o_ref.dtype)

    return kernel


# --------------------------------------------------------------------------------------
# Wrapper
# --------------------------------------------------------------------------------------
def bottleneck_forward(x_nhwc, params, *, compute_dtype=jnp.float32,
                       vmem_limit_bytes=None):
    N, H, W, Cin = x_nhwc.shape
    P = params["w1"].shape[1]           # planes
    Cout = params["w3"].shape[1]        # planes * 4
    assert Cin == Cout, "downsample is None => inplanes must equal planes*4"
    HW = H * W
    cdt = compute_dtype

    # Fold BN scales into the conv weights (host side, once per call).
    w1f = (params["w1"] * params["s1"]).astype(cdt)                      # (Cin, P)
    w2f = (params["w2"] * params["s2"]).reshape(9, P, P).astype(cdt)     # (9, P, P) taps
    w3f = (params["w3"] * params["s3"]).astype(cdt)                      # (P, Cout)
    b1 = params["b1"].astype(jnp.float32)
    b2 = params["b2"].astype(jnp.float32)
    b3 = params["b3"].astype(jnp.float32)

    # Per-pixel W-boundary validity (left / right neighbour exists), flat over H*W.
    col = jnp.arange(HW, dtype=jnp.int32) % W
    wmask = jnp.stack([(col >= 1), (col <= W - 2)], axis=-1).astype(jnp.float32)

    x2d = x_nhwc.reshape(N * HW, Cin).astype(cdt)

    pad = _round_up(W + 1, 8)            # sublane-aligned zero halo above/below h1
    srows = HW + 2 * pad                 # flat scratch rows

    kernel = _make_bottleneck_kernel(H, W, pad, cdt)

    cp_kwargs = dict(dimension_semantics=("parallel",))
    if vmem_limit_bytes is not None:     # raise scoped VMEM for very large H*W / channels
        cp_kwargs["vmem_limit_bytes"] = vmem_limit_bytes

    out2d = pl.pallas_call(
        kernel,
        out_shape=jax.ShapeDtypeStruct((N * HW, Cout), jnp.float32),
        grid_spec=pltpu.PrefetchScalarGridSpec(
            num_scalar_prefetch=0,
            grid=(N,),                                       # one image per grid step
            in_specs=[
                pl.BlockSpec((HW, Cin), lambda n: (n, 0)),   # x slab (also the residual)
                pl.BlockSpec((Cin, P), lambda n: (0, 0)),    # w1 (BN1 folded)
                pl.BlockSpec((1, P), lambda n: (0, 0)),      # b1
                pl.BlockSpec((9, P, P), lambda n: (0, 0, 0)),  # w2 taps (BN2 folded)
                pl.BlockSpec((1, P), lambda n: (0, 0)),      # b2
                pl.BlockSpec((P, Cout), lambda n: (0, 0)),   # w3 (BN3 folded)
                pl.BlockSpec((1, Cout), lambda n: (0, 0)),   # b3
                pl.BlockSpec((HW, 2), lambda n: (0, 0)),     # W-boundary masks
            ],
            out_specs=pl.BlockSpec((HW, Cout), lambda n: (n, 0)),
            scratch_shapes=[pltpu.VMEM((srows, P), cdt)],    # zero-haloed h1 (never hits HBM)
        ),
        compiler_params=pltpu.CompilerParams(**cp_kwargs),
    )(x2d, w1f, b1, w2f, b2, w3f, b3, wmask)

    return out2d.reshape(N, H, W, Cout)


# --------------------------------------------------------------------------------------
# Deterministic parameter construction (synthetic, shapes from Bottleneck.__init__)
# --------------------------------------------------------------------------------------
def init_params(key, inplanes, planes):
    expansion = 4
    out_ch = planes * expansion
    eps = 1e-5
    ks = jax.random.split(key, 15)

    def bn_fold(kg, kb, km, kv, c):
        gamma = 1.0 + 0.1 * jax.random.normal(kg, (c,), jnp.float32)
        beta = 0.1 * jax.random.normal(kb, (c,), jnp.float32)
        mean = 0.1 * jax.random.normal(km, (c,), jnp.float32)
        var = jax.random.uniform(kv, (c,), jnp.float32, minval=0.5, maxval=1.5)
        scale = gamma / jnp.sqrt(var + eps)
        bias = beta - mean * scale
        return scale.reshape(1, c), bias.reshape(1, c)

    # PyTorch conv weight layouts: (out, in, kh, kw)
    w1_t = jax.random.normal(ks[0], (planes, inplanes, 1, 1), jnp.float32) * (2.0 / inplanes) ** 0.5
    w2_t = jax.random.normal(ks[1], (planes, planes, 3, 3), jnp.float32) * (2.0 / (9 * planes)) ** 0.5
    w3_t = jax.random.normal(ks[2], (out_ch, planes, 1, 1), jnp.float32) * (2.0 / planes) ** 0.5

    s1, b1 = bn_fold(ks[3], ks[4], ks[5], ks[6], planes)
    s2, b2 = bn_fold(ks[7], ks[8], ks[9], ks[10], planes)
    s3, b3 = bn_fold(ks[11], ks[12], ks[13], ks[14], out_ch)

    # Matmul-friendly layouts:
    w1 = jnp.transpose(w1_t[:, :, 0, 0], (1, 0))                         # (Cin, P)
    w2 = jnp.transpose(w2_t, (2, 3, 1, 0)).reshape(9 * planes, planes)   # rows = (kh,kw,cin)
    w3 = jnp.transpose(w3_t[:, :, 0, 0], (1, 0))                         # (P, Cout)

    return dict(w1=w1, s1=s1, b1=b1, w2=w2, s2=s2, b2=b2, w3=w3, s3=s3, b3=b3)


# --------------------------------------------------------------------------------------
# Pure-JAX reference (same folded-BN semantics, f32) for validation
# --------------------------------------------------------------------------------------
def bottleneck_ref(x_nhwc, params):
    P = params["w1"].shape[1]
    h1 = jnp.einsum("nhwc,cp->nhwp", x_nhwc, params["w1"])
    h1 = jnp.maximum(h1 * params["s1"][0] + params["b1"][0], 0.0)

    w2_hwio = params["w2"].reshape(3, 3, P, P)
    h2 = jax.lax.conv_general_dilated(
        h1, w2_hwio, window_strides=(1, 1), padding="SAME",
        dimension_numbers=("NHWC", "HWIO", "NHWC"))
    h2 = jnp.maximum(h2 * params["s2"][0] + params["b2"][0], 0.0)

    h3 = jnp.einsum("nhwp,po->nhwo", h2, params["w3"])
    h3 = h3 * params["s3"][0] + params["b3"][0]
    return jnp.maximum(h3 + x_nhwc, 0.0)


if __name__ == "__main__":
    key = jax.random.PRNGKey(0)
    k_x, k_p = jax.random.split(key)

    N, H, W = 2, 16, 16
    planes = 4
    inplanes = planes * 4  # 16; residual add requires inplanes == planes*4 (downsample=None)

    # PyTorch-style NCHW input, converted to NHWC for the kernel.
    x_nchw = jax.random.normal(k_x, (N, inplanes, H, W), jnp.float32)
    x_nhwc = jnp.transpose(x_nchw, (0, 2, 3, 1))

    params = init_params(k_p, inplanes, planes)
    ref = bottleneck_ref(x_nhwc, params)

    # f32 path: matches the PyTorch f32 module semantics tightly.
    out_f32 = jax.block_until_ready(
        bottleneck_forward(x_nhwc, params, compute_dtype=jnp.float32))
    assert out_f32.shape == (N, H, W, planes * 4)
    assert jnp.allclose(out_f32, ref, atol=1e-3, rtol=1e-3), "f32 Pallas output mismatch"

    # bf16-matmul path (bandwidth-optimized): bf16 inputs/weights, f32 accumulate/post-ops.
    out_bf16 = jax.block_until_ready(
        bottleneck_forward(x_nhwc, params, compute_dtype=jnp.bfloat16))
    assert out_bf16.shape == (N, H, W, planes * 4)
    assert jnp.allclose(out_bf16, ref, atol=1.5e-1, rtol=5e-2), "bf16 Pallas output mismatch"

    print("KERNEL_OK")
</pallas_src>

<mosaic_0001>
module attributes {stable_mosaic.version = 11 : i64} {
  func.func @kernel(%arg0: i32, %arg1: memref<256x16xf32, #tpu.memory_space<vmem>>, %arg2: memref<16x4xf32, #tpu.memory_space<vmem>>, %arg3: memref<1x4xf32, #tpu.memory_space<vmem>>, %arg4: memref<9x4x4xf32, #tpu.memory_space<vmem>>, %arg5: memref<1x4xf32, #tpu.memory_space<vmem>>, %arg6: memref<4x16xf32, #tpu.memory_space<vmem>>, %arg7: memref<1x16xf32, #tpu.memory_space<vmem>>, %arg8: memref<256x2xf32, #tpu.memory_space<vmem>>, %arg9: memref<256x16xf32, #tpu.memory_space<vmem>>, %arg10: memref<304x4xf32, #tpu.memory_space<vmem>>) attributes {dimension_semantics = [#tpu.dimension_semantics<parallel>], iteration_bounds = array<i64: 2>, scalar_prefetch = 0 : i64, scratch_operands = 1 : i64, tpu.core_type = #tpu.core_type<tc>, window_params = [{transform_indices = @transform_0, window_bounds = array<i64: 256, 16>}, {pipeline_mode = #tpu.pipeline_mode<synchronous>, transform_indices = @transform_1, window_bounds = array<i64: 16, 4>}, {pipeline_mode = #tpu.pipeline_mode<synchronous>, transform_indices = @transform_2, window_bounds = array<i64: 1, 4>}, {pipeline_mode = #tpu.pipeline_mode<synchronous>, transform_indices = @transform_3, window_bounds = array<i64: 9, 4, 4>}, {pipeline_mode = #tpu.pipeline_mode<synchronous>, transform_indices = @transform_4, window_bounds = array<i64: 1, 4>}, {pipeline_mode = #tpu.pipeline_mode<synchronous>, transform_indices = @transform_5, window_bounds = array<i64: 4, 16>}, {pipeline_mode = #tpu.pipeline_mode<synchronous>, transform_indices = @transform_6, window_bounds = array<i64: 1, 16>}, {pipeline_mode = #tpu.pipeline_mode<synchronous>, transform_indices = @transform_7, window_bounds = array<i64: 256, 2>}, {transform_indices = @transform_8, window_bounds = array<i64: 256, 16>}]} {
    %c0 = arith.constant 0 : index
    %c0_0 = arith.constant 0 : index
    %0 = vector.load %arg1[%c0, %c0_0] : memref<256x16xf32, #tpu.memory_space<vmem>>, vector<256x16xf32>
    %c0_1 = arith.constant 0 : index
    %c0_2 = arith.constant 0 : index
    %1 = vector.load %arg2[%c0_1, %c0_2] : memref<16x4xf32, #tpu.memory_space<vmem>>, vector<16x4xf32>
    %cst = arith.constant dense<0.000000e+00> : vector<256x4xf32>
    %2 = tpu.matmul %0, %1, %cst {dimension_numbers = #tpu.dot_dimension_numbers<[1], [0], [0], [1], [0, 0, 1, 1], [], []>} : vector<256x16xf32>, vector<16x4xf32>, vector<256x4xf32> -> vector<256x4xf32>
    %c0_3 = arith.constant 0 : index
    %c0_4 = arith.constant 0 : index
    %3 = vector.load %arg3[%c0_3, %c0_4] : memref<1x4xf32, #tpu.memory_space<vmem>>, vector<1x4xf32>
    %4 = vector.broadcast %3 : vector<1x4xf32> to vector<256x4xf32>
    %5 = arith.addf %2, %4 : vector<256x4xf32>
    %cst_5 = arith.constant 0.000000e+00 : f32
    %6 = vector.broadcast %cst_5 : f32 to vector<256x4xf32>
    %7 = arith.maximumf %5, %6 : vector<256x4xf32>
    %cst_6 = arith.constant 0.000000e+00 : f32
    %8 = vector.broadcast %cst_6 : f32 to vector<24x4xf32>
    %c0_7 = arith.constant 0 : index
    %c0_8 = arith.constant 0 : index
    %9 = vector.load %arg10[%c0_7, %c0_8] : memref<304x4xf32, #tpu.memory_space<vmem>>, vector<24x4xf32>
    tpu.vector_store %arg10[%c0_7, %c0_8], %8 {strides = array<i32>} : memref<304x4xf32, #tpu.memory_space<vmem>>, vector<24x4xf32>,
    %c280 = arith.constant 280 : index
    %c0_9 = arith.constant 0 : index
    %10 = vector.load %arg10[%c280, %c0_9] : memref<304x4xf32, #tpu.memory_space<vmem>>, vector<24x4xf32>
    tpu.vector_store %arg10[%c280, %c0_9], %8 {strides = array<i32>} : memref<304x4xf32, #tpu.memory_space<vmem>>, vector<24x4xf32>,
    %c24 = arith.constant 24 : index
    %c0_10 = arith.constant 0 : index
    %11 = vector.load %arg10[%c24, %c0_10] : memref<304x4xf32, #tpu.memory_space<vmem>>, vector<256x4xf32>
    tpu.vector_store %arg10[%c24, %c0_10], %7 {strides = array<i32>} : memref<304x4xf32, #tpu.memory_space<vmem>>, vector<256x4xf32>,
    %c0_11 = arith.constant 0 : index
    %c0_12 = arith.constant 0 : index
    %12 = vector.load %arg8[%c0_11, %c0_12] : memref<256x2xf32, #tpu.memory_space<vmem>>, vector<256x2xf32>
    %13 = vector.extract_strided_slice %12 {offsets = [0, 0], sizes = [256, 1], strides = [1, 1]} : vector<256x2xf32> to vector<256x1xf32>
    %cst_13 = arith.constant 5.000000e-01 : f32
    %14 = vector.broadcast %cst_13 : f32 to vector<256x1xf32>
    %15 = arith.cmpf ogt, %13, %14 : vector<256x1xf32>
    %16 = vector.extract_strided_slice %12 {offsets = [0, 1], sizes = [256, 1], strides = [1, 1]} : vector<256x2xf32> to vector<256x1xf32>
    %cst_14 = arith.constant 5.000000e-01 : f32
    %17 = vector.broadcast %cst_14 : f32 to vector<256x1xf32>
    %18 = arith.cmpf ogt, %16, %17 : vector<256x1xf32>
    %c7 = arith.constant 7 : index
    %c0_15 = arith.constant 0 : index
    %19 = vector.load %arg10[%c7, %c0_15] : memref<304x4xf32, #tpu.memory_space<vmem>>, vector<256x4xf32>
    %c0_i32 = arith.constant 0 : i32
    %20 = arith.sitofp %c0_i32 : i32 to f32
    %21 = vector.shape_cast %15 : vector<256x1xi1> to vector<256x1xi1>
    %22 = vector.broadcast %21 : vector<256x1xi1> to vector<256x4xi1>
    %23 = vector.broadcast %20 : f32 to vector<256x4xf32>
    %24 = arith.select %22, %19, %23 : vector<256x4xi1>, vector<256x4xf32>
    %c0_16 = arith.constant 0 : index
    %c0_17 = arith.constant 0 : index
    %c0_18 = arith.constant 0 : index
    %25 = vector.load %arg4[%c0_16, %c0_17, %c0_18] : memref<9x4x4xf32, #tpu.memory_space<vmem>>, vector<1x4x4xf32>
    %26 = vector.shape_cast %25 : vector<1x4x4xf32> to vector<4x4xf32>
    %cst_19 = arith.constant dense<0.000000e+00> : vector<256x4xf32>
    %27 = tpu.matmul %24, %26, %cst_19 {dimension_numbers = #tpu.dot_dimension_numbers<[1], [0], [0], [1], [0, 0, 1, 1], [], []>} : vector<256x4xf32>, vector<4x4xf32>, vector<256x4xf32> -> vector<256x4xf32>
    %c8 = arith.constant 8 : index
    %c0_20 = arith.constant 0 : index
    %28 = vector.load %arg10[%c8, %c0_20] : memref<304x4xf32, #tpu.memory_space<vmem>>, vector<256x4xf32>
    %c1 = arith.constant 1 : index
    %c0_21 = arith.constant 0 : index
    %c0_22 = arith.constant 0 : index
    %29 = vector.load %arg4[%c1, %c0_21, %c0_22] : memref<9x4x4xf32, #tpu.memory_space<vmem>>, vector<1x4x4xf32>
    %30 = vector.shape_cast %29 : vector<1x4x4xf32> to vector<4x4xf32>
    %cst_23 = arith.constant dense<0.000000e+00> : vector<256x4xf32>
    %31 = tpu.matmul %28, %30, %cst_23 {dimension_numbers = #tpu.dot_dimension_numbers<[1], [0], [0], [1], [0, 0, 1, 1], [], []>} : vector<256x4xf32>, vector<4x4xf32>, vector<256x4xf32> -> vector<256x4xf32>
    %32 = arith.addf %27, %31 : vector<256x4xf32>
    %c9 = arith.constant 9 : index
    %c0_24 = arith.constant 0 : index
    %33 = vector.load %arg10[%c9, %c0_24] : memref<304x4xf32, #tpu.memory_space<vmem>>, vector<256x4xf32>
    %c0_i32_25 = arith.constant 0 : i32
    %34 = arith.sitofp %c0_i32_25 : i32 to f32
    %35 = vector.shape_cast %18 : vector<256x1xi1> to vector<256x1xi1>
    %36 = vector.broadcast %35 : vector<256x1xi1> to vector<256x4xi1>
    %37 = vector.broadcast %34 : f32 to vector<256x4xf32>
    %38 = arith.select %36, %33, %37 : vector<256x4xi1>, vector<256x4xf32>
    %c2 = arith.constant 2 : index
    %c0_26 = arith.constant 0 : index
    %c0_27 = arith.constant 0 : index
    %39 = vector.load %arg4[%c2, %c0_26, %c0_27] : memref<9x4x4xf32, #tpu.memory_space<vmem>>, vector<1x4x4xf32>
    %40 = vector.shape_cast %39 : vector<1x4x4xf32> to vector<4x4xf32>
    %cst_28 = arith.constant dense<0.000000e+00> : vector<256x4xf32>
    %41 = tpu.matmul %38, %40, %cst_28 {dimension_numbers = #tpu.dot_dimension_numbers<[1], [0], [0], [1], [0, 0, 1, 1], [], []>} : vector<256x4xf32>, vector<4x4xf32>, vector<256x4xf32> -> vector<256x4xf32>
    %42 = arith.addf %32, %41 : vector<256x4xf32>
    %c23 = arith.constant 23 : index
    %c0_29 = arith.constant 0 : index
    %43 = vector.load %arg10[%c23, %c0_29] : memref<304x4xf32, #tpu.memory_space<vmem>>, vector<256x4xf32>
    %c0_i32_30 = arith.constant 0 : i32
    %44 = arith.sitofp %c0_i32_30 : i32 to f32
    %45 = vector.shape_cast %15 : vector<256x1xi1> to vector<256x1xi1>
    %46 = vector.broadcast %45 : vector<256x1xi1> to vector<256x4xi1>
    %47 = vector.broadcast %44 : f32 to vector<256x4xf32>
    %48 = arith.select %46, %43, %47 : vector<256x4xi1>, vector<256x4xf32>
    %c3 = arith.constant 3 : index
    %c0_31 = arith.constant 0 : index
    %c0_32 = arith.constant 0 : index
    %49 = vector.load %arg4[%c3, %c0_31, %c0_32] : memref<9x4x4xf32, #tpu.memory_space<vmem>>, vector<1x4x4xf32>
    %50 = vector.shape_cast %49 : vector<1x4x4xf32> to vector<4x4xf32>
    %cst_33 = arith.constant dense<0.000000e+00> : vector<256x4xf32>
    %51 = tpu.matmul %48, %50, %cst_33 {dimension_numbers = #tpu.dot_dimension_numbers<[1], [0], [0], [1], [0, 0, 1, 1], [], []>} : vector<256x4xf32>, vector<4x4xf32>, vector<256x4xf32> -> vector<256x4xf32>
    %52 = arith.addf %42, %51 : vector<256x4xf32>
    %c24_34 = arith.constant 24 : index
    %c0_35 = arith.constant 0 : index
    %53 = vector.load %arg10[%c24_34, %c0_35] : memref<304x4xf32, #tpu.memory_space<vmem>>, vector<256x4xf32>
    %c4 = arith.constant 4 : index
    %c0_36 = arith.constant 0 : index
    %c0_37 = arith.constant 0 : index
    %54 = vector.load %arg4[%c4, %c0_36, %c0_37] : memref<9x4x4xf32, #tpu.memory_space<vmem>>, vector<1x4x4xf32>
    %55 = vector.shape_cast %54 : vector<1x4x4xf32> to vector<4x4xf32>
    %cst_38 = arith.constant dense<0.000000e+00> : vector<256x4xf32>
    %56 = tpu.matmul %53, %55, %cst_38 {dimension_numbers = #tpu.dot_dimension_numbers<[1], [0], [0], [1], [0, 0, 1, 1], [], []>} : vector<256x4xf32>, vector<4x4xf32>, vector<256x4xf32> -> vector<256x4xf32>
    %57 = arith.addf %52, %56 : vector<256x4xf32>
    %c25 = arith.constant 25 : index
    %c0_39 = arith.constant 0 : index
    %58 = vector.load %arg10[%c25, %c0_39] : memref<304x4xf32, #tpu.memory_space<vmem>>, vector<256x4xf32>
    %c0_i32_40 = arith.constant 0 : i32
    %59 = arith.sitofp %c0_i32_40 : i32 to f32
    %60 = vector.shape_cast %18 : vector<256x1xi1> to vector<256x1xi1>
    %61 = vector.broadcast %60 : vector<256x1xi1> to vector<256x4xi1>
    %62 = vector.broadcast %59 : f32 to vector<256x4xf32>
    %63 = arith.select %61, %58, %62 : vector<256x4xi1>, vector<256x4xf32>
    %c5 = arith.constant 5 : index
    %c0_41 = arith.constant 0 : index
    %c0_42 = arith.constant 0 : index
    %64 = vector.load %arg4[%c5, %c0_41, %c0_42] : memref<9x4x4xf32, #tpu.memory_space<vmem>>, vector<1x4x4xf32>
    %65 = vector.shape_cast %64 : vector<1x4x4xf32> to vector<4x4xf32>
    %cst_43 = arith.constant dense<0.000000e+00> : vector<256x4xf32>
    %66 = tpu.matmul %63, %65, %cst_43 {dimension_numbers = #tpu.dot_dimension_numbers<[1], [0], [0], [1], [0, 0, 1, 1], [], []>} : vector<256x4xf32>, vector<4x4xf32>, vector<256x4xf32> -> vector<256x4xf32>
    %67 = arith.addf %57, %66 : vector<256x4xf32>
    %c39 = arith.constant 39 : index
    %c0_44 = arith.constant 0 : index
    %68 = vector.load %arg10[%c39, %c0_44] : memref<304x4xf32, #tpu.memory_space<vmem>>, vector<256x4xf32>
    %c0_i32_45 = arith.constant 0 : i32
    %69 = arith.sitofp %c0_i32_45 : i32 to f32
    %70 = vector.shape_cast %15 : vector<256x1xi1> to vector<256x1xi1>
    %71 = vector.broadcast %70 : vector<256x1xi1> to vector<256x4xi1>
    %72 = vector.broadcast %69 : f32 to vector<256x4xf32>
    %73 = arith.select %71, %68, %72 : vector<256x4xi1>, vector<256x4xf32>
    %c6 = arith.constant 6 : index
    %c0_46 = arith.constant 0 : index
    %c0_47 = arith.constant 0 : index
    %74 = vector.load %arg4[%c6, %c0_46, %c0_47] : memref<9x4x4xf32, #tpu.memory_space<vmem>>, vector<1x4x4xf32>
    %75 = vector.shape_cast %74 : vector<1x4x4xf32> to vector<4x4xf32>
    %cst_48 = arith.constant dense<0.000000e+00> : vector<256x4xf32>
    %76 = tpu.matmul %73, %75, %cst_48 {dimension_numbers = #tpu.dot_dimension_numbers<[1], [0], [0], [1], [0, 0, 1, 1], [], []>} : vector<256x4xf32>, vector<4x4xf32>, vector<256x4xf32> -> vector<256x4xf32>
    %77 = arith.addf %67, %76 : vector<256x4xf32>
    %c40 = arith.constant 40 : index
    %c0_49 = arith.constant 0 : index
    %78 = vector.load %arg10[%c40, %c0_49] : memref<304x4xf32, #tpu.memory_space<vmem>>, vector<256x4xf32>
    %c7_50 = arith.constant 7 : index
    %c0_51 = arith.constant 0 : index
    %c0_52 = arith.constant 0 : index
    %79 = vector.load %arg4[%c7_50, %c0_51, %c0_52] : memref<9x4x4xf32, #tpu.memory_space<vmem>>, vector<1x4x4xf32>
    %80 = vector.shape_cast %79 : vector<1x4x4xf32> to vector<4x4xf32>
    %cst_53 = arith.constant dense<0.000000e+00> : vector<256x4xf32>
    %81 = tpu.matmul %78, %80, %cst_53 {dimension_numbers = #tpu.dot_dimension_numbers<[1], [0], [0], [1], [0, 0, 1, 1], [], []>} : vector<256x4xf32>, vector<4x4xf32>, vector<256x4xf32> -> vector<256x4xf32>
    %82 = arith.addf %77, %81 : vector<256x4xf32>
    %c41 = arith.constant 41 : index
    %c0_54 = arith.constant 0 : index
    %83 = vector.load %arg10[%c41, %c0_54] : memref<304x4xf32, #tpu.memory_space<vmem>>, vector<256x4xf32>
    %c0_i32_55 = arith.constant 0 : i32
    %84 = arith.sitofp %c0_i32_55 : i32 to f32
    %85 = vector.shape_cast %18 : vector<256x1xi1> to vector<256x1xi1>
    %86 = vector.broadcast %85 : vector<256x1xi1> to vector<256x4xi1>
    %87 = vector.broadcast %84 : f32 to vector<256x4xf32>
    %88 = arith.select %86, %83, %87 : vector<256x4xi1>, vector<256x4xf32>
    %c8_56 = arith.constant 8 : index
    %c0_57 = arith.constant 0 : index
    %c0_58 = arith.constant 0 : index
    %89 = vector.load %arg4[%c8_56, %c0_57, %c0_58] : memref<9x4x4xf32, #tpu.memory_space<vmem>>, vector<1x4x4xf32>
    %90 = vector.shape_cast %89 : vector<1x4x4xf32> to vector<4x4xf32>
    %cst_59 = arith.constant dense<0.000000e+00> : vector<256x4xf32>
    %91 = tpu.matmul %88, %90, %cst_59 {dimension_numbers = #tpu.dot_dimension_numbers<[1], [0], [0], [1], [0, 0, 1, 1], [], []>} : vector<256x4xf32>, vector<4x4xf32>, vector<256x4xf32> -> vector<256x4xf32>
    %92 = arith.addf %82, %91 : vector<256x4xf32>
    %c0_60 = arith.constant 0 : index
    %c0_61 = arith.constant 0 : index
    %93 = vector.load %arg5[%c0_60, %c0_61] : memref<1x4xf32, #tpu.memory_space<vmem>>, vector<1x4xf32>
    %94 = vector.broadcast %93 : vector<1x4xf32> to vector<256x4xf32>
    %95 = arith.addf %92, %94 : vector<256x4xf32>
    %cst_62 = arith.constant 0.000000e+00 : f32
    %96 = vector.broadcast %cst_62 : f32 to vector<256x4xf32>
    %97 = arith.maximumf %95, %96 : vector<256x4xf32>
    %c0_63 = arith.constant 0 : index
    %c0_64 = arith.constant 0 : index
    %98 = vector.load %arg6[%c0_63, %c0_64] : memref<4x16xf32, #tpu.memory_space<vmem>>, vector<4x16xf32>
    %cst_65 = arith.constant dense<0.000000e+00> : vector<256x16xf32>
    %99 = tpu.matmul %97, %98, %cst_65 {dimension_numbers = #tpu.dot_dimension_numbers<[1], [0], [0], [1], [0, 0, 1, 1], [], []>} : vector<256x4xf32>, vector<4x16xf32>, vector<256x16xf32> -> vector<256x16xf32>
    %c0_66 = arith.constant 0 : index
    %c0_67 = arith.constant 0 : index
    %100 = vector.load %arg7[%c0_66, %c0_67] : memref<1x16xf32, #tpu.memory_space<vmem>>, vector<1x16xf32>
    %101 = vector.broadcast %100 : vector<1x16xf32> to vector<256x16xf32>
    %102 = arith.addf %99, %101 : vector<256x16xf32>
    %103 = arith.addf %102, %0 : vector<256x16xf32>
    %cst_68 = arith.constant 0.000000e+00 : f32
    %104 = vector.broadcast %cst_68 : f32 to vector<256x16xf32>
    %105 = arith.maximumf %103, %104 : vector<256x16xf32>
    %c0_69 = arith.constant 0 : index
    %c0_70 = arith.constant 0 : index
    %106 = vector.load %arg9[%c0_69, %c0_70] : memref<256x16xf32, #tpu.memory_space<vmem>>, vector<256x16xf32>
    tpu.vector_store %arg9[%c0_69, %c0_70], %105 {strides = array<i32>} : memref<256x16xf32, #tpu.memory_space<vmem>>, vector<256x16xf32>,
    return
  }
  func.func @transform_0(%arg0: i32) -> (i32, i32) {
    %c0_i32 = arith.constant 0 : i32
    %c0_i32_0 = arith.constant 0 : i32
    return %arg0, %c0_i32 : i32, i32
  }
  func.func @transform_1(%arg0: i32) -> (i32, i32) {
    %c0_i32 = arith.constant 0 : i32
    %c0_i32_0 = arith.constant 0 : i32
    %c0_i32_1 = arith.constant 0 : i32
    return %c0_i32, %c0_i32_0 : i32, i32
  }
  func.func @transform_2(%arg0: i32) -> (i32, i32) {
    %c0_i32 = arith.constant 0 : i32
    %c0_i32_0 = arith.constant 0 : i32
    %c0_i32_1 = arith.constant 0 : i32
    return %c0_i32, %c0_i32_0 : i32, i32
  }
  func.func @transform_3(%arg0: i32) -> (i32, i32, i32) {
    %c0_i32 = arith.constant 0 : i32
    %c0_i32_0 = arith.constant 0 : i32
    %c0_i32_1 = arith.constant 0 : i32
    %c0_i32_2 = arith.constant 0 : i32
    return %c0_i32, %c0_i32_0, %c0_i32_1 : i32, i32, i32
  }
  func.func @transform_4(%arg0: i32) -> (i32, i32) {
    %c0_i32 = arith.constant 0 : i32
    %c0_i32_0 = arith.constant 0 : i32
    %c0_i32_1 = arith.constant 0 : i32
    return %c0_i32, %c0_i32_0 : i32, i32
  }
  func.func @transform_5(%arg0: i32) -> (i32, i32) {
    %c0_i32 = arith.constant 0 : i32
    %c0_i32_0 = arith.constant 0 : i32
    %c0_i32_1 = arith.constant 0 : i32
    return %c0_i32, %c0_i32_0 : i32, i32
  }
  func.func @transform_6(%arg0: i32) -> (i32, i32) {
    %c0_i32 = arith.constant 0 : i32
    %c0_i32_0 = arith.constant 0 : i32
    %c0_i32_1 = arith.constant 0 : i32
    return %c0_i32, %c0_i32_0 : i32, i32
  }
  func.func @transform_7(%arg0: i32) -> (i32, i32) {
    %c0_i32 = arith.constant 0 : i32
    %c0_i32_0 = arith.constant 0 : i32
    %c0_i32_1 = arith.constant 0 : i32
    return %c0_i32, %c0_i32_0 : i32, i32
  }
  func.func @transform_8(%arg0: i32) -> (i32, i32) {
    %c0_i32 = arith.constant 0 : i32
    %c0_i32_0 = arith.constant 0 : i32
    return %arg0, %c0_i32 : i32, i32
  }
}

</mosaic_0001>

<bundles_post_ra>
// kernel: tpu_custom_call.1
= control target key start
LH: loop header
LB: loop body
LE: loop exit
PB: predicated region body
PF: predicated region fallthrough
CT: control target
= control target key end

     0   :  { %s4576_s27 = smov 0   ;;  %s6796_s0 = inlined_call_operand.vmem [shape: f32[512,16], index: 0, kind: input, shape index: {}]   ;;  %s6797_s1 = inlined_call_operand.vmem [shape: f32[16,4], index: 1, kind: input, shape index: {}]   ;;  %s6798_s2 = inlined_call_operand.vmem [shape: f32[1,4], index: 2, kind: input, shape index: {}]   ;;  %s6799_s3 = inlined_call_operand.vmem [shape: f32[9,4,4], index: 3, kind: input, shape index: {}]   ;;  %s6800_s4 = inlined_call_operand.vmem [shape: f32[1,4], index: 4, kind: input, shape index: {}]   ;;  %s6801_s5 = inlined_call_operand.vmem [shape: f32[4,16], index: 5, kind: input, shape index: {}]   ;;  %s6802_s6 = inlined_call_operand.vmem [shape: f32[1,16], index: 6, kind: input, shape index: {}]   ;;  %s6803_s7 = inlined_call_operand.vmem [shape: f32[256,2], index: 7, kind: input, shape index: {}]   ;;  %s6804_s8 = inlined_call_operand.vmem [shape: f32[512,16], index: 8, kind: output, shape index: {}]  }
   0x1 LB: > { %s4047_s28 = sadd.s32 4294967295, %s4526_s27   ;;  %p4051_p0 = scmp.ge.s32.totalorder %s4526_s27, 1  ;;  %s4526_s27 = sphi %s4576_s27, %s18_s27  }
   0x2   : > { %p263_p1 = scmp.lt.s32.totalorder %s4526_s27, 3 }
   0x4   : > { %p264_p2 = pnand %p4051_p0, %p263_p1 }
   0x6   : > { %267 = sbr.rel (%p264_p2) target bundleno = 1183 (0x49f), region = 52 }
   0xb   : > { %v640_v0 = vld [vmem:[%s6803_s7 + $0x60] sm:$0xff]  ;;  %v638_v1 = vld [vmem:[%s6803_s7 + $0x50] sm:$0xff]  ;;  %s4052_s13 = sshll.u32 %s4047_s28, 5  ;;  %v4528_v3 = vmov 0   ;;  %v342_v4 = vld [vmem:[%s6797_s1 + $0x8] sm:$0xff]  ;;  %vm6836_vm3 = vcmask 130048  }
   0xc   : > { %v636_v2 = vld [vmem:[%s6803_s7 + $0x40] sm:$0xff]  ;;  %4444 = vset.pattern.permute.xlu2 %v4528_v3  ;;  %4443 = vset.pattern.permute.xlu1 %v4528_v3  ;;  %vm672_vm0 = vcmp.gt.f32.partialorder %v640_v0, 0.5  ;;  %vm670_vm1 = vcmp.gt.f32.partialorder %v638_v1, 0.5  ;;  %p298_p3 = scmp.lt.s32.totalorder %s4052_s13, 63  ;;  %v641_v9 = vld [vmem:[%s6803_s7 + $0x68] sm:$0xff]  ;;  %v639_v10 = vld [vmem:[%s6803_s7 + $0x58] sm:$0xff] }
   0xd   : > { %vm668_vm2 = vcmp.gt.f32.partialorder %v636_v2, 0.5  ;;  %v341_v5 = vld [vmem:[%s6797_s1] sm:$0xff]  ;;  %4442 = vset.pattern.permute.xlu0 %v4528_v3  ;;  %v4603_v6 = vsel %vm672_vm0, 1, %v4528_v3  ;;  %v4606_v7 = vsel %vm670_vm1, 1, %v4528_v3  ;;  %458 = vmatpush.msra.mxu0 %v342_v4  ;;  %v637_v11 = vld [vmem:[%s6803_s7 + $0x48] sm:$0xff]  ;;  %vm673_vm4 = vcmp.gt.f32.partialorder %v641_v9, 0.5 }
   0xe   : > { %v4609_v8 = vsel %vm668_vm2, 1, %v4528_v3  ;;  %793 = vperm.xlu2 %4444, %v4603_v6   ;;  %787 = vperm.xlu1 %4443, %v4606_v7   ;;  %s7247_s13 = smov (!%p298_p3, %s4052_s13), 63  ;;  %vm671_vm5 = vcmp.gt.f32.partialorder %v639_v10, 0.5  ;;  %vm669_vm6 = vcmp.gt.f32.partialorder %v637_v11, 0.5  ;;  %v4636_v13 = vsel %vm673_vm4, 1, %v4528_v3  ;;  %v644_v16 = vld [vmem:[%s6803_s7 + $0x80] sm:$0xff] }
   0xf   : > { %781 = vperm.xlu0 %4442, %v4609_v8   ;;  %459 = vmatpush.msra.mxu0 %v341_v5  ;;  %s4053_s24 = sshll.u32 %s7247_s13, 3  ;;  %v4639_v14 = vsel %vm671_vm5, 1, %v4528_v3  ;;  %v4642_v15 = vsel %vm669_vm6, 1, %v4528_v3  ;;  %v643_v17 = vld [vmem:[%s6803_s7 + $0x78] sm:$0xff]  ;;  %v642_v18 = vld [vmem:[%s6803_s7 + $0x70] sm:$0xff]  ;;  %vm676_vm7 = vcmp.gt.f32.partialorder %v644_v16, 0.5 }
  0x10   : > { %s4631_s28 = scalar_lea.vmem %s6796_s0, %s4053_s24  ;;  %vm675_vm8 = vcmp.gt.f32.partialorder %v643_v17, 0.5  ;;  %vm674_vm9 = vcmp.gt.f32.partialorder %v642_v18, 0.5  ;;  %v4659_v20 = vsel %vm676_vm7, 1, %v4528_v3  ;;  %v647_v23 = vld [vmem:[%s6803_s7 + $0x98] sm:$0xff]  ;;  %v646_v24 = vld [vmem:[%s6803_s7 + $0x90] sm:$0xff]  ;;  %v645_v25 = vld [vmem:[%s6803_s7 + $0x88] sm:$0xff]  ;;  %s6610_s18 = scalar_lea.vmem %s6804_s8, %s4053_s24 }
  0x11   : > { %v309_v12 = vld [vmem:[%s4631_s28] sm:$0xff]  ;;  %v310_v19 = vld [vmem:[%s4631_s28 + $0x8] sm:$0xff]  ;;  %v4662_v21 = vsel %vm675_vm8, 1, %v4528_v3  ;;  %v4665_v22 = vsel %vm674_vm9, 1, %v4528_v3  ;;  %v311_v26 = vld [vmem:[%s4631_s28 + $0x10] sm:$0xff]  ;;  %vm679_vm10 = vcmp.gt.f32.partialorder %v647_v23, 0.5 }
  0x12   : > { %4056 = vmatmul.msk.f32.vlgmr.msra.gmra.mxu0 %vm6836_vm3, %v309_v12  ;;  %vm678_vm11 = vcmp.gt.f32.partialorder %v646_v24, 0.5  ;;  %vm677_vm12 = vcmp.gt.f32.partialorder %v645_v25, 0.5  ;;  %v4682_v27 = vsel %vm679_vm10, 1, %v4528_v3  ;;  %v650_v30 = vld [vmem:[%s6803_s7 + $0xb0] sm:$0xff]  ;;  %v649_v31 = vld [vmem:[%s6803_s7 + $0xa8] sm:$0xff]  ;;  %v648_v32 = vld [vmem:[%s6803_s7 + $0xa0] sm:$0xff] }
  0x13   : > { %v4685_v28 = vsel %vm678_vm11, 1, %v4528_v3  ;;  %v4688_v29 = vsel %vm677_vm12, 1, %v4528_v3  ;;  %v312_v33 = vld [vmem:[%s4631_s28 + $0x18] sm:$0xff]  ;;  %vm682_vm13 = vcmp.gt.f32.partialorder %v650_v30, 0.5  ;;  %vm681_vm14 = vcmp.gt.f32.partialorder %v649_v31, 0.5  ;;  %v653_v37 = vld [vmem:[%s6803_s7 + $0xc8] sm:$0xff] }
  0x14   : > { %vm680_vm15 = vcmp.gt.f32.partialorder %v648_v32, 0.5  ;;  %v4705_v34 = vsel %vm682_vm13, 1, %v4528_v3  ;;  %v4708_v35 = vsel %vm681_vm14, 1, %v4528_v3  ;;  %v652_v38 = vld [vmem:[%s6803_s7 + $0xc0] sm:$0xff]  ;;  %v651_v39 = vld [vmem:[%s6803_s7 + $0xb8] sm:$0xff]  ;;  %vm685_vm0 = vcmp.gt.f32.partialorder %v653_v37, 0.5 }
  0x15   : > { %v4711_v36 = vsel %vm680_vm15, 1, %v4528_v3  ;;  %v313_v40 = vld [vmem:[%s4631_s28 + $0x20] sm:$0xff]  ;;  %vm684_vm1 = vcmp.gt.f32.partialorder %v652_v38, 0.5  ;;  %vm683_vm2 = vcmp.gt.f32.partialorder %v651_v39, 0.5  ;;  %v4728_v41 = vsel %vm685_vm0, 1, %v4528_v3  ;;  %v654_v44 = vld [vmem:[%s6803_s7 + $0xd0] sm:$0xff] }
  0x16   : > { %796 = vperm.xlu2 %4444, %v4636_v13   ;;  %790 = vperm.xlu1 %4443, %v4639_v14   ;;  %v4731_v42 = vsel %vm684_vm1, 1, %v4528_v3  ;;  %v4734_v43 = vsel %vm683_vm2, 1, %v4528_v3  ;;  %v314_v45 = vld [vmem:[%s4631_s28 + $0x28] sm:$0xff]  ;;  %vm686_vm4 = vcmp.gt.f32.partialorder %v654_v44, 0.5  ;;  %v655_v47 = vld [vmem:[%s6803_s7 + $0xd8] sm:$0xff]  ;;  %v4529_v48 = vmov 1  }
  0x17   : > { %784 = vperm.xlu0 %4442, %v4642_v15   ;;  %v4745_v46 = vsel %vm686_vm4, 1, %v4528_v3  ;;  %v315_v49 = vld [vmem:[%s4631_s28 + $0x30] sm:$0xff]  ;;  %vm687_vm5 = vcmp.gt.f32.partialorder %v655_v47, 0.5  ;;  %v656_v50 = vld [vmem:[%s6803_s7 + $0xe0] sm:$0xff]  ;;  %v657_v53 = vld [vmem:[%s6803_s7 + $0xe8] sm:$0xff]  ;;  %vm589_vm14 = vcmask 31744  }
  0x18   : > { %v4761_v51 = vsel %vm687_vm5, 1, %v4528_v3  ;;  %vm688_vm6 = vcmp.gt.f32.partialorder %v656_v50, 0.5  ;;  %v316_v54 = vld [vmem:[%s4631_s28 + $0x38] sm:$0xff]  ;;  %vm689_vm7 = vcmp.gt.f32.partialorder %v657_v53, 0.5  ;;  %v658_v56 = vld [vmem:[%s6803_s7 + $0xf0] sm:$0xff]  ;;  %v317_v57 = vld [vmem:[%s4631_s28 + $0x40] sm:$0xff] }
  0x19   : > { %v4765_v52 = vsel %vm688_vm6, 1, %v4528_v3  ;;  %v4776_v55 = vsel %vm689_vm7, 1, %v4528_v3  ;;  %vm690_vm8 = vcmp.gt.f32.partialorder %v658_v56, 0.5  ;;  %v659_v59 = vld [vmem:[%s6803_s7 + $0xf8] sm:$0xff]  ;;  %v318_v60 = vld [vmem:[%s4631_s28 + $0x48] sm:$0xff]  ;;  %v630_v61 = vld [vmem:[%s6803_s7 + $0x10] sm:$0xff] }
  0x1a   : > { %4057 = vmatmul.msk.f32.gmra.mxu0 %vm6836_vm3, %v310_v19  ;;  %v4790_v58 = vsel %vm690_vm8, 1, %v4528_v3  ;;  %vm691_vm9 = vcmp.gt.f32.partialorder %v659_v59, 0.5  ;;  %vm662_vm10 = vcmp.gt.f32.partialorder %v630_v61, 0.5  ;;  %v319_v0 = vld [vmem:[%s4631_s28 + $0x50] sm:$0xff]  ;;  %v628_v1 = vld [vmem:[%s6803_s7] sm:$0xff]  ;;  %v320_v4 = vld [vmem:[%s4631_s28 + $0x58] sm:$0xff] }
  0x1b   : > { %v4804_v62 = vsel %vm691_vm9, 1, %v4528_v3  ;;  %v4810_v63 = vsel %vm662_vm10, 1, %v4528_v3  ;;  %vm660_vm11 = vcmp.gt.f32.partialorder %v628_v1, 0.5  ;;  %v321_v9 = vld [vmem:[%s4631_s28 + $0x60] sm:$0xff]  ;;  %v631_v12 = vld [vmem:[%s6803_s7 + $0x18] sm:$0xff]  ;;  %v633_v23 = vld [vmem:[%s6803_s7 + $0x28] sm:$0xff] }
  0x1c   : > { %v724_v2 = vsel %vm660_vm11, 1, %v4528_v3  ;;  %vm663_vm15 = vcmp.gt.f32.partialorder %v631_v12, 0.5  ;;  %v632_v17 = vld [vmem:[%s6803_s7 + $0x20] sm:$0xff]  ;;  %vm665_vm1 = vcmp.gt.f32.partialorder %v633_v23, 0.5  ;;  %v327_v53 = vld [vmem:[%s4631_s28 + $0x90] sm:$0xff]  ;;  %vm1047_vm4 = vcmask 1043456  }
  0x1d   : > { %v727_v16 = vsel %vm663_vm15, 1, %v4528_v3  ;;  %vm664_vm0 = vcmp.gt.f32.partialorder %v632_v17, 0.5  ;;  %v4910_v30 = vld [vmem:[%s6798_s2] ss:$0 sm:$0xff]  ;;  %v330_v17 = vld [vmem:[%s4631_s28 + $0xa8] sm:$0xff] }
  0x1e   : > { %805 = vperm.xlu2 %4444, %v4659_v20   ;;  %802 = vperm.xlu1 %4443, %v4662_v21  }
  0x1f   : > { %799 = vperm.xlu0 %4442, %v4665_v22  }
  0x22   : > { %4058 = vmatmul.msk.f32.gmra.mxu0 %vm6836_vm3, %v311_v26  ;;  %v324_v26 = vld [vmem:[%s4631_s28 + $0x78] sm:$0xff] }
  0x26   : > { %814 = vperm.xlu2 %4444, %v4682_v27   ;;  %811 = vperm.xlu1 %4443, %v4685_v28  }
  0x27   : > { %808 = vperm.xlu0 %4442, %v4688_v29  }
  0x2a   : > { %4059 = vmatmul.msk.f32.gmra.mxu0 %vm6836_vm3, %v312_v33 }
  0x2e   : > { %823 = vperm.xlu2 %4444, %v4705_v34   ;;  %820 = vperm.xlu1 %4443, %v4708_v35  }
  0x2f   : > { %817 = vperm.xlu0 %4442, %v4711_v36  }
  0x32   : > { %4060 = vmatmul.msk.f32.gmra.mxu0 %vm6836_vm3, %v313_v40 }
  0x36   : > { %832 = vperm.xlu2 %4444, %v4728_v41   ;;  %829 = vperm.xlu1 %4443, %v4731_v42  }
  0x37   : > { %826 = vperm.xlu0 %4442, %v4734_v43  }
  0x3a   : > { %4061 = vmatmul.msk.f32.gmra.mxu0 %vm6836_vm3, %v314_v45  ;;  %v326_v45 = vld [vmem:[%s4631_s28 + $0x88] sm:$0xff] }
  0x3e   : > { %4446 = vset.pattern.permute.xlu2 %v4529_v48  ;;  %835 = vperm.xlu1 %4443, %v4745_v46  }
  0x3f   : > { %4445 = vset.pattern.permute.xlu0 %v4529_v48  ;;  %1436 = vperm.xlu2 %4446, %v4642_v15   ;;  %v322_v15 = vld [vmem:[%s4631_s28 + $0x68] sm:$0xff] }
  0x40   : > { %1433 = vperm.xlu0 %4445, %v4609_v8  }
  0x42   : > { %4062 = vmatmul.msk.f32.gmra.mxu0 %vm6836_vm3, %v315_v49 }
  0x46   : > { %838 = vperm.xlu1 %4443, %v4761_v51  }
  0x47   : > { %1439 = vperm.xlu2 %4446, %v4606_v7   ;;  %v635_v7 = vld [vmem:[%s6803_s7 + $0x38] sm:$0xff] }
  0x48   : > { %4447 = vset.pattern.permute.xlu0 %v4528_v3  ;;  %vm667_vm13 = vcmp.gt.f32.partialorder %v635_v7, 0.5 }
  0x49   : > { %841 = vperm.xlu0 %4447, %v4765_v52   ;;  %v4846_v11 = vsel %vm667_vm13, 1, %v4528_v3 }
  0x4a   : > { %4063 = vmatmul.msk.f32.gmra.mxu0 %vm6836_vm3, %v316_v54 }
  0x4e   : > { %4448 = vset.pattern.permute.xlu1 %v4529_v48 }
  0x4f   : > { %1442 = vperm.xlu1 %4448, %v4639_v14   ;;  %4449 = vset.pattern.permute.xlu2 %v4528_v3 }
  0x50   : > { %844 = vperm.xlu2 %4449, %v4776_v55  }
  0x51   : > { %4450 = vset.pattern.permute.xlu0 %v4529_v48 }
  0x52   : > { %1448 = vperm.xlu0 %4450, %v4636_v13   ;;  %4064 = vmatmul.msk.f32.gmra.mxu0 %vm6836_vm3, %v317_v57  ;;  %v4530_v13 = vmov 0.0  }
  0x53   : > { %590 = vst.msk [vmem:[#allocation2] sm:$0xff] %vm589_vm14, %v4530_v13 }
  0x54   : > { %591 = vst.msk [vmem:[#allocation2 + $0x8] sm:$0xff] %vm589_vm14, %v4530_v13 }
  0x55   : > { %592 = vst.msk [vmem:[#allocation2 + $0x10] sm:$0xff] %vm589_vm14, %v4530_v13 }
  0x56   : > { %593 = vst.msk [vmem:[#allocation2 + $0x118] sm:$0xff] %vm589_vm14, %v4530_v13 }
  0x57   : > { %1445 = vperm.xlu1 %4448, %v4603_v6   ;;  %v629_v6 = vld [vmem:[%s6803_s7 + $0x8] sm:$0xff]  ;;  %594 = vst.msk [vmem:[#allocation2 + $0x120] sm:$0xff] %vm589_vm14, %v4530_v13 }
  0x58   : > { %847 = vperm.xlu2 %4449, %v4790_v58   ;;  %vm661_vm12 = vcmp.gt.f32.partialorder %v629_v6, 0.5  ;;  %595 = vst.msk [vmem:[#allocation2 + $0x128] sm:$0xff] %vm589_vm14, %v4530_v13  ;;  %v329_v6 = vld [vmem:[%s4631_s28 + $0xa0] sm:$0xff]  ;;  %v4189_v13 = vld [vmem:[%s6799_s3 + $0xc] sm:$0xf] }
  0x59   : > { %v4837_v8 = vsel %vm661_vm12, 1, %v4528_v3 }
  0x5a   : > { %1457 = vperm.xlu0 %4450, %v4659_v20   ;;  %4065 = vmatmul.msk.f32.gmra.mxu0 %vm6836_vm3, %v318_v60  ;;  %v323_v20 = vld [vmem:[%s4631_s28 + $0x70] sm:$0xff] }
  0x5f   : > { %4451 = vset.pattern.permute.xlu1 %v4528_v3 }
  0x60   : > { %850 = vperm.xlu1 %4451, %v4804_v62   ;;  %4452 = vset.pattern.permute.xlu2 %v4529_v48 }
  0x61   : > { %1451 = vperm.xlu2 %4452, %v4665_v22   ;;  %v4882_v22 = vsel %vm664_vm0, 1, %v4528_v3 }
  0x62   : > { %4457 = vset.pattern.permute.xlu0 %v4528_v3  ;;  %4066 = vmatmul.msk.f32.gmra.mxu0 %vm6836_vm3, %v319_v0 }
  0x63   : > { %763 = vperm.xlu0 %4457, %v4810_v63  }
  0x68   : > { %4453 = vset.pattern.permute.xlu1 %v4529_v48  ;;  %v4823_v5 = vpop.permute.xlu2 %793 }
  0x69   : > { %6918 = vst [vmem:[#allocation3_spill] sm:$0xff] %v4823_v5  ;;  %1454 = vperm.xlu1 %4453, %v4662_v21   ;;  %4454 = vset.pattern.permute.xlu2 %v4528_v3 }
  0x6a   : > { %757 = vperm.xlu2 %4454, %v724_v2   ;;  %4067 = vmatmul.msk.f32.gmra.mxu0 %vm6836_vm3, %v320_v4 }
  0x6b   : > { %4460 = vset.pattern.permute.xlu0 %v4529_v48 }
  0x6c   : > { %1469 = vperm.xlu0 %4460, %v4711_v36   ;;  %v325_v36 = vld [vmem:[%s4631_s28 + $0x80] sm:$0xff] }
  0x70   : > { %v4840_v10 = vpop.permute.xlu2 %796 }
  0x71   : > { %6919 = vst [vmem:[#allocation4_spill] sm:$0xff] %v4840_v10  ;;  %4455 = vset.pattern.permute.xlu1 %v4528_v3 }
  0x72   : > { %760 = vperm.xlu1 %4455, %v4837_v8   ;;  %4456 = vset.pattern.permute.xlu2 %v4529_v48 }
  0x73   : > { %1460 = vperm.xlu2 %4456, %v4688_v29   ;;  %4068 = vmatmul.msk.f32.gmra.mxu0 %vm6836_vm3, %v321_v9  ;;  %v634_v29 = vld [vmem:[%s6803_s7 + $0x30] sm:$0xff] }
  0x74   : > { %4463 = vset.pattern.permute.xlu0 %v4528_v3  ;;  %vm666_vm2 = vcmp.gt.f32.partialorder %v634_v29, 0.5 }
  0x75   : > { %778 = vperm.xlu0 %4463, %v4846_v11   ;;  %v730_v39 = vsel %vm666_vm2, 1, %v4528_v3 }
  0x78   : > { %v4857_v14 = vpop.permute.xlu2 %805 }
  0x79   : > { %6920 = vst [vmem:[#allocation5_spill] sm:$0xff] %v4857_v14 }
  0x7a   : > { %4458 = vset.pattern.permute.xlu1 %v4529_v48 }
  0x7b   : > { %1463 = vperm.xlu1 %4458, %v4685_v28   ;;  %4459 = vset.pattern.permute.xlu2 %v4528_v3 }
  0x7c   : > { %4069 = vmatmul.msk.f32.gmra.mxu0 %vm6836_vm3, %v322_v15  ;;  %766 = vperm.xlu2 %4459, %v727_v16   ;;  %v4993_v15 = vld [vmem:[%s6799_s3 + $0x8] sm:$0xf] }
  0x7d   : > { %4465 = vset.pattern.permute.xlu0 %v4529_v48  ;;  %4430 = vmatpush.msk.msra.mxu3 %vm1047_vm4, %v4993_v15 }
  0x7e   : > { %1490 = vperm.xlu0 %4465, %v4761_v51  }
  0x80   : > { %v4874_v18 = vpop.permute.xlu2 %814  ;;  %v4876_v19 = vpop.permute.xlu1 %787 }
  0x81   : > { %6921 = vst [vmem:[#allocation6_spill] sm:$0xff] %v4874_v18  ;;  %v4879_v21 = vpop.permute.xlu0 %781  ;;  %vm6809_vm11 = vcmp.eq.s32.totalorder %v4876_v19, 1 }
  0x82   : > { %6922 = vst [vmem:[#allocation7_spill] sm:$0xff] %v4876_v19  ;;  %vm6822_vm6 = vcmp.eq.s32.totalorder %v4879_v21, 1 }
  0x83   : > { %1466 = vperm.xlu1 %4458, %v4682_v27   ;;  %v4898_v27 = vsel %vm665_vm1, 1, %v4528_v3 }
  0x84   : > { %4070 = vmatmul.msk.f32.gmra.mxu0 %vm6836_vm3, %v323_v20  ;;  %769 = vperm.xlu2 %4459, %v4882_v22  }
  0x86   : > { %1409 = vperm.xlu0 %4465, %v724_v2   ;;  %v4223_v2 = vld [vmem:[%s6799_s3 + $0x10] sm:$0xf] }
  0x88   : > { %v4890_v24 = vpop.permute.xlu2 %823  ;;  %v4892_v25 = vpop.permute.xlu1 %790 }
  0x89   : > { %6923 = vst [vmem:[#allocation8_spill] sm:$0xff] %v4890_v24  ;;  %v4895_v28 = vpop.permute.xlu0 %784  ;;  %vm6806_vm0 = vcmp.eq.s32.totalorder %v4892_v25, 1 }
  0x8a   : > { %6924 = vst [vmem:[#allocation9_spill] sm:$0xff] %v4892_v25  ;;  %vm6818_vm8 = vcmp.eq.s32.totalorder %v4895_v28, 1  ;;  %v338_v25 = vld [vmem:[%s4631_s28 + $0xe8] sm:$0xff] }
  0x8b   : > { %6925 = vst [vmem:[#allocation10_spill] sm:$0xff] %v4895_v28  ;;  %4461 = vset.pattern.permute.xlu1 %v4528_v3 }
  0x8c   : > { %4071 = vmatmul.msk.f32.gmra.mxu0 %vm6836_vm3, %v324_v26  ;;  %772 = vperm.xlu1 %4461, %v4898_v27  }
  0x8d   : > { %4462 = vset.pattern.permute.xlu2 %v4529_v48 }
  0x8e   : > { %1418 = vperm.xlu0 %4465, %v727_v16   ;;  %1472 = vperm.xlu2 %4462, %v4708_v35  }
  0x8f   : > { %v461_v31 = vpop.f32.mrf.mxu0 }
  0x90   : > { %v4913_v32 = vpop.permute.xlu2 %832  ;;  %v462_v33 = vadd.f32 %v4910_v30, %v461_v31  ;;  %v4917_v37 = vpop.permute.xlu1 %802 }
  0x91   : > { %6926 = vst [vmem:[#allocation11_spill] sm:$0xff] %v4913_v32  ;;  %v4919_v38 = vpop.permute.xlu0 %799 }
  0x92   : > { %6927 = vst [vmem:[#allocation12_spill] sm:$0xff] %v4917_v37  ;;  %v557_v40 = vmax.f32 %v462_v33, 0.0  ;;  %v331_v33 = vld [vmem:[%s4631_s28 + $0xb0] sm:$0xff] }
  0x93   : > { %6928 = vst [vmem:[#allocation13_spill] sm:$0xff] %v4919_v38 }
  0x94   : > { %4072 = vmatmul.msk.f32.gmra.mxu0 %vm6836_vm3, %v325_v36  ;;  %775 = vperm.xlu1 %4461, %v730_v39   ;;  %596 = vst.msk [vmem:[#allocation2 + $0x18] sm:$0xff] %vm589_vm14, %v557_v40 }
  0x96   : > { %1427 = vperm.xlu0 %4465, %v730_v39   ;;  %1475 = vperm.xlu2 %4462, %v4705_v34  }
  0x97   : > { %v464_v35 = vpop.f32.mrf.mxu0 }
  0x98   : > { %v465_v44 = vadd.f32 %v4910_v30, %v464_v35  ;;  %v4927_v47 = vpop.permute.xlu1 %811 }
  0x99   : > { %6929 = vst [vmem:[#allocation14_spill] sm:$0xff] %v4927_v47  ;;  %v4929_v49 = vpop.permute.xlu2 %1436  ;;  %v4931_v50 = vpop.permute.xlu0 %808 }
  0x9a   : > { %6930 = vst [vmem:[#allocation15_spill] sm:$0xff] %v4929_v49  ;;  %v558_v3 = vmax.f32 %v465_v44, 0.0  ;;  %vm6825_vm12 = vcmp.eq.s32.totalorder %v4929_v49, 1 }
  0x9b   : > { %6931 = vst [vmem:[#allocation16_spill] sm:$0xff] %v4931_v50 }
  0x9c   : > { %4073 = vmatmul.msk.f32.gmra.mxu0 %vm6836_vm3, %v326_v45  ;;  %4464 = vset.pattern.permute.xlu1 %v4529_v48  ;;  %597 = vst.msk [vmem:[#allocation2 + $0x20] sm:$0xff] %vm589_vm14, %v558_v3  ;;  %v328_v48 = vld [vmem:[%s4631_s28 + $0x98] sm:$0xff] }
  0x9d   : > { %1478 = vperm.xlu1 %4464, %v4734_v43   ;;  %v332_v3 = vld [vmem:[%s4631_s28 + $0xb8] sm:$0xff] }
  0x9e   : > { %1481 = vperm.xlu2 %4462, %v4731_v42  }
  0x9f   : > { %v467_v34 = vpop.f32.mrf.mxu0 }
  0xa0   : > { %v468_v51 = vadd.f32 %v4910_v30, %v467_v34  ;;  %v4940_v54 = vpop.permute.xlu1 %820 }
  0xa1   : > { %6932 = vst [vmem:[#allocation17_spill] sm:$0xff] %v4940_v54  ;;  %v4942_v56 = vpop.permute.xlu2 %1439  ;;  %v4944_v57 = vpop.permute.xlu0 %817 }
  0xa2   : > { %6933 = vst [vmem:[#allocation18_spill] sm:$0xff] %v4942_v56  ;;  %v559_v59 = vmax.f32 %v468_v51, 0.0  ;;  %vm6805_vm15 = vcmp.eq.s32.totalorder %v4942_v56, 1 }
  0xa3   : > { %6934 = vst [vmem:[#allocation19_spill] sm:$0xff] %v4944_v57 }
  0xa4   : > { %4074 = vmatmul.msk.f32.gmra.mxu0 %vm6836_vm3, %v327_v53  ;;  %598 = vst.msk [vmem:[#allocation2 + $0x28] sm:$0xff] %vm589_vm14, %v559_v59 }
  0xa5   : > { %1484 = vperm.xlu1 %4464, %v4728_v41   ;;  %v4088_v41 = vld [vmem:[%s6799_s3 + $0x4] sm:$0xf] }
  0xa6   : > { %1487 = vperm.xlu2 %4462, %v4745_v46   ;;  %4428 = vmatpush.msk.msra.mxu1 %vm1047_vm4, %v4088_v41  ;;  %v916_v46 = vld [vmem:[%s6799_s3] sm:$0xf] }
  0xa7   : > { %v470_v42 = vpop.f32.mrf.mxu0  ;;  %4429 = vmatpush.msk.msra.mxu2 %vm1047_vm4, %v916_v46  ;;  %4089 = vmatpush.msk.msrb.mxu0 %vm1047_vm4, %v4088_v41 }
  0xa8   : > { %v471_v43 = vadd.f32 %v4910_v30, %v470_v42  ;;  %v4952_v60 = vpop.permute.xlu1 %829  ;;  %4190 = vmatpush.msk.msrb.mxu1 %vm1047_vm4, %v4189_v13 }
  0xa9   : > { %6935 = vst [vmem:[#allocation20_spill] sm:$0xff] %v4952_v60  ;;  %v4956_v0 = vpop.permute.xlu0 %826  ;;  %4224 = vmatpush.msk.msrb.mxu2 %vm1047_vm4, %v4223_v2  ;;  %4122 = vmatpush.msk.msra.mxu0 %vm1047_vm4, %v916_v46 }
  0xaa   : > { %v4954_v61 = vpop.permute.xlu2 %844  ;;  %6937 = vst [vmem:[#allocation22_spill] sm:$0xff] %v4956_v0  ;;  %v560_v1 = vmax.f32 %v471_v43, 0.0 }
  0xab   : > { %6936 = vst [vmem:[#allocation21_spill] sm:$0xff] %v4954_v61 }
  0xac   : > { %4075 = vmatmul.msk.f32.gmra.mxu0 %vm6836_vm3, %v328_v48  ;;  %599 = vst.msk [vmem:[#allocation2 + $0x30] sm:$0xff] %vm589_vm14, %v560_v1  ;;  %v333_v1 = vld [vmem:[%s4631_s28 + $0xc0] sm:$0xff] }
  0xad   : > { %1493 = vperm.xlu1 %4464, %v4765_v52  }
  0xae   : > { %1496 = vperm.xlu2 %4462, %v4776_v55  }
  0xaf   : > { %v473_v4 = vpop.f32.mrf.mxu0 }
  0xb0   : > { %v474_v52 = vadd.f32 %v4910_v30, %v473_v4  ;;  %v4978_v7 = vpop.permute.xlu1 %835 }
  0xb1   : > { %6938 = vst [vmem:[#allocation23_spill] sm:$0xff] %v4978_v7 }
  0xb2   : > { %v4980_v9 = vpop.permute.xlu2 %847  ;;  %v4982_v12 = vpop.permute.xlu0 %1433  ;;  %v561_v55 = vmax.f32 %v474_v52, 0.0 }
  0xb3   : > { %6939 = vst [vmem:[#allocation24_spill] sm:$0xff] %v4980_v9  ;;  %vm6819_vm7 = vcmp.eq.s32.totalorder %v4982_v12, 1 }
  0xb4   : > { %6940 = vst [vmem:[#allocation25_spill] sm:$0xff] %v4982_v12  ;;  %4076 = vmatmul.msk.f32.gmra.mxu0 %vm6836_vm3, %v329_v6 }
  0xb5   : > { %600 = vst.msk [vmem:[#allocation2 + $0x38] sm:$0xff] %vm589_vm14, %v561_v55  ;;  %1499 = vperm.xlu1 %4464, %v4790_v58  }
  0xb6   : > { %1502 = vperm.xlu2 %4462, %v4804_v62  }
  0xb7   : > { %v476_v16 = vpop.f32.mrf.mxu0 }
  0xb8   : > { %v477_v58 = vadd.f32 %v4910_v30, %v476_v16  ;;  %v5001_v20 = vpop.permute.xlu1 %838 }
  0xb9   : > { %6941 = vst [vmem:[#allocation26_spill] sm:$0xff] %v5001_v20 }
  0xba   : > { %v562_v23 = vmax.f32 %v477_v58, 0.0 }
  0xbb   : > { %v5003_v26 = vpop.permute.xlu2 %1451  ;;  %v5005_v29 = vpop.permute.xlu0 %841 }
  0xbc   : > { %6942 = vst [vmem:[#allocation27_spill] sm:$0xff] %v5003_v26  ;;  %4077 = vmatmul.msk.f32.gmra.mxu0 %vm6836_vm3, %v330_v17  ;;  %v5066_v13 = vld [vmem:[#allocation2 + $0x37] sm:$0xff] }
  0xbd   : > { %6943 = vst [vmem:[#allocation28_spill] sm:$0xff] %v5005_v29  ;;  %1412 = vperm.xlu1 %4464, %v4837_v8   ;;  %v5022_v8 = vld [vmem:[#allocation2 + $0x27] sm:$0xff] }
  0xbe   : > { %601 = vst.msk [vmem:[#allocation2 + $0x40] sm:$0xff] %vm589_vm14, %v562_v23  ;;  %1415 = vperm.xlu2 %4462, %v4810_v63  }
  0xbf   : > { %v479_v62 = vpop.f32.mrf.mxu0 }
  0xc0   : > { %v480_v31 = vadd.f32 %v4910_v30, %v479_v62 }
  0xc1   : > { %v5013_v36 = vpop.permute.xlu1 %1442 }
  0xc2   : > { %6944 = vst [vmem:[#allocation29_spill] sm:$0xff] %v5013_v36  ;;  %v563_v39 = vmax.f32 %v480_v31, 0.0 }
  0xc4   : > { %4078 = vmatmul.msk.f32.gmra.mxu0 %vm6836_vm3, %v331_v33  ;;  %v5016_v40 = vpop.permute.xlu0 %1448  ;;  %v5018_v35 = vpop.permute.xlu2 %757  ;;  %602 = vst.msk [vmem:[#allocation2 + $0x48] sm:$0xff] %vm589_vm14, %v563_v39  ;;  %v334_v33 = vld [vmem:[%s4631_s28 + $0xc8] sm:$0xff] }
  0xc5   : > { %6945 = vst [vmem:[#allocation30_spill] sm:$0xff] %v5016_v40  ;;  %vm852_vm5 = vcmp.eq.s32.totalorder %v5018_v35, 1  ;;  %1421 = vperm.xlu1 %4464, %v4882_v22   ;;  %v5078_v17 = vld [vmem:[#allocation2 + $0x3f] sm:$0xff] }
  0xc6   : > { %v5028_v63 = vsel %vm852_vm5, %v5022_v8, 0.0  ;;  %1424 = vperm.xlu2 %4462, %v4898_v27  }
  0xc7   : > { %6946 = vst [vmem:[#allocation31_spill] sm:$0xff] %v5028_v63  ;;  %v482_v44 = vpop.f32.mrf.mxu0 }
  0xc8   : > { %v483_v45 = vadd.f32 %v4910_v30, %v482_v44 }
  0xc9   : > { %v5033_v34 = vpop.permute.xlu1 %1445 }
  0xca   : > { %6947 = vst [vmem:[#allocation32_spill] sm:$0xff] %v5033_v34  ;;  %v564_v51 = vmax.f32 %v483_v45, 0.0 }
  0xcb   : > { %v925_v53 = vld [vmem:[#allocation2 + $0x48] sm:$0xff] }
  0xcc   : > { %4079 = vmatmul.msk.f32.gmra.mxu0 %vm6836_vm3, %v332_v3  ;;  %v5037_v22 = vpop.permute.xlu0 %1457  ;;  %v700_v59 = vld [vmem:[#allocation2 + $0x47] sm:$0xff]  ;;  %603 = vst.msk [vmem:[#allocation2 + $0x50] sm:$0xff] %vm589_vm14, %v564_v51  ;;  %4098 = vmatmul.msk.f32.vlgmr.msra.gmra.mxu1 %vm589_vm14, %v925_v53 }
  0xcd   : > { %6948 = vst [vmem:[#allocation33_spill] sm:$0xff] %v5037_v22  ;;  %1430 = vperm.xlu1 %4464, %v4846_v11   ;;  %v5042_v27 = vpop.permute.xlu2 %1460  ;;  %v892_v42 = vsel %vm6822_vm6, %v700_v59, 0.0 }
  0xce   : > { %6949 = vst [vmem:[#allocation34_spill] sm:$0xff] %v5042_v27  ;;  %4131 = vmatmul.msk.f32.vlgmr.msra.gmra.mxu2 %vm589_vm14, %v892_v42 }
  0xcf   : > { %v485_v43 = vpop.f32.mrf.mxu0 }
  0xd0   : > { %v486_v48 = vadd.f32 %v4910_v30, %v485_v43 }
  0xd2   : > { %v5050_v41 = vpop.permute.xlu1 %850  ;;  %v565_v46 = vmax.f32 %v486_v48, 0.0 }
  0xd3   : > { %v926_v11 = vld [vmem:[#allocation2 + $0x50] sm:$0xff] }
  0xd4   : > { %4080 = vmatmul.msk.f32.gmra.mxu0 %vm6836_vm3, %v333_v1  ;;  %v5054_v2 = vld [vmem:[#allocation2 + $0x4f] sm:$0xff]  ;;  %604 = vst.msk [vmem:[#allocation2 + $0x58] sm:$0xff] %vm589_vm14, %v565_v46  ;;  %4099 = vmatmul.msk.f32.gmra.mxu1 %vm589_vm14, %v926_v11 }
  0xd5   : > { %v1384_v4 = vld [vmem:[#allocation2 + $0x49] sm:$0xff]  ;;  %v5057_v52 = vpop.permute.xlu0 %763  ;;  %v893_v6 = vsel %vm6818_vm8, %v5054_v2, 0.0  ;;  %vm6837_vm8 = vcmp.eq.s32.totalorder %v5016_v40, 1 }
  0xd6   : > { %v1544_v55 = vsel %vm6819_vm7, %v1384_v4, 0.0  ;;  %vm854_vm9 = vcmp.eq.s32.totalorder %v5057_v52, 1  ;;  %v5068_v16 = vpop.permute.xlu2 %766  ;;  %4132 = vmatmul.msk.f32.gmra.mxu2 %vm589_vm14, %v893_v6  ;;  %v335_v4 = vld [vmem:[%s4631_s28 + $0xd0] sm:$0xff] }
  0xd7   : > { %4165 = vmatmul.msk.f32.vlgmr.msra.gmra.mxu3 %vm589_vm14, %v1544_v55  ;;  %v5075_v58 = vsel %vm854_vm9, %v5066_v13, 0.0  ;;  %vm855_vm10 = vcmp.eq.s32.totalorder %v5068_v16, 1  ;;  %v488_v62 = vpop.f32.mrf.mxu0 }
  0xd8   : > { %6950 = vst [vmem:[#allocation35_spill] sm:$0xff] %v5075_v58  ;;  %v5083_v23 = vsel %vm855_vm10, %v5078_v17, 0.0  ;;  %v489_v31 = vadd.f32 %v4910_v30, %v488_v62 }
  0xd9   : > { %6951 = vst [vmem:[#allocation36_spill] sm:$0xff] %v5083_v23 }
  0xda   : > { %v566_v39 = vmax.f32 %v489_v31, 0.0 }
  0xdb   : > { %v5089_v44 = vpop.permute.xlu1 %1454  ;;  %v927_v45 = vld [vmem:[#allocation2 + $0x58] sm:$0xff] }
  0xdc   : > { %6952 = vst [vmem:[#allocation37_spill] sm:$0xff] %v5089_v44  ;;  %4081 = vmatmul.msk.f32.gmra.mxu0 %vm6836_vm3, %v334_v33  ;;  %v5092_v3 = vld [vmem:[#allocation2 + $0x57] sm:$0xff]  ;;  %4100 = vmatmul.msk.f32.gmra.mxu1 %vm589_vm14, %v927_v45 }
  0xdd   : > { %v1385_v51 = vld [vmem:[#allocation2 + $0x51] sm:$0xff]  ;;  %605 = vst.msk [vmem:[#allocation2 + $0x60] sm:$0xff] %vm589_vm14, %v566_v39  ;;  %v894_v53 = vsel %vm6809_vm11, %v5092_v3, 0.0  ;;  %vm6832_vm11 = vcmp.eq.s32.totalorder %v5033_v34, 1 }
  0xde   : > { %v1545_v42 = vsel %vm6825_vm12, %v1385_v51, 0.0  ;;  %v5101_v43 = vpop.permute.xlu0 %1469  ;;  %v5103_v48 = vpop.permute.xlu2 %769  ;;  %4133 = vmatmul.msk.f32.gmra.mxu2 %vm589_vm14, %v894_v53 }
  0xdf   : > { %6953 = vst [vmem:[#allocation38_spill] sm:$0xff] %v5101_v43  ;;  %4166 = vmatmul.msk.f32.gmra.mxu3 %vm589_vm14, %v1545_v42  ;;  %vm856_vm13 = vcmp.eq.s32.totalorder %v5103_v48, 1  ;;  %v491_v46 = vpop.f32.mrf.mxu0 }
  0xe0   : > { %v5110_v1 = vsel %vm856_vm13, %v700_v59, 0.0  ;;  %v492_v11 = vadd.f32 %v4910_v30, %v491_v46  ;;  %v5121_v59 = vld [vmem:[#allocation2 + $0x2f] sm:$0xff] }
  0xe1   : > { %6954 = vst [vmem:[#allocation39_spill] sm:$0xff] %v5110_v1 }
  0xe2   : > { %v567_v6 = vmax.f32 %v492_v11, 0.0 }
  0xe4   : > { %4082 = vmatmul.msk.f32.gmra.mxu0 %vm6836_vm3, %v335_v4  ;;  %v5117_v55 = vpop.permute.xlu1 %760  ;;  %v928_v62 = vld [vmem:[#allocation2 + $0x60] sm:$0xff]  ;;  %606 = vst.msk [vmem:[#allocation2 + $0x68] sm:$0xff] %vm589_vm14, %v567_v6  ;;  %v336_v4 = vld [vmem:[%s4631_s28 + $0xd8] sm:$0xff] }
  0xe5   : > { %v2719_v31 = vld [vmem:[#allocation2 + $0x5f] sm:$0xff]  ;;  %vm853_vm1 = vcmp.eq.s32.totalorder %v5117_v55, 1  ;;  %4101 = vmatmul.msk.f32.gmra.mxu1 %vm589_vm14, %v928_v62 }
  0xe6   : > { %v5119_v33 = vld [vmem:[#allocation2 + $0x59] sm:$0xff]  ;;  %v895_v39 = vsel %vm6806_vm0, %v2719_v31, 0.0  ;;  %v5134_v51 = vsel %vm853_vm1, %v5121_v59, 0.0  ;;  %vm6810_vm0 = vcmp.eq.s32.totalorder %v5013_v36, 1 }
  0xe7   : > { %v1546_v45 = vsel %vm6805_vm15, %v5119_v33, 0.0  ;;  %6955 = vst [vmem:[#allocation40_spill] sm:$0xff] %v5134_v51  ;;  %4134 = vmatmul.msk.f32.gmra.mxu2 %vm589_vm14, %v895_v39  ;;  %v5138_v53 = vpop.permute.xlu0 %778  ;;  %v494_v46 = vpop.f32.mrf.mxu0  ;;  %vm6815_vm15 = vcmp.eq.s32.totalorder %v4823_v5, 1  ;;  %v339_v51 = vld [vmem:[%s4631_s28 + $0xf0] sm:$0xff] }
  0xe8   : > { %4167 = vmatmul.msk.f32.gmra.mxu3 %vm589_vm14, %v1546_v45  ;;  %vm6824_vm2 = vcmp.eq.s32.totalorder %v5138_v53, 1  ;;  %v5141_v42 = vpop.permute.xlu2 %1472  ;;  %v495_v6 = vadd.f32 %v4910_v30, %v494_v46 }
  0xe9   : > { %6956 = vst [vmem:[#allocation41_spill] sm:$0xff] %v5141_v42  ;;  %v5145_v11 = vsel %vm6824_vm2, %v2719_v31, 0.0  ;;  %vm6842_vm2 = vcmp.eq.s32.totalorder %v5003_v26, 1 }
  0xea   : > { %6957 = vst [vmem:[#allocation42_spill] sm:$0xff] %v5145_v11  ;;  %v568_v62 = vmax.f32 %v495_v6, 0.0 }
  0xeb   : > { %v929_v39 = vld [vmem:[#allocation2 + $0x68] sm:$0xff] }
  0xec   : > { %4083 = vmatmul.msk.f32.gmra.mxu0 %vm6836_vm3, %v336_v4  ;;  %v704_v45 = vld [vmem:[#allocation2 + $0x67] sm:$0xff]  ;;  %607 = vst.msk [vmem:[#allocation2 + $0x70] sm:$0xff] %vm589_vm14, %v568_v62 }
  0xed   : > { %v1387_v1 = vld [vmem:[#allocation2 + $0x61] sm:$0xff]  ;;  %4102 = vmatmul.msk.f32.gmra.mxu1 %vm589_vm14, %v929_v39  ;;  %v5153_v23 = vpop.permute.xlu1 %1463  ;;  %v896_v31 = vsel %vm6815_vm15, %v704_v45, 0.0 }
  0xee   : > { %6958 = vst [vmem:[#allocation43_spill] sm:$0xff] %v5153_v23  ;;  %v1547_v11 = vsel %vm6810_vm0, %v1387_v1, 0.0  ;;  %v337_v39 = vld [vmem:[%s4631_s28 + $0xe0] sm:$0xff]  ;;  %vm6830_vm0 = vcmp.eq.s32.totalorder %v4840_v10, 1 }
  0xef   : > { %4135 = vmatmul.msk.f32.gmra.mxu2 %vm589_vm14, %v896_v31 }
  0xf0   : > { %4168 = vmatmul.msk.f32.gmra.mxu3 %vm589_vm14, %v1547_v11  ;;  %v5162_v46 = vpop.permute.xlu0 %1490  ;;  %v5164_v4 = vpop.permute.xlu2 %1475 }
  0xf1   : > { %6959 = vst [vmem:[#allocation44_spill] sm:$0xff] %v5162_v46  ;;  %v497_v6 = vpop.f32.mrf.mxu0 }
  0xf2   : > { %6960 = vst [vmem:[#allocation45_spill] sm:$0xff] %v5164_v4  ;;  %v498_v56 = vadd.f32 %v4910_v30, %v497_v6 }
  0xf3   : > { %v930_v1 = vld [vmem:[#allocation2 + $0x70] sm:$0xff] }
  0xf4   : > { %v569_v45 = vmax.f32 %v498_v56, 0.0  ;;  %4084 = vmatmul.msk.f32.gmra.mxu0 %vm6836_vm3, %v337_v39  ;;  %v705_v11 = vld [vmem:[#allocation2 + $0x6f] sm:$0xff] }
  0xf5   : > { %v5171_v62 = vpop.permute.xlu1 %1466  ;;  %v1388_v31 = vld [vmem:[#allocation2 + $0x69] sm:$0xff]  ;;  %4103 = vmatmul.msk.f32.gmra.mxu1 %vm589_vm14, %v930_v1  ;;  %v897_v6 = vsel %vm6830_vm0, %v705_v11, 0.0 }
  0xf6   : > { %6961 = vst [vmem:[#allocation46_spill] sm:$0xff] %v5171_v62  ;;  %v1548_v56 = vsel %vm6832_vm11, %v1388_v31, 0.0  ;;  %v2412_v39 = vld [vmem:[#allocation2 + $0x69] sm:$0xff] }
  0xf7   : > { %608 = vst.msk [vmem:[#allocation2 + $0x78] sm:$0xff] %vm589_vm14, %v569_v45  ;;  %4136 = vmatmul.msk.f32.gmra.mxu2 %vm589_vm14, %v897_v6  ;;  %v5187_v45 = vsel %vm6819_vm7, %v2412_v39, 0.0  ;;  %v5190_v1 = vld [vmem:[#allocation2 + $0x29] sm:$0xff]  ;;  %vm6839_vm7 = vcmp.eq.s32.totalorder %v4919_v38, 1 }
  0xf8   : > { %4169 = vmatmul.msk.f32.gmra.mxu3 %vm589_vm14, %v1548_v56  ;;  %v5181_v36 = vpop.permute.xlu0 %1409  ;;  %v5183_v5 = vpop.permute.xlu2 %1481  ;;  %6963 = vst [vmem:[#allocation48_spill] sm:$0xff] %v5187_v45 }
  0xf9   : > { %6962 = vst [vmem:[#allocation47_spill] sm:$0xff] %v5183_v5  ;;  %vm6823_vm15 = vcmp.eq.s32.totalorder %v5181_v36, 1  ;;  %v500_v11 = vpop.f32.mrf.mxu0 }
  0xfa   : > { %v5196_v31 = vsel %vm6823_vm15, %v5190_v1, 0.0  ;;  %v501_v6 = vadd.f32 %v4910_v30, %v500_v11 }
  0xfb   : > { %6964 = vst [vmem:[#allocation49_spill] sm:$0xff] %v5196_v31 }
  0xfc   : > { %v570_v56 = vmax.f32 %v501_v6, 0.0  ;;  %4085 = vmatmul.msk.f32.gmra.mxu0 %vm6836_vm3, %v338_v25 }
  0xfe   : > { %v931_v39 = vld [vmem:[#allocation2 + $0x78] sm:$0xff]  ;;  %609 = vst.msk [vmem:[#allocation2 + $0x80] sm:$0xff] %vm589_vm14, %v570_v56  ;;  %v5204_v19 = vpop.permute.xlu1 %772 }
  0xff   : > { %v706_v45 = vld [vmem:[#allocation2 + $0x77] sm:$0xff]  ;;  %4104 = vmatmul.msk.f32.gmra.mxu1 %vm589_vm14, %v931_v39  ;;  %vm857_vm6 = vcmp.eq.s32.totalorder %v5204_v19, 1 }
 0x100   : > { %v1389_v58 = vld [vmem:[#allocation2 + $0x71] sm:$0xff]  ;;  %v898_v11 = vsel %vm6839_vm7, %v706_v45, 0.0  ;;  %v5216_v25 = vsel %vm857_vm6, %v5054_v2, 0.0  ;;  %v5218_v56 = vpop.permute.xlu0 %1418  ;;  %v5220_v39 = vpop.permute.xlu2 %1487 }
 0x101   : > { %v1549_v6 = vsel %vm6837_vm8, %v1389_v58, 0.0  ;;  %v2413_v31 = vld [vmem:[#allocation2 + $0x71] sm:$0xff]  ;;  %4137 = vmatmul.msk.f32.gmra.mxu2 %vm589_vm14, %v898_v11  ;;  %6965 = vst [vmem:[#allocation50_spill] sm:$0xff] %v5216_v25  ;;  %vm6828_vm15 = vcmp.eq.s32.totalorder %v5218_v56, 1  ;;  %v5227_v58 = vld [vmem:[#allocation2 + $0x41] sm:$0xff]  ;;  %v503_v11 = vpop.f32.mrf.mxu0 }
 0x102   : > { %4170 = vmatmul.msk.f32.gmra.mxu3 %vm589_vm14, %v1549_v6  ;;  %6966 = vst [vmem:[#allocation51_spill] sm:$0xff] %v5220_v39  ;;  %v5224_v45 = vsel %vm6825_vm12, %v2413_v31, 0.0  ;;  %v5233_v6 = vsel %vm6828_vm15, %v5227_v58, 0.0  ;;  %v504_v2 = vadd.f32 %v4910_v30, %v503_v11  ;;  %vm6843_vm12 = vcmp.eq.s32.totalorder %v4917_v37, 1  ;;  %v918_v37 = vld [vmem:[#allocation2 + $0x10] sm:$0xff] }
 0x103   : > { %6967 = vst [vmem:[#allocation52_spill] sm:$0xff] %v5224_v45 }
 0x104   : > { %6968 = vst [vmem:[#allocation53_spill] sm:$0xff] %v5233_v6  ;;  %v571_v25 = vmax.f32 %v504_v2, 0.0  ;;  %4086 = vmatmul.msk.f32.gmra.mxu0 %vm6836_vm3, %v339_v51 }
 0x105   : > { %v932_v31 = vld [vmem:[#allocation2 + $0x80] sm:$0xff] }
 0x106   : > { %v707_v45 = vld [vmem:[#allocation2 + $0x7f] sm:$0xff]  ;;  %610 = vst.msk [vmem:[#allocation2 + $0x88] sm:$0xff] %vm589_vm14, %v571_v25  ;;  %v5241_v12 = vpop.permute.xlu1 %775 }
 0x107   : > { %v1390_v49 = vld [vmem:[#allocation2 + $0x79] sm:$0xff]  ;;  %4105 = vmatmul.msk.f32.gmra.mxu1 %vm589_vm14, %v932_v31  ;;  %v899_v11 = vsel %vm6843_vm12, %v707_v45, 0.0  ;;  %v5249_v51 = vsel %vm6830_vm0, %v707_v45, 0.0  ;;  %vm6833_vm15 = vcmp.eq.s32.totalorder %v5241_v12, 1 }
 0x108   : > { %v1550_v2 = vsel %vm6842_vm2, %v1390_v49, 0.0  ;;  %6969 = vst [vmem:[#allocation54_spill] sm:$0xff] %v5249_v51  ;;  %v5253_v6 = vsel %vm6832_vm11, %v1390_v49, 0.0  ;;  %v5261_v25 = vsel %vm6833_vm15, %v5092_v3, 0.0  ;;  %v5263_v31 = vpop.permute.xlu0 %1427  ;;  %v5265_v10 = vpop.permute.xlu2 %1496  ;;  %v340_v49 = vld [vmem:[%s4631_s28 + $0xf8] sm:$0xff]  ;;  %vm6847_vm11 = vcmp.eq.s32.totalorder %v5089_v44, 1 }
 0x109   : > { %6970 = vst [vmem:[#allocation55_spill] sm:$0xff] %v5253_v6  ;;  %4138 = vmatmul.msk.f32.gmra.mxu2 %vm589_vm14, %v899_v11  ;;  %vm6845_vm0 = vcmp.eq.s32.totalorder %v5263_v31, 1  ;;  %v506_v45 = vpop.f32.mrf.mxu0  ;;  %vm6849_vm15 = vcmp.eq.s32.totalorder %v4857_v14, 1  ;;  %v917_v51 = vld [vmem:[#allocation2 + $0x8] sm:$0xff] }
 0x10a   : > { %4171 = vmatmul.msk.f32.gmra.mxu3 %vm589_vm14, %v1550_v2  ;;  %6971 = vst [vmem:[#allocation56_spill] sm:$0xff] %v5261_v25  ;;  %v5272_v34 = vsel %vm6845_vm0, %v5119_v33, 0.0  ;;  %v507_v11 = vadd.f32 %v4910_v30, %v506_v45  ;;  %vm6862_vm0 = vcmp.eq.s32.totalorder %v5153_v23, 1 }
 0x10b   : > { %6972 = vst [vmem:[#allocation57_spill] sm:$0xff] %v5272_v34 }
 0x10c   : > { %v572_v2 = vmax.f32 %v507_v11, 0.0  ;;  %4087 = vmatmul.msk.f32.gmra.mxu0 %vm6836_vm3, %v340_v49  ;;  %vm6851_vm3 = vcmp.eq.s32.totalorder %v5037_v22, 1 }
 0x10d   : > { %v933_v3 = vld [vmem:[#allocation2 + $0x88] sm:$0xff] }
 0x10e   : > { %v708_v25 = vld [vmem:[#allocation2 + $0x87] sm:$0xff]  ;;  %611 = vst.msk [vmem:[#allocation2 + $0x90] sm:$0xff] %vm589_vm14, %v572_v2 }
 0x10f   : > { %v1391_v6 = vld [vmem:[#allocation2 + $0x81] sm:$0xff]  ;;  %4106 = vmatmul.msk.f32.gmra.mxu1 %vm589_vm14, %v933_v3  ;;  %v900_v33 = vsel %vm6849_vm15, %v708_v25, 0.0  ;;  %v5286_v11 = vsel %vm6839_vm7, %v708_v25, 0.0  ;;  %v5294_v2 = vpop.permute.xlu1 %1478 }
 0x110   : > { %v1551_v45 = vsel %vm6847_vm11, %v1391_v6, 0.0  ;;  %6973 = vst [vmem:[#allocation58_spill] sm:$0xff] %v5286_v11  ;;  %v5290_v49 = vsel %vm6837_vm8, %v1391_v6, 0.0  ;;  %v5296_v3 = vpop.permute.xlu2 %1502  ;;  %vm6853_vm8 = vcmp.eq.s32.totalorder %v4931_v50, 1 }
 0x111   : > { %6974 = vst [vmem:[#allocation59_spill] sm:$0xff] %v5290_v49  ;;  %4139 = vmatmul.msk.f32.gmra.mxu2 %vm589_vm14, %v900_v33  ;;  %v509_v34 = vpop.f32.mrf.mxu0  ;;  %v5356_v49 = vld [vmem:[#allocation2 + $0x18] sm:$0xff] }
 0x112   : > { %4172 = vmatmul.msk.f32.gmra.mxu3 %vm589_vm14, %v1551_v45  ;;  %6975 = vst [vmem:[#allocation60_spill] sm:$0xff] %v5294_v2  ;;  %v510_v28 = vadd.f32 %v4910_v30, %v509_v34 }
 0x114   : > { %v573_v25 = vmax.f32 %v510_v28, 0.0  ;;  %4090 = vmatmul.msk.f32.vlgmr.msrb.gmra.mxu0 %vm589_vm14, %v917_v51 }
 0x115   : > { %v934_v6 = vld [vmem:[#allocation2 + $0x90] sm:$0xff]  ;;  %4156 = vmatpush.msk.msrb.mxu0 %vm1047_vm4, %v4993_v15 }
 0x116   : > { %v709_v40 = vld [vmem:[#allocation2 + $0x8f] sm:$0xff]  ;;  %612 = vst.msk [vmem:[#allocation2 + $0x98] sm:$0xff] %vm589_vm14, %v573_v25 }
 0x117   : > { %v1392_v33 = vld [vmem:[#allocation2 + $0x89] sm:$0xff]  ;;  %4107 = vmatmul.msk.f32.gmra.mxu1 %vm589_vm14, %v934_v6  ;;  %v901_v34 = vsel %vm6853_vm8, %v709_v40, 0.0  ;;  %v5312_v51 = vsel %vm6843_vm12, %v709_v40, 0.0  ;;  %v5320_v15 = vpop.permute.xlu1 %1484  ;;  %v5324_v6 = vld [vmem:[#allocation2 + $0x39] sm:$0xff]  ;;  %vm6857_vm12 = vcmp.eq.s32.totalorder %v4927_v47, 1 }
 0x118   : > { %v1552_v28 = vsel %vm6851_vm3, %v1392_v33, 0.0  ;;  %6976 = vst [vmem:[#allocation61_spill] sm:$0xff] %v5312_v51  ;;  %v5316_v45 = vsel %vm6842_vm2, %v1392_v33, 0.0  ;;  %v5322_v25 = vpop.permute.xlu2 %1415  ;;  %vm6856_vm2 = vcmp.eq.s32.totalorder %v5042_v27, 1 }
 0x119   : > { %6977 = vst [vmem:[#allocation62_spill] sm:$0xff] %v5316_v45  ;;  %4140 = vmatmul.msk.f32.gmra.mxu2 %vm589_vm14, %v901_v34  ;;  %vm6858_vm7 = vcmp.eq.s32.totalorder %v5322_v25, 1  ;;  %v512_v38 = vpop.f32.mrf.mxu0 }
 0x11a   : > { %4173 = vmatmul.msk.f32.gmra.mxu3 %vm589_vm14, %v1552_v28  ;;  %6978 = vst [vmem:[#allocation63_spill] sm:$0xff] %v5320_v15  ;;  %v5330_v40 = vsel %vm6858_vm7, %v5324_v6, 0.0  ;;  %v513_v33 = vadd.f32 %v4910_v30, %v512_v38  ;;  %vm6873_vm7 = vcmp.eq.s32.totalorder %v5141_v42, 1  ;;  %v693_v42 = vld [vmem:[#allocation2 + $0xf] sm:$0xff] }
 0x11b   : > { %6979 = vst [vmem:[#allocation64_spill] sm:$0xff] %v5330_v40 }
 0x11c   : > { %v574_v34 = vmax.f32 %v513_v33, 0.0  ;;  %4091 = vmatmul.msk.f32.gmra.mxu0 %vm589_vm14, %v918_v37 }
 0x11d   : > { %v935_v28 = vld [vmem:[#allocation2 + $0x98] sm:$0xff] }
 0x11e   : > { %v710_v26 = vld [vmem:[#allocation2 + $0x97] sm:$0xff]  ;;  %613 = vst.msk [vmem:[#allocation2 + $0xa0] sm:$0xff] %vm589_vm14, %v574_v34 }
 0x11f   : > { %v1393_v45 = vld [vmem:[#allocation2 + $0x91] sm:$0xff]  ;;  %4108 = vmatmul.msk.f32.gmra.mxu1 %vm589_vm14, %v935_v28  ;;  %v902_v51 = vsel %vm6857_vm12, %v710_v26, 0.0  ;;  %v5344_v33 = vsel %vm6849_vm15, %v710_v26, 0.0  ;;  %v5352_v34 = vpop.permute.xlu1 %1493  ;;  %vm6867_vm15 = vcmp.eq.s32.totalorder %v5171_v62, 1 }
 0x120   : > { %v1553_v38 = vsel %vm6856_vm2, %v1393_v45, 0.0  ;;  %6980 = vst [vmem:[#allocation65_spill] sm:$0xff] %v5344_v33  ;;  %v5348_v37 = vsel %vm6847_vm11, %v1393_v45, 0.0  ;;  %vm6859_vm11 = vcmp.eq.s32.totalorder %v4874_v18, 1  ;;  %v5381_v33 = vld [vmem:[#allocation2 + $0x20] sm:$0xff] }
 0x121   : > { %6981 = vst [vmem:[#allocation66_spill] sm:$0xff] %v5348_v37  ;;  %4141 = vmatmul.msk.f32.gmra.mxu2 %vm589_vm14, %v902_v51  ;;  %v515_v28 = vpop.f32.mrf.mxu0 }
 0x122   : > { %4174 = vmatmul.msk.f32.gmra.mxu3 %vm589_vm14, %v1553_v38  ;;  %v516_v40 = vadd.f32 %v4910_v30, %v515_v28 }
 0x124   : > { %v575_v14 = vmax.f32 %v516_v40, 0.0  ;;  %4092 = vmatmul.msk.f32.gmra.mxu0 %vm589_vm14, %v5356_v49 }
 0x125   : > { %v936_v26 = vld [vmem:[#allocation2 + $0xa0] sm:$0xff] }
 0x126   : > { %v711_v45 = vld [vmem:[#allocation2 + $0x9f] sm:$0xff]  ;;  %614 = vst.msk [vmem:[#allocation2 + $0xa8] sm:$0xff] %vm589_vm14, %v575_v14 }
 0x127   : > { %v1394_v51 = vld [vmem:[#allocation2 + $0x99] sm:$0xff]  ;;  %4109 = vmatmul.msk.f32.gmra.mxu1 %vm589_vm14, %v936_v26  ;;  %v903_v38 = vsel %vm6859_vm11, %v711_v45, 0.0  ;;  %v5369_v40 = vsel %vm6853_vm8, %v711_v45, 0.0  ;;  %v5377_v14 = vpop.permute.xlu1 %1499 }
 0x128   : > { %v1554_v28 = vsel %vm6862_vm0, %v1394_v51, 0.0  ;;  %6982 = vst [vmem:[#allocation67_spill] sm:$0xff] %v5369_v40  ;;  %v5373_v44 = vsel %vm6851_vm3, %v1394_v51, 0.0  ;;  %vm6864_vm3 = vcmp.eq.s32.totalorder %v4944_v57, 1  ;;  %v5437_v40 = vld [vmem:[#allocation2 + $0x30] sm:$0xff] }
 0x129   : > { %6983 = vst [vmem:[#allocation68_spill] sm:$0xff] %v5373_v44  ;;  %4142 = vmatmul.msk.f32.gmra.mxu2 %vm589_vm14, %v903_v38  ;;  %v518_v26 = vpop.f32.mrf.mxu0 }
 0x12a   : > { %4175 = vmatmul.msk.f32.gmra.mxu3 %vm589_vm14, %v1554_v28  ;;  %6984 = vst [vmem:[#allocation69_spill] sm:$0xff] %v5377_v14  ;;  %v519_v37 = vadd.f32 %v4910_v30, %v518_v26 }
 0x12c   : > { %v576_v50 = vmax.f32 %v519_v37, 0.0  ;;  %4093 = vmatmul.msk.f32.gmra.mxu0 %vm589_vm14, %v5381_v33 }
 0x12d   : > { %v937_v45 = vld [vmem:[#allocation2 + $0xa8] sm:$0xff] }
 0x12e   : > { %v712_v51 = vld [vmem:[#allocation2 + $0xa7] sm:$0xff]  ;;  %615 = vst.msk [vmem:[#allocation2 + $0xb0] sm:$0xff] %vm589_vm14, %v576_v50 }
 0x12f   : > { %v1395_v38 = vld [vmem:[#allocation2 + $0xa1] sm:$0xff]  ;;  %4110 = vmatmul.msk.f32.gmra.mxu1 %vm589_vm14, %v937_v45  ;;  %v904_v28 = vsel %vm6864_vm3, %v712_v51, 0.0  ;;  %v5394_v37 = vsel %vm6857_vm12, %v712_v51, 0.0  ;;  %v5402_v50 = vpop.permute.xlu1 %1412  ;;  %v5404_v45 = vld [vmem:[#allocation2 + $0x31] sm:$0xff]  ;;  %vm6868_vm12 = vcmp.eq.s32.totalorder %v4940_v54, 1 }
 0x130   : > { %v1555_v26 = vsel %vm6867_vm15, %v1395_v38, 0.0  ;;  %6985 = vst [vmem:[#allocation70_spill] sm:$0xff] %v5394_v37  ;;  %v5398_v22 = vsel %vm6856_vm2, %v1395_v38, 0.0  ;;  %vm1505_vm8 = vcmp.eq.s32.totalorder %v5402_v50, 1  ;;  %vm6872_vm2 = vcmp.eq.s32.totalorder %v5101_v43, 1  ;;  %v5414_v38 = vld [vmem:[#allocation2 + $0x28] sm:$0xff] }
 0x131   : > { %6986 = vst [vmem:[#allocation71_spill] sm:$0xff] %v5398_v22  ;;  %4143 = vmatmul.msk.f32.gmra.mxu2 %vm589_vm14, %v904_v28  ;;  %v5410_v47 = vsel %vm1505_vm8, %v5404_v45, 0.0  ;;  %v521_v51 = vpop.f32.mrf.mxu0  ;;  %v692_v43 = vld [vmem:[#allocation2 + $0x7] sm:$0xff] }
 0x132   : > { %4176 = vmatmul.msk.f32.gmra.mxu3 %vm589_vm14, %v1555_v26  ;;  %6987 = vst [vmem:[#allocation72_spill] sm:$0xff] %v5410_v47  ;;  %v522_v27 = vadd.f32 %v4910_v30, %v521_v51 }
 0x134   : > { %v577_v28 = vmax.f32 %v522_v27, 0.0  ;;  %4094 = vmatmul.msk.f32.gmra.mxu0 %vm589_vm14, %v5414_v38 }
 0x135   : > { %v938_v26 = vld [vmem:[#allocation2 + $0xb0] sm:$0xff] }
 0x136   : > { %v713_v22 = vld [vmem:[#allocation2 + $0xaf] sm:$0xff]  ;;  %616 = vst.msk [vmem:[#allocation2 + $0xb8] sm:$0xff] %vm589_vm14, %v577_v28 }
 0x137   : > { %v1396_v37 = vld [vmem:[#allocation2 + $0xa9] sm:$0xff]  ;;  %4111 = vmatmul.msk.f32.gmra.mxu1 %vm589_vm14, %v938_v26  ;;  %v905_v51 = vsel %vm6868_vm12, %v713_v22, 0.0  ;;  %v5427_v27 = vsel %vm6859_vm11, %v713_v22, 0.0  ;;  %vm6899_vm11 = vcmp.eq.s32.totalorder %v4890_v24, 1 }
 0x138   : > { %v1556_v47 = vsel %vm6872_vm2, %v1396_v37, 0.0  ;;  %6988 = vst [vmem:[#allocation73_spill] sm:$0xff] %v5427_v27  ;;  %v5431_v44 = vsel %vm6862_vm0, %v1396_v37, 0.0  ;;  %vm6879_vm0 = vcmp.eq.s32.totalorder %v5164_v4, 1 }
 0x139   : > { %6989 = vst [vmem:[#allocation74_spill] sm:$0xff] %v5431_v44  ;;  %4144 = vmatmul.msk.f32.gmra.mxu2 %vm589_vm14, %v905_v51  ;;  %v524_v28 = vpop.f32.mrf.mxu0  ;;  %v5464_v44 = vld [vmem:[#allocation2 + $0x38] sm:$0xff] }
 0x13a   : > { %4177 = vmatmul.msk.f32.gmra.mxu3 %vm589_vm14, %v1556_v47  ;;  %v525_v26 = vadd.f32 %v4910_v30, %v524_v28  ;;  %v4257_v28 = vld [vmem:[%s6799_s3 + $0x14] sm:$0xf] }
 0x13b   : > { %4258 = vmatpush.msk.msrb.mxu3 %vm1047_vm4, %v4257_v28 }
 0x13c   : > { %v578_v11 = vmax.f32 %v525_v26, 0.0  ;;  %4095 = vmatmul.msk.f32.gmra.mxu0 %vm589_vm14, %v5437_v40 }
 0x13d   : > { %v939_v22 = vld [vmem:[#allocation2 + $0xb8] sm:$0xff] }
 0x13e   : > { %v714_v37 = vld [vmem:[#allocation2 + $0xb7] sm:$0xff]  ;;  %617 = vst.msk [vmem:[#allocation2 + $0xc0] sm:$0xff] %vm589_vm14, %v578_v11 }
 0x13f   : > { %v1397_v23 = vld [vmem:[#allocation2 + $0xb1] sm:$0xff]  ;;  %4112 = vmatmul.msk.f32.gmra.mxu1 %vm589_vm14, %v939_v22  ;;  %v906_v47 = vsel %vm6899_vm11, %v714_v37, 0.0  ;;  %v5453_v26 = vsel %vm6864_vm3, %v714_v37, 0.0  ;;  %vm6878_vm3 = vcmp.eq.s32.totalorder %v4956_v0, 1 }
 0x140   : > { %v1557_v51 = vsel %vm6873_vm7, %v1397_v23, 0.0  ;;  %6990 = vst [vmem:[#allocation75_spill] sm:$0xff] %v5453_v26  ;;  %v5459_v11 = vsel %vm6867_vm15, %v1397_v23, 0.0  ;;  %vm6882_vm15 = vcmp.eq.s32.totalorder %v5294_v2, 1 }
 0x141   : > { %4145 = vmatmul.msk.f32.gmra.mxu2 %vm589_vm14, %v906_v47  ;;  %6991 = vst [vmem:[#allocation76_spill] sm:$0xff] %v5459_v11  ;;  %v527_v22 = vpop.f32.mrf.mxu0  ;;  %v5490_v11 = vld [vmem:[#allocation2 + $0x40] sm:$0xff] }
 0x142   : > { %4178 = vmatmul.msk.f32.gmra.mxu3 %vm589_vm14, %v1557_v51  ;;  %v528_v18 = vadd.f32 %v4910_v30, %v527_v22 }
 0x144   : > { %v579_v57 = vmax.f32 %v528_v18, 0.0  ;;  %4096 = vmatmul.msk.f32.gmra.mxu0 %vm589_vm14, %v5464_v44 }
 0x145   : > { %v5469_v37 = vld [vmem:[#allocation2 + $0xc0] sm:$0xff] }
 0x146   : > { %6992 = vst [vmem:[#allocation77_spill] sm:$0xff] %v5469_v37  ;;  %v715_v47 = vld [vmem:[#allocation2 + $0xbf] sm:$0xff] }
 0x147   : > { %v1398_v23 = vld [vmem:[#allocation2 + $0xb9] sm:$0xff]  ;;  %618 = vst.msk [vmem:[#allocation2 + $0xc8] sm:$0xff] %vm589_vm14, %v579_v57  ;;  %4113 = vmatmul.msk.f32.gmra.mxu1 %vm589_vm14, %v5469_v37  ;;  %v907_v51 = vsel %vm6878_vm3, %v715_v47, 0.0  ;;  %v5480_v28 = vsel %vm6868_vm12, %v715_v47, 0.0  ;;  %vm6883_vm12 = vcmp.eq.s32.totalorder %v4952_v60, 1 }
 0x148   : > { %v1558_v18 = vsel %vm6879_vm0, %v1398_v23, 0.0  ;;  %6993 = vst [vmem:[#allocation78_spill] sm:$0xff] %v5480_v28  ;;  %v5484_v22 = vsel %vm6872_vm2, %v1398_v23, 0.0  ;;  %vm6888_vm2 = vcmp.eq.s32.totalorder %v5183_v5, 1 }
 0x149   : > { %6994 = vst [vmem:[#allocation79_spill] sm:$0xff] %v5484_v22  ;;  %4146 = vmatmul.msk.f32.gmra.mxu2 %vm589_vm14, %v907_v51  ;;  %v530_v57 = vpop.f32.mrf.mxu0  ;;  %v1092_v37 = vpop.f32.mrf.mxu1 }
 0x14a   : > { %4179 = vmatmul.msk.f32.gmra.mxu3 %vm589_vm14, %v1558_v18  ;;  %v531_v62 = vadd.f32 %v4910_v30, %v530_v57 }
 0x14c   : > { %v580_v26 = vmax.f32 %v531_v62, 0.0  ;;  %4097 = vmatmul.msk.f32.gmra.mxu0 %vm589_vm14, %v5490_v11 }
 0x14e   : > { %v5495_v47 = vld [vmem:[#allocation2 + $0xc8] sm:$0xff]  ;;  %619 = vst.msk [vmem:[#allocation2 + $0xd0] sm:$0xff] %vm589_vm14, %v580_v26  ;;  %v884_v26 = vsel %vm852_vm5, %v692_v43, 0.0 }
 0x14f   : > { %6995 = vst [vmem:[#allocation80_spill] sm:$0xff] %v5495_v47  ;;  %v716_v23 = vld [vmem:[#allocation2 + $0xc7] sm:$0xff]  ;;  %4114 = vmatmul.msk.f32.gmra.mxu1 %vm589_vm14, %v5495_v47 }
 0x150   : > { %v1399_v51 = vld [vmem:[#allocation2 + $0xc1] sm:$0xff]  ;;  %v908_v18 = vsel %vm6883_vm12, %v716_v23, 0.0  ;;  %v5506_v57 = vsel %vm6899_vm11, %v716_v23, 0.0  ;;  %vm883_vm11 = vcmp.eq.s32.totalorder %v5050_v41, 1 }
 0x151   : > { %v1559_v62 = vsel %vm6882_vm15, %v1399_v51, 0.0  ;;  %v5510_v54 = vsel %vm6873_vm7, %v1399_v51, 0.0  ;;  %4147 = vmatmul.msk.f32.gmra.mxu2 %vm589_vm14, %v908_v18  ;;  %v533_v47 = vpop.f32.mrf.mxu0  ;;  %v1304_v22 = vpop.f32.mrf.mxu2  ;;  %vm6889_vm7 = vcmp.eq.s32.totalorder %v4913_v32, 1 }
 0x152   : > { %6996 = vst [vmem:[#allocation81_spill] sm:$0xff] %v5510_v54  ;;  %4180 = vmatmul.msk.f32.gmra.mxu3 %vm589_vm14, %v1559_v62  ;;  %v534_v28 = vadd.f32 %v4910_v30, %v533_v47  ;;  %v1305_v27 = vadd.f32 %v1304_v22, %v1092_v37  ;;  %v1095_v63 = vpop.f32.mrf.mxu1  ;;  %v885_v47 = vsel %vm853_vm1, %v693_v42, 0.0 }
 0x154   : > { %v581_v23 = vmax.f32 %v534_v28, 0.0  ;;  %4123 = vmatmul.msk.f32.vlgmr.msra.gmra.mxu0 %vm589_vm14, %v884_v26 }
 0x155   : > { %v5520_v51 = vld [vmem:[#allocation2 + $0xd0] sm:$0xff] }
 0x156   : > { %6997 = vst [vmem:[#allocation82_spill] sm:$0xff] %v5520_v51  ;;  %v717_v18 = vld [vmem:[#allocation2 + $0xcf] sm:$0xff] }
 0x157   : > { %v1400_v62 = vld [vmem:[#allocation2 + $0xc9] sm:$0xff]  ;;  %620 = vst.msk [vmem:[#allocation2 + $0xd8] sm:$0xff] %vm589_vm14, %v581_v23  ;;  %4115 = vmatmul.msk.f32.gmra.mxu1 %vm589_vm14, %v5520_v51  ;;  %v909_v43 = vsel %vm6889_vm7, %v717_v18, 0.0  ;;  %v5531_v28 = vsel %vm6878_vm3, %v717_v18, 0.0  ;;  %vm6892_vm3 = vcmp.eq.s32.totalorder %v5320_v15, 1 }
 0x158   : > { %v1560_v37 = vsel %vm6888_vm2, %v1400_v62, 0.0  ;;  %v5535_v22 = vsel %vm6879_vm0, %v1400_v62, 0.0  ;;  %vm6891_vm0 = vcmp.eq.s32.totalorder %v4978_v7, 1 }
 0x159   : > { %4148 = vmatmul.msk.f32.gmra.mxu2 %vm589_vm14, %v909_v43  ;;  %v536_v26 = vpop.f32.mrf.mxu0  ;;  %v1307_v23 = vpop.f32.mrf.mxu2 }
 0x15a   : > { %4181 = vmatmul.msk.f32.gmra.mxu3 %vm589_vm14, %v1560_v37  ;;  %v537_v24 = vadd.f32 %v4910_v30, %v536_v26  ;;  %v1308_v51 = vadd.f32 %v1307_v23, %v1095_v63  ;;  %v1710_v54 = vpop.f32.mrf.mxu3  ;;  %v1098_v0 = vpop.f32.mrf.mxu1  ;;  %v5566_v23 = vld [vmem:[#allocation2 + $0x17] sm:$0xff] }
 0x15b   : > { %v5543_v18 = vadd.f32 %v1710_v54, %v1305_v27 }
 0x15c   : > { %v582_v62 = vmax.f32 %v537_v24, 0.0  ;;  %4124 = vmatmul.msk.f32.gmra.mxu0 %vm589_vm14, %v885_v47 }
 0x15d   : > { %6998 = vst [vmem:[#allocation83_spill] sm:$0xff] %v5543_v18 }
 0x15e   : > { %v5547_v43 = vld [vmem:[#allocation2 + $0xd8] sm:$0xff]  ;;  %621 = vst.msk [vmem:[#allocation2 + $0xe0] sm:$0xff] %vm589_vm14, %v582_v62 }
 0x15f   : > { %6999 = vst [vmem:[#allocation84_spill] sm:$0xff] %v5547_v43  ;;  %v718_v37 = vld [vmem:[#allocation2 + $0xd7] sm:$0xff]  ;;  %4116 = vmatmul.msk.f32.gmra.mxu1 %vm589_vm14, %v5547_v43 }
 0x160   : > { %v1401_v42 = vld [vmem:[#allocation2 + $0xd1] sm:$0xff]  ;;  %v910_v63 = vsel %vm6891_vm0, %v718_v37, 0.0  ;;  %v5558_v24 = vsel %vm6883_vm12, %v718_v37, 0.0  ;;  %v886_v37 = vsel %vm854_vm9, %v5566_v23, 0.0  ;;  %vm6895_vm12 = vcmp.eq.s32.totalorder %v5001_v20, 1 }
 0x161   : > { %v1561_v54 = vsel %vm6892_vm3, %v1401_v42, 0.0  ;;  %v5562_v27 = vsel %vm6882_vm15, %v1401_v42, 0.0  ;;  %4149 = vmatmul.msk.f32.gmra.mxu2 %vm589_vm14, %v910_v63  ;;  %v539_v47 = vpop.f32.mrf.mxu0  ;;  %v1310_v26 = vpop.f32.mrf.mxu2  ;;  %vm6898_vm15 = vcmp.eq.s32.totalorder %v5220_v39, 1 }
 0x162   : > { %4182 = vmatmul.msk.f32.gmra.mxu3 %vm589_vm14, %v1561_v54  ;;  %v540_v62 = vadd.f32 %v4910_v30, %v539_v47  ;;  %v1311_v4 = vadd.f32 %v1310_v26, %v1098_v0  ;;  %v1713_v18 = vpop.f32.mrf.mxu3  ;;  %v1101_v43 = vpop.f32.mrf.mxu1 }
 0x163   : > { %v5573_v42 = vadd.f32 %v1713_v18, %v1308_v51 }
 0x164   : > { %v583_v63 = vmax.f32 %v540_v62, 0.0  ;;  %4125 = vmatmul.msk.f32.gmra.mxu0 %vm589_vm14, %v886_v37  ;;  %v5596_v37 = vld [vmem:[#allocation2 + $0x1f] sm:$0xff] }
 0x165   : > { %7000 = vst [vmem:[#allocation85_spill] sm:$0xff] %v5573_v42  ;;  %v5577_v54 = vld [vmem:[#allocation2 + $0xe0] sm:$0xff] }
 0x166   : > { %v719_v2 = vld [vmem:[#allocation2 + $0xdf] sm:$0xff]  ;;  %622 = vst.msk [vmem:[#allocation2 + $0xe8] sm:$0xff] %vm589_vm14, %v583_v63 }
 0x167   : > { %v1402_v30 = vld [vmem:[#allocation2 + $0xd9] sm:$0xff]  ;;  %4117 = vmatmul.msk.f32.gmra.mxu1 %vm589_vm14, %v5577_v54  ;;  %v911_v0 = vsel %vm6895_vm12, %v719_v2, 0.0  ;;  %v5588_v18 = vsel %vm6889_vm7, %v719_v2, 0.0  ;;  %vm6906_vm7 = vcmp.eq.s32.totalorder %v5162_v46, 1 }
 0x168   : > { %v1562_v51 = vsel %vm6898_vm15, %v1402_v30, 0.0  ;;  %v5592_v47 = vsel %vm6888_vm2, %v1402_v30, 0.0  ;;  %v5601_v63 = vld [vmem:[%s6798_s2] ss:$0 sm:$0xff]  ;;  %vm6901_vm2 = vcmp.eq.s32.totalorder %v5005_v29, 1  ;;  %v887_v30 = vsel %vm855_vm10, %v5596_v37, 0.0 }
 0x169   : > { %7001 = vst [vmem:[#allocation86_spill] sm:$0xff] %v5592_v47  ;;  %4150 = vmatmul.msk.f32.gmra.mxu2 %vm589_vm14, %v911_v0  ;;  %v542_v26 = vpop.f32.mrf.mxu0 }
 0x16a   : > { %4183 = vmatmul.msk.f32.gmra.mxu3 %vm589_vm14, %v1562_v51  ;;  %v1313_v62 = vpop.f32.mrf.mxu2  ;;  %v543_v2 = vadd.f32 %v5601_v63, %v542_v26  ;;  %v1104_v5 = vpop.f32.mrf.mxu1 }
 0x16b   : > { %v1314_v32 = vadd.f32 %v1313_v62, %v1101_v43  ;;  %v1716_v60 = vpop.f32.mrf.mxu3 }
 0x16c   : > { %v5609_v0 = vadd.f32 %v1716_v60, %v1311_v4  ;;  %v584_v51 = vmax.f32 %v543_v2, 0.0  ;;  %4126 = vmatmul.msk.f32.gmra.mxu0 %vm589_vm14, %v887_v30  ;;  %v4359_v2 = vld [vmem:[%s6799_s3 + $0x20] sm:$0xf] }
 0x16d   : > { %v5612_v42 = vld [vmem:[#allocation2 + $0xe8] sm:$0xff]  ;;  %4360 = vmatpush.msk.msra.mxu2 %vm1047_vm4, %v4359_v2  ;;  %v4325_v2 = vld [vmem:[%s6799_s3 + $0x1c] sm:$0xf] }
 0x16e   : > { %7002 = vst [vmem:[#allocation87_spill] sm:$0xff] %v5609_v0  ;;  %v720_v47 = vld [vmem:[#allocation2 + $0xe7] sm:$0xff]  ;;  %4326 = vmatpush.msk.msra.mxu1 %vm1047_vm4, %v4325_v2 }
 0x16f   : > { %v1403_v26 = vld [vmem:[#allocation2 + $0xe1] sm:$0xff]  ;;  %623 = vst.msk [vmem:[#allocation2 + $0xf0] sm:$0xff] %vm589_vm14, %v584_v51  ;;  %4118 = vmatmul.msk.f32.gmra.mxu1 %vm589_vm14, %v5612_v42  ;;  %v912_v43 = vsel %vm6901_vm2, %v720_v47, 0.0  ;;  %v5623_v60 = vsel %vm6891_vm0, %v720_v47, 0.0  ;;  %vm881_vm0 = vcmp.eq.s32.totalorder %v4954_v61, 1 }
 0x170   : > { %v1563_v62 = vsel %vm6906_vm7, %v1403_v26, 0.0  ;;  %v5627_v4 = vsel %vm6892_vm3, %v1403_v26, 0.0  ;;  %v888_v26 = vsel %vm856_vm13, %v5022_v8, 0.0  ;;  %vm1532_vm3 = vcmp.eq.s32.totalorder %v5352_v34, 1 }
 0x171   : > { %4151 = vmatmul.msk.f32.gmra.mxu2 %vm589_vm14, %v912_v43  ;;  %v545_v30 = vpop.f32.mrf.mxu0 }
 0x172   : > { %4184 = vmatmul.msk.f32.gmra.mxu3 %vm589_vm14, %v1563_v62  ;;  %v1316_v51 = vpop.f32.mrf.mxu2  ;;  %v546_v7 = vadd.f32 %v5601_v63, %v545_v30  ;;  %v1107_v62 = vpop.f32.mrf.mxu1 }
 0x173   : > { %v1317_v47 = vadd.f32 %v1316_v51, %v1104_v5  ;;  %v1719_v0 = vpop.f32.mrf.mxu3 }
 0x174   : > { %v5641_v43 = vadd.f32 %v1719_v0, %v1314_v32  ;;  %v585_v15 = vmax.f32 %v546_v7, 0.0  ;;  %4127 = vmatmul.msk.f32.gmra.mxu0 %vm589_vm14, %v888_v26 }
 0x176   : > { %7003 = vst [vmem:[#allocation88_spill] sm:$0xff] %v5641_v43  ;;  %v5648_v5 = vld [vmem:[#allocation2 + $0xf0] sm:$0xff] }
 0x177   : > { %7004 = vst [vmem:[#allocation89_spill] sm:$0xff] %v5648_v5  ;;  %v721_v30 = vld [vmem:[#allocation2 + $0xef] sm:$0xff]  ;;  %4119 = vmatmul.msk.f32.gmra.mxu1 %vm589_vm14, %v5648_v5  ;;  %v889_v5 = vsel %vm857_vm6, %v5121_v59, 0.0 }
 0x178   : > { %v1404_v51 = vld [vmem:[#allocation2 + $0xe9] sm:$0xff]  ;;  %624 = vst.msk [vmem:[#allocation2 + $0xf8] sm:$0xff] %vm589_vm14, %v585_v15  ;;  %v913_v32 = vsel %vm881_vm0, %v721_v30, 0.0  ;;  %v5659_v7 = vsel %vm6895_vm12, %v721_v30, 0.0  ;;  %vm1533_vm12 = vcmp.eq.s32.totalorder %v5265_v10, 1 }
 0x179   : > { %v1564_v8 = vsel %vm1532_vm3, %v1404_v51, 0.0  ;;  %v5663_v0 = vsel %vm6898_vm15, %v1404_v51, 0.0  ;;  %4152 = vmatmul.msk.f32.gmra.mxu2 %vm589_vm14, %v913_v32  ;;  %v548_v15 = vpop.f32.mrf.mxu0  ;;  %vm6900_vm15 = vcmp.eq.s32.totalorder %v4980_v9, 1 }
 0x17a   : > { %4185 = vmatmul.msk.f32.gmra.mxu3 %vm589_vm14, %v1564_v8  ;;  %v549_v26 = vadd.f32 %v5601_v63, %v548_v15  ;;  %v1319_v2 = vpop.f32.mrf.mxu2 }
 0x17b   : > { %v1722_v43 = vpop.f32.mrf.mxu3  ;;  %v1320_v30 = vadd.f32 %v1319_v2, %v1107_v62 }
 0x17c   : > { %v5672_v20 = vadd.f32 %v1722_v43, %v1317_v47  ;;  %v1110_v51 = vpop.f32.mrf.mxu1  ;;  %v586_v39 = vmax.f32 %v549_v26, 0.0  ;;  %4128 = vmatmul.msk.f32.gmra.mxu0 %vm589_vm14, %v889_v5 }
 0x17e   : > { %7005 = vst [vmem:[#allocation90_spill] sm:$0xff] %v5672_v20 }
 0x17f   : > { %v5676_v32 = vld [vmem:[#allocation2 + $0xf8] sm:$0xff]  ;;  %625 = vst.msk [vmem:[#allocation2 + $0x100] sm:$0xff] %vm589_vm14, %v586_v39 }
 0x180   : > { %v722_v8 = vld [vmem:[#allocation2 + $0xf7] sm:$0xff]  ;;  %4120 = vmatmul.msk.f32.gmra.mxu1 %vm589_vm14, %v5676_v32 }
 0x181   : > { %v1405_v15 = vld [vmem:[#allocation2 + $0xf1] sm:$0xff]  ;;  %v914_v59 = vsel %vm6900_vm15, %v722_v8, 0.0  ;;  %v5687_v43 = vsel %vm6901_vm2, %v722_v8, 0.0  ;;  %v551_v39 = vpop.f32.mrf.mxu0  ;;  %vm7006_vm15 = vcmp.eq.s32.totalorder %v5241_v12, 1  ;;  %vm1534_vm2 = vcmp.eq.s32.totalorder %v5377_v14, 1 }
 0x182   : > { %v1565_v47 = vsel %vm1533_vm12, %v1405_v15, 0.0  ;;  %v5691_v62 = vsel %vm6906_vm7, %v1405_v15, 0.0  ;;  %4153 = vmatmul.msk.f32.gmra.mxu2 %vm589_vm14, %v914_v59  ;;  %v552_v5 = vadd.f32 %v5601_v63, %v551_v39  ;;  %v890_v8 = vsel %vm7006_vm15, %v5066_v13, 0.0 }
 0x183   : > { %4186 = vmatmul.msk.f32.gmra.mxu3 %vm589_vm14, %v1565_v47  ;;  %vm7007_vm15 = vcmp.eq.s32.totalorder %v5138_v53, 1  ;;  %vm1535_vm7 = vcmp.eq.s32.totalorder %v5296_v3, 1 }
 0x184   : > { %v1322_v26 = vpop.f32.mrf.mxu2  ;;  %v1113_v29 = vpop.f32.mrf.mxu1  ;;  %v587_v59 = vmax.f32 %v552_v5, 0.0  ;;  %4129 = vmatmul.msk.f32.gmra.mxu0 %vm589_vm14, %v890_v8 }
 0x185   : > { %v1725_v2 = vpop.f32.mrf.mxu3  ;;  %v1323_v46 = vadd.f32 %v1322_v26, %v1110_v51 }
 0x186   : > { %v5701_v15 = vadd.f32 %v1725_v2, %v1320_v30  ;;  %v5704_v47 = vld [vmem:[#allocation2 + $0x100] sm:$0xff]  ;;  %626 = vst.msk [vmem:[#allocation2 + $0x108] sm:$0xff] %vm589_vm14, %v587_v59  ;;  %v891_v59 = vsel %vm7007_vm15, %v5078_v17, 0.0 }
 0x187   : > { %v723_v9 = vld [vmem:[#allocation2 + $0xff] sm:$0xff] }
 0x188   : > { %v1406_v20 = vld [vmem:[#allocation2 + $0xf9] sm:$0xff]  ;;  %4121 = vmatmul.msk.f32.gmra.mxu1 %vm589_vm14, %v5704_v47  ;;  %v915_v13 = vsel %vm883_vm11, %v723_v9, 0.0  ;;  %v5715_v51 = vsel %vm881_vm0, %v723_v9, 0.0 }
 0x189   : > { %v1566_v30 = vsel %vm1534_vm2, %v1406_v20, 0.0  ;;  %v5719_v39 = vsel %vm1532_vm3, %v1406_v20, 0.0  ;;  %v554_v5 = vpop.f32.mrf.mxu0 }
 0x18a   : > { %4154 = vmatmul.msk.f32.gmra.mxu2 %vm589_vm14, %v915_v13  ;;  %v555_v26 = vadd.f32 %v5601_v63, %v554_v5  ;;  %v1846_v13 = vsel %vm852_vm5, %v5566_v23, 0.0  ;;  %vm7008_vm5 = vcmp.eq.s32.totalorder %v5181_v36, 1 }
 0x18b   : > { %4187 = vmatmul.msk.f32.gmra.mxu3 %vm589_vm14, %v1566_v30  ;;  %v1376_v30 = vld [vmem:[#allocation2 + $0x9] sm:$0xff]  ;;  %vm7009_vm15 = vmmov %vm7008_vm5 }
 0x18c   : > { %v1325_v2 = vpop.f32.mrf.mxu2  ;;  %v1116_v20 = vpop.f32.mrf.mxu1  ;;  %v588_v14 = vmax.f32 %v555_v26, 0.0  ;;  %4130 = vmatmul.msk.f32.gmra.mxu0 %vm589_vm14, %v891_v59  ;;  %v1536_v35 = vsel %vm7008_vm5, %v1376_v30, 0.0  ;;  %v2402_v59 = vld [vmem:[#allocation2 + $0x19] sm:$0xff]  ;;  %vm7025_vm5 = vcmp.eq.s32.totalorder %v5138_v53, 1 }
 0x18d   : > { %v1728_v8 = vpop.f32.mrf.mxu3  ;;  %v1326_v9 = vadd.f32 %v1325_v2, %v1113_v29  ;;  %v1407_v63 = vld [vmem:[#allocation2 + $0x101] sm:$0xff] }
 0x18e   : > { %v5728_v61 = vadd.f32 %v1728_v8, %v1323_v46  ;;  %627 = vst.msk [vmem:[#allocation2 + $0x110] sm:$0xff] %vm589_vm14, %v588_v14  ;;  %v1567_v17 = vsel %vm1535_vm7, %v1407_v63, 0.0  ;;  %v5740_v29 = vsel %vm1533_vm12, %v1407_v63, 0.0  ;;  %v1847_v8 = vsel %vm853_vm1, %v5596_v37, 0.0 }
 0x18f   : > { %vm7010_vm1 = vcmp.eq.s32.totalorder %v5322_v25, 1  ;;  %v4472_v25 = vld [vmem:[#allocation2 + $0x37] sm:$0xff] }
 0x190   : > { %4191 = vmatmul.msk.f32.vlgmr.msrb.gmra.mxu1 %vm589_vm14, %v1846_v13  ;;  %v1538_v52 = vsel %vm7010_vm1, %v2402_v59, 0.0 }
 0x191   : > { %v5747_v46 = vpop.f32.mrf.mxu0 }
 0x192   : > { %4225 = vmatmul.msk.f32.vlgmr.msrb.gmra.mxu2 %vm589_vm14, %v5356_v49  ;;  %v2434_v49 = vsel %vm7009_vm15, %v2402_v59, 0.0 }
 0x193   : > { %4188 = vmatmul.msk.f32.gmra.mxu3 %vm589_vm14, %v1567_v17  ;;  %v4470_v17 = vld [vmem:[#allocation2 + $0x27] sm:$0xff] }
 0x194   : > { %v1328_v14 = vpop.f32.mrf.mxu2  ;;  %v1119_v2 = vpop.f32.mrf.mxu1  ;;  %4157 = vmatmul.msk.f32.vlgmr.msrb.gmra.mxu0 %vm589_vm14, %v1536_v35  ;;  %v1379_v35 = vld [vmem:[#allocation2 + $0x21] sm:$0xff] }
 0x195   : > { %v1731_v23 = vpop.f32.mrf.mxu3  ;;  %v1329_v5 = vadd.f32 %v1328_v14, %v1116_v20  ;;  %v1377_v20 = vld [vmem:[#allocation2 + $0x11] sm:$0xff]  ;;  %v2435_v14 = vsel %vm1505_vm8, %v1379_v35, 0.0 }
 0x196   : > { %v5749_v26 = vadd.f32 %v1731_v23, %v1326_v9  ;;  %v1537_v55 = vsel %vm1505_vm8, %v1377_v20, 0.0  ;;  %vm7013_vm8 = vmmov %vm7010_vm1 }
 0x198   : > { %4192 = vmatmul.msk.f32.gmra.mxu1 %vm589_vm14, %v1847_v8 }
 0x199   : > { %v5761_v9 = vpop.f32.mrf.mxu0 }
 0x19a   : > { %4226 = vmatmul.msk.f32.gmra.mxu2 %vm589_vm14, %v5381_v33  ;;  %v1848_v33 = vsel %vm854_vm9, %v4470_v17, 0.0  ;;  %vm7014_vm9 = vcmp.eq.s32.totalorder %v5218_v56, 1  ;;  %v4291_v56 = vld [vmem:[%s6799_s3 + $0x18] sm:$0xf] }
 0x19b   : > { %4259 = vmatmul.msk.f32.vlgmr.msrb.gmra.mxu3 %vm589_vm14, %v2434_v49  ;;  %4292 = vmatpush.msk.msra.mxu0 %vm1047_vm4, %v4291_v56 }
 0x19c   : > { %v1331_v13 = vpop.f32.mrf.mxu2  ;;  %v1122_v36 = vpop.f32.mrf.mxu1  ;;  %4158 = vmatmul.msk.f32.gmra.mxu0 %vm589_vm14, %v1537_v55  ;;  %v2436_v55 = vsel %vm7013_vm8, %v5190_v1, 0.0  ;;  %vm7030_vm8 = vcmp.eq.s32.totalorder %v4879_v21, 1 }
 0x19d   : > { %v1734_v63 = vpop.f32.mrf.mxu3  ;;  %v1332_v37 = vadd.f32 %v1331_v13, %v1119_v2 }
 0x19e   : > { %v5765_v30 = vadd.f32 %v1734_v63, %v1329_v5  ;;  %v5778_v5 = vld [vmem:[#allocation2 + $0x111] sm:$0xff] }
 0x19f   : > { %v5787_v13 = vsel %vm1533_vm12, %v5778_v5, 0.0 }
 0x1a0   : > { %4193 = vmatmul.msk.f32.gmra.mxu1 %vm589_vm14, %v1848_v33  ;;  %7012 = vst [vmem:[#allocation92_spill] sm:$0xff] %v5787_v13 }
 0x1a1   : > { %v5776_v23 = vpop.f32.mrf.mxu0 }
 0x1a2   : > { %4227 = vmatmul.msk.f32.gmra.mxu2 %vm589_vm14, %v5414_v38  ;;  %v4471_v38 = vld [vmem:[#allocation2 + $0x2f] sm:$0xff] }
 0x1a3   : > { %4260 = vmatmul.msk.f32.gmra.mxu3 %vm589_vm14, %v2435_v14  ;;  %v1849_v63 = vsel %vm855_vm10, %v4471_v38, 0.0  ;;  %v1850_v14 = vsel %vm856_vm13, %v4472_v25, 0.0  ;;  %vm7017_vm10 = vmmov %vm7014_vm9  ;;  %vm7023_vm13 = vcmp.eq.s32.totalorder %v5263_v31, 1 }
 0x1a4   : > { %v1334_v2 = vpop.f32.mrf.mxu2  ;;  %v1125_v50 = vpop.f32.mrf.mxu1  ;;  %4159 = vmatmul.msk.f32.gmra.mxu0 %vm589_vm14, %v1538_v52  ;;  %vm7028_vm15 = vmmov %vm7023_vm13 }
 0x1a5   : > { %v1737_v8 = vpop.f32.mrf.mxu3  ;;  %v1335_v49 = vadd.f32 %v1334_v2, %v1122_v36  ;;  %v1539_v36 = vsel %vm7014_vm9, %v1379_v35, 0.0  ;;  %v2437_v2 = vsel %vm7017_vm10, %v5404_v45, 0.0 }
 0x1a6   : > { %v5782_v20 = vadd.f32 %v1737_v8, %v1332_v37  ;;  %v5820_v8 = vld [vmem:[#allocation2 + $0x109] sm:$0xff] }
 0x1a8   : > { %7011 = vst [vmem:[#allocation91_spill] sm:$0xff] %v5782_v20  ;;  %4194 = vmatmul.msk.f32.gmra.mxu1 %vm589_vm14, %v1849_v63  ;;  %v5834_v63 = vsel %vm1532_vm3, %v5820_v8, 0.0 }
 0x1a9   : > { %v5799_v10 = vpop.f32.mrf.mxu0  ;;  %7019 = vst [vmem:[#allocation96_spill] sm:$0xff] %v5834_v63 }
 0x1aa   : > { %4228 = vmatmul.msk.f32.gmra.mxu2 %vm589_vm14, %v5437_v40  ;;  %v5808_v40 = vpop.permute.xlu1 %1421 }
 0x1ab   : > { %4261 = vmatmul.msk.f32.gmra.mxu3 %vm589_vm14, %v2436_v55  ;;  %7016 = vst [vmem:[#allocation94_spill] sm:$0xff] %v5808_v40  ;;  %vm1508_vm12 = vcmp.eq.s32.totalorder %v5808_v40, 1  ;;  %v4473_v55 = vld [vmem:[#allocation2 + $0x3f] sm:$0xff] }
 0x1ac   : > { %v1337_v59 = vpop.f32.mrf.mxu2  ;;  %v1128_v33 = vpop.f32.mrf.mxu1  ;;  %4160 = vmatmul.msk.f32.gmra.mxu0 %vm589_vm14, %v1539_v36 }
 0x1ad   : > { %v1740_v37 = vpop.f32.mrf.mxu3  ;;  %v1338_v16 = vadd.f32 %v1337_v59, %v1125_v50  ;;  %v1851_v59 = vsel %vm857_vm6, %v4473_v55, 0.0  ;;  %vm7022_vm6 = vcmp.eq.s32.totalorder %v5241_v12, 1  ;;  %v1542_v12 = vsel %vm7023_vm13, %v5324_v6, 0.0 }
 0x1ae   : > { %v5803_v17 = vadd.f32 %v1740_v37, %v1335_v49  ;;  %v1540_v49 = vsel %vm1508_vm12, %v5190_v1, 0.0  ;;  %v5839_v37 = vpop.permute.xlu2 %1424  ;;  %v2438_v1 = vsel %vm1508_vm12, %v5324_v6, 0.0  ;;  %v2131_v6 = vld [vmem:[#allocation2 + $0x50] sm:$0xff] }
 0x1af   : > { %7020 = vst [vmem:[#allocation97_spill] sm:$0xff] %v5839_v37  ;;  %vm1509_vm3 = vcmp.eq.s32.totalorder %v5839_v37, 1 }
 0x1b0   : > { %7015 = vst [vmem:[#allocation93_spill] sm:$0xff] %v5803_v17  ;;  %4195 = vmatmul.msk.f32.gmra.mxu1 %vm589_vm14, %v1850_v14 }
 0x1b1   : > { %v5818_v35 = vpop.f32.mrf.mxu0 }
 0x1b2   : > { %4229 = vmatmul.msk.f32.gmra.mxu2 %vm589_vm14, %v5464_v44 }
 0x1b3   : > { %4262 = vmatmul.msk.f32.gmra.mxu3 %vm589_vm14, %v2437_v2  ;;  %v4474_v2 = vld [vmem:[#allocation2 + $0x47] sm:$0xff] }
 0x1b4   : > { %v1340_v48 = vpop.f32.mrf.mxu2  ;;  %v1131_v38 = vpop.f32.mrf.mxu1  ;;  %4161 = vmatmul.msk.f32.gmra.mxu0 %vm589_vm14, %v1540_v49 }
 0x1b5   : > { %v1743_v52 = vpop.f32.mrf.mxu3  ;;  %v1341_v50 = vadd.f32 %v1340_v48, %v1128_v33  ;;  %v2439_v48 = vsel %vm1509_vm3, %v5227_v58, 0.0 }
 0x1b6   : > { %v5828_v44 = vadd.f32 %v1743_v52, %v1338_v16  ;;  %v1541_v16 = vsel %vm1509_vm3, %v5404_v45, 0.0  ;;  %v2130_v52 = vld [vmem:[#allocation2 + $0x48] sm:$0xff] }
 0x1b8   : > { %7018 = vst [vmem:[#allocation95_spill] sm:$0xff] %v5828_v44  ;;  %4196 = vmatmul.msk.f32.gmra.mxu1 %vm589_vm14, %v1851_v59  ;;  %v4475_v59 = vld [vmem:[#allocation2 + $0x4f] sm:$0xff] }
 0x1b9   : > { %v5849_v34 = vpop.f32.mrf.mxu0 }
 0x1ba   : > { %4230 = vmatmul.msk.f32.gmra.mxu2 %vm589_vm14, %v5490_v11  ;;  %v1852_v11 = vsel %vm7022_vm6, %v4474_v2, 0.0  ;;  %v1822_v2 = vld [vmem:[#allocation2 + $0x57] sm:$0xff] }
 0x1bb   : > { %4263 = vmatmul.msk.f32.gmra.mxu3 %vm589_vm14, %v2438_v1  ;;  %v1853_v1 = vsel %vm7025_vm5, %v4475_v59, 0.0  ;;  %v2132_v59 = vld [vmem:[#allocation2 + $0x58] sm:$0xff] }
 0x1bc   : > { %v1343_v36 = vpop.f32.mrf.mxu2  ;;  %v1134_v14 = vpop.f32.mrf.mxu1  ;;  %4162 = vmatmul.msk.f32.gmra.mxu0 %vm589_vm14, %v1541_v16 }
 0x1bd   : > { %v1746_v19 = vpop.f32.mrf.mxu3  ;;  %v1344_v33 = vadd.f32 %v1343_v36, %v1131_v38  ;;  %v5875_v36 = vpop.permute.xlu1 %1430 }
 0x1be   : > { %v5854_v25 = vadd.f32 %v1746_v19, %v1341_v50  ;;  %7026 = vst [vmem:[#allocation100_spill] sm:$0xff] %v5875_v36  ;;  %v5877_v19 = vld [vmem:[#allocation2 + $0x49] sm:$0xff]  ;;  %vm1511_vm1 = vcmp.eq.s32.totalorder %v5875_v36, 1 }
 0x1bf   : > { %7027 = vst [vmem:[#allocation101_spill] sm:$0xff] %v5877_v19  ;;  %v2440_v16 = vsel %vm7028_vm15, %v5877_v19, 0.0  ;;  %v7060_v19 = vld [vmem:[#allocation54_spill] sm:$0xff] }
 0x1c0   : > { %7021 = vst [vmem:[#allocation98_spill] sm:$0xff] %v5854_v25  ;;  %4197 = vmatmul.msk.f32.gmra.mxu1 %vm589_vm14, %v1852_v11  ;;  %v1543_v11 = vsel %vm1511_vm1, %v5227_v58, 0.0  ;;  %v7056_v25 = vld [vmem:[#allocation29_spill] sm:$0xff] }
 0x1c1   : > { %v5865_v45 = vpop.f32.mrf.mxu0 }
 0x1c2   : > { %4231 = vmatmul.msk.f32.gmra.mxu2 %vm589_vm14, %v2130_v52 }
 0x1c3   : > { %4264 = vmatmul.msk.f32.gmra.mxu3 %vm589_vm14, %v2439_v48 }
 0x1c4   : > { %v1346_v56 = vpop.f32.mrf.mxu2  ;;  %v1137_v55 = vpop.f32.mrf.mxu1  ;;  %4163 = vmatmul.msk.f32.gmra.mxu0 %vm589_vm14, %v1542_v12 }
 0x1c5   : > { %v1749_v49 = vpop.f32.mrf.mxu3  ;;  %v1347_v50 = vadd.f32 %v1346_v56, %v1134_v14  ;;  %v1854_v56 = vsel %vm7030_vm8, %v1822_v2, 0.0  ;;  %v7033_v2 = vld [vmem:[#allocation31_spill] sm:$0xff] }
 0x1c6   : > { %v5870_v38 = vadd.f32 %v1749_v49, %v1344_v33  ;;  %v5896_v49 = vld [vmem:[#allocation2 + $0x51] sm:$0xff] }
 0x1c7   : > { %7031 = vst [vmem:[#allocation103_spill] sm:$0xff] %v5896_v49  ;;  %v2441_v12 = vsel %vm1511_vm1, %v5896_v49, 0.0  ;;  %v7052_v49 = vld [vmem:[#allocation36_spill] sm:$0xff] }
 0x1c8   : > { %7024 = vst [vmem:[#allocation99_spill] sm:$0xff] %v5870_v38  ;;  %4198 = vmatmul.msk.f32.gmra.mxu1 %vm589_vm14, %v1853_v1  ;;  %v1823_v1 = vld [vmem:[#allocation2 + $0x5f] sm:$0xff]  ;;  %v7045_v38 = vld [vmem:[#allocation35_spill] sm:$0xff] }
 0x1c9   : > { %v5886_v33 = vpop.f32.mrf.mxu0 }
 0x1ca   : > { %4232 = vmatmul.msk.f32.gmra.mxu2 %vm589_vm14, %v2131_v6 }
 0x1cb   : > { %4265 = vmatmul.msk.f32.gmra.mxu3 %vm589_vm14, %v2440_v16 }
 0x1cc   : > { %v1349_v53 = vpop.f32.mrf.mxu2  ;;  %v1140_v52 = vpop.f32.mrf.mxu1  ;;  %4164 = vmatmul.msk.f32.gmra.mxu0 %vm589_vm14, %v1543_v11  ;;  %v7034_v11 = vld [vmem:[#allocation10_spill] sm:$0xff] }
 0x1cd   : > { %v1752_v14 = vpop.f32.mrf.mxu3  ;;  %v1350_v31 = vadd.f32 %v1349_v53, %v1137_v55  ;;  %vm7035_vm9 = vcmp.eq.s32.totalorder %v7034_v11, 1 }
 0x1ce   : > { %v5891_v48 = vadd.f32 %v1752_v14, %v1347_v50  ;;  %v2410_v14 = vld [vmem:[#allocation2 + $0x59] sm:$0xff] }
 0x1d0   : > { %7029 = vst [vmem:[#allocation102_spill] sm:$0xff] %v5891_v48  ;;  %4199 = vmatmul.msk.f32.gmra.mxu1 %vm589_vm14, %v1854_v56  ;;  %v1855_v56 = vsel %vm7035_vm9, %v1823_v1, 0.0  ;;  %vm7057_vm9 = vcmp.eq.s32.totalorder %v7056_v25, 1 }
 0x1d1   : > { %v5904_v58 = vpop.f32.mrf.mxu0 }
 0x1d2   : > { %4233 = vmatmul.msk.f32.gmra.mxu2 %vm589_vm14, %v2132_v59  ;;  %v2133_v59 = vld [vmem:[#allocation2 + $0x60] sm:$0xff] }
 0x1d3   : > { %4266 = vmatmul.msk.f32.gmra.mxu3 %vm589_vm14, %v2441_v12  ;;  %v7036_v12 = vld [vmem:[#allocation25_spill] sm:$0xff] }
 0x1d4   : > { %v1352_v50 = vpop.f32.mrf.mxu2  ;;  %v1143_v53 = vpop.f32.mrf.mxu1  ;;  %4293 = vmatmul.msk.f32.vlgmr.msra.gmra.mxu0 %vm589_vm14, %v7033_v2  ;;  %vm7037_vm10 = vcmp.eq.s32.totalorder %v7036_v12, 1  ;;  %v7042_v12 = vld [vmem:[#allocation15_spill] sm:$0xff] }
 0x1d5   : > { %v1755_v55 = vpop.f32.mrf.mxu3  ;;  %v1353_v16 = vadd.f32 %v1352_v50, %v1140_v52  ;;  %v2442_v13 = vsel %vm7037_vm10, %v2410_v14, 0.0  ;;  %v7040_v14 = vld [vmem:[#allocation7_spill] sm:$0xff]  ;;  %vm7043_vm13 = vcmp.eq.s32.totalorder %v7042_v12, 1  ;;  %v7049_v12 = vld [vmem:[#allocation18_spill] sm:$0xff]  ;;  %vm7078_vm10 = vcmp.eq.s32.totalorder %v7034_v11, 1 }
 0x1d6   : > { %v5906_v6 = vadd.f32 %v1755_v55, %v1350_v31  ;;  %v5919_v55 = vld [vmem:[#allocation2 + $0x67] sm:$0xff]  ;;  %vm7041_vm6 = vcmp.eq.s32.totalorder %v7040_v14, 1  ;;  %vm7050_vm15 = vcmp.eq.s32.totalorder %v7049_v12, 1 }
 0x1d8   : > { %7032 = vst [vmem:[#allocation104_spill] sm:$0xff] %v5906_v6  ;;  %4200 = vmatmul.msk.f32.gmra.mxu1 %vm589_vm14, %v1855_v56  ;;  %v2411_v6 = vld [vmem:[#allocation2 + $0x61] sm:$0xff]  ;;  %v7039_v56 = vld [vmem:[#allocation40_spill] sm:$0xff] }
 0x1d9   : > { %v5917_v31 = vpop.f32.mrf.mxu0  ;;  %v2443_v36 = vsel %vm7043_vm13, %v2411_v6, 0.0 }
 0x1da   : > { %4234 = vmatmul.msk.f32.gmra.mxu2 %vm589_vm14, %v2133_v59  ;;  %v1856_v59 = vsel %vm7041_vm6, %v5919_v55, 0.0 }
 0x1db   : > { %4267 = vmatmul.msk.f32.gmra.mxu3 %vm589_vm14, %v2442_v13  ;;  %v2134_v13 = vld [vmem:[#allocation2 + $0x68] sm:$0xff] }
 0x1dc   : > { %v1355_v52 = vpop.f32.mrf.mxu2  ;;  %v1146_v1 = vpop.f32.mrf.mxu1  ;;  %4294 = vmatmul.msk.f32.gmra.mxu0 %vm589_vm14, %v7039_v56 }
 0x1dd   : > { %v1758_v50 = vpop.f32.mrf.mxu3  ;;  %v1356_v2 = vadd.f32 %v1355_v52, %v1143_v53 }
 0x1de   : > { %v5921_v63 = vadd.f32 %v1758_v50, %v1353_v16  ;;  %v5935_v50 = vld [vmem:[#allocation2 + $0x6f] sm:$0xff] }
 0x1e0   : > { %7038 = vst [vmem:[#allocation31_spill] sm:$0xff] %v5921_v63  ;;  %4201 = vmatmul.msk.f32.gmra.mxu1 %vm589_vm14, %v1856_v59  ;;  %v7046_v59 = vld [vmem:[#allocation9_spill] sm:$0xff] }
 0x1e1   : > { %v5933_v16 = vpop.f32.mrf.mxu0  ;;  %vm7047_vm5 = vcmp.eq.s32.totalorder %v7046_v59, 1 }
 0x1e2   : > { %4235 = vmatmul.msk.f32.gmra.mxu2 %vm589_vm14, %v2134_v13  ;;  %v1857_v6 = vsel %vm7047_vm5, %v5935_v50, 0.0  ;;  %v4478_v13 = vld [vmem:[#allocation2 + $0x69] sm:$0xff]  ;;  %vm7083_vm13 = vmmov %vm7047_vm5 }
 0x1e3   : > { %4268 = vmatmul.msk.f32.gmra.mxu3 %vm589_vm14, %v2443_v36  ;;  %v5945_v36 = vld [vmem:[#allocation2 + $0x70] sm:$0xff]  ;;  %v2444_v37 = vsel %vm7050_vm15, %v4478_v13, 0.0 }
 0x1e4   : > { %v1358_v53 = vpop.f32.mrf.mxu2  ;;  %v1149_v48 = vpop.f32.mrf.mxu1  ;;  %4295 = vmatmul.msk.f32.gmra.mxu0 %vm589_vm14, %v7045_v38  ;;  %7048 = vst [vmem:[#allocation25_spill] sm:$0xff] %v5945_v36  ;;  %v7053_v13 = vld [vmem:[#allocation3_spill] sm:$0xff] }
 0x1e5   : > { %v1761_v52 = vpop.f32.mrf.mxu3  ;;  %v1359_v56 = vadd.f32 %v1358_v53, %v1146_v1  ;;  %v5954_v53 = vld [vmem:[#allocation2 + $0x77] sm:$0xff]  ;;  %vm7054_vm8 = vcmp.eq.s32.totalorder %v7053_v13, 1 }
 0x1e6   : > { %v5937_v63 = vadd.f32 %v1761_v52, %v1356_v2  ;;  %v1858_v12 = vsel %vm7054_vm8, %v5954_v53, 0.0  ;;  %vm7086_vm5 = vmmov %vm7054_vm8 }
 0x1e8   : > { %7044 = vst [vmem:[#allocation10_spill] sm:$0xff] %v5937_v63  ;;  %4202 = vmatmul.msk.f32.gmra.mxu1 %vm589_vm14, %v1857_v6 }
 0x1e9   : > { %v5952_v2 = vpop.f32.mrf.mxu0 }
 0x1ea   : > { %4236 = vmatmul.msk.f32.gmra.mxu2 %vm589_vm14, %v5945_v36  ;;  %v4479_v36 = vld [vmem:[#allocation2 + $0x71] sm:$0xff] }
 0x1eb   : > { %4269 = vmatmul.msk.f32.gmra.mxu3 %vm589_vm14, %v2444_v37  ;;  %v5964_v37 = vld [vmem:[#allocation2 + $0x78] sm:$0xff]  ;;  %v2445_v40 = vsel %vm7057_vm9, %v4479_v36, 0.0  ;;  %v5979_v36 = vld [vmem:[#allocation2 + $0x80] sm:$0xff] }
 0x1ec   : > { %v1361_v38 = vpop.f32.mrf.mxu2  ;;  %v1152_v6 = vpop.f32.mrf.mxu1  ;;  %4296 = vmatmul.msk.f32.gmra.mxu0 %vm589_vm14, %v7052_v49  ;;  %7055 = vst [vmem:[#allocation7_spill] sm:$0xff] %v5964_v37 }
 0x1ed   : > { %v1764_v1 = vpop.f32.mrf.mxu3  ;;  %v1362_v52 = vadd.f32 %v1361_v38, %v1149_v48  ;;  %7061 = vst [vmem:[#allocation35_spill] sm:$0xff] %v5979_v36 }
 0x1ee   : > { %v5956_v63 = vadd.f32 %v1764_v1, %v1359_v56 }
 0x1f0   : > { %7051 = vst [vmem:[#allocation40_spill] sm:$0xff] %v5956_v63  ;;  %4203 = vmatmul.msk.f32.gmra.mxu1 %vm589_vm14, %v1858_v12  ;;  %v7059_v12 = vld [vmem:[#allocation39_spill] sm:$0xff] }
 0x1f1   : > { %v5971_v48 = vpop.f32.mrf.mxu0 }
 0x1f2   : > { %4237 = vmatmul.msk.f32.gmra.mxu2 %vm589_vm14, %v5964_v37  ;;  %v7066_v37 = vld [vmem:[#allocation59_spill] sm:$0xff] }
 0x1f3   : > { %4270 = vmatmul.msk.f32.gmra.mxu3 %vm589_vm14, %v2445_v40  ;;  %v7062_v40 = vld [vmem:[#allocation55_spill] sm:$0xff] }
 0x1f4   : > { %v1364_v49 = vpop.f32.mrf.mxu2  ;;  %v1155_v63 = vpop.f32.mrf.mxu1  ;;  %4297 = vmatmul.msk.f32.gmra.mxu0 %vm589_vm14, %v7059_v12 }
 0x1f5   : > { %v1767_v56 = vpop.f32.mrf.mxu3  ;;  %v1365_v38 = vadd.f32 %v1364_v49, %v1152_v6  ;;  %v3678_v49 = vld [vmem:[%s6801_s5] sm:$0xf] }
 0x1f6   : > { %v5973_v1 = vadd.f32 %v1767_v56, %v1362_v52  ;;  %4393 = vmatpush.msk.msra.mxu3 %vm1047_vm4, %v3678_v49  ;;  %vm7075_vm4 = vcmp.eq.s32.totalorder %v4879_v21, 1 }
 0x1f8   : > { %7058 = vst [vmem:[#allocation15_spill] sm:$0xff] %v5973_v1  ;;  %4204 = vmatmul.msk.f32.gmra.mxu1 %vm589_vm14, %v7060_v19  ;;  %v7064_v1 = vld [vmem:[#allocation50_spill] sm:$0xff] }
 0x1f9   : > { %v5985_v25 = vpop.f32.mrf.mxu0 }
 0x1fa   : > { %4238 = vmatmul.msk.f32.gmra.mxu2 %vm589_vm14, %v5979_v36  ;;  %v7065_v36 = vld [vmem:[#allocation58_spill] sm:$0xff] }
 0x1fb   : > { %4271 = vmatmul.msk.f32.gmra.mxu3 %vm589_vm14, %v7062_v40  ;;  %v4480_v40 = vld [vmem:[#allocation2 + $0x88] sm:$0xff] }
 0x1fc   : > { %v1367_v6 = vpop.f32.mrf.mxu2  ;;  %4298 = vmatmul.msk.f32.gmra.mxu0 %vm589_vm14, %v7064_v1  ;;  %v7069_v1 = vld [vmem:[#allocation61_spill] sm:$0xff] }
 0x1fd   : > { %v1770_v52 = vpop.f32.mrf.mxu3  ;;  %v1368_v56 = vadd.f32 %v1367_v6, %v1155_v63  ;;  %v1158_v19 = vpop.f32.mrf.mxu1 }
 0x1fe   : > { %v5990_v12 = vadd.f32 %v1770_v52, %v1365_v38 }
 0x200   : > { %7063 = vst [vmem:[#allocation9_spill] sm:$0xff] %v5990_v12  ;;  %4205 = vmatmul.msk.f32.gmra.mxu1 %vm589_vm14, %v7065_v36  ;;  %v7068_v12 = vld [vmem:[#allocation56_spill] sm:$0xff]  ;;  %v4481_v36 = vld [vmem:[#allocation2 + $0x90] sm:$0xff] }
 0x201   : > { %v6000_v44 = vpop.f32.mrf.mxu0 }
 0x202   : > { %4239 = vmatmul.msk.f32.gmra.mxu2 %vm589_vm14, %v4480_v40  ;;  %v7070_v40 = vld [vmem:[#allocation62_spill] sm:$0xff] }
 0x203   : > { %4272 = vmatmul.msk.f32.gmra.mxu3 %vm589_vm14, %v7066_v37 }
 0x204   : > { %4299 = vmatmul.msk.f32.gmra.mxu0 %vm589_vm14, %v7068_v12  ;;  %v1281_v12 = vadd.f32 %v5904_v58, %v5747_v46  ;;  %v2752_v46 = vsel %vm7075_vm4, %v5919_v55, 0.0 }
 0x205   : > { %v1370_v63 = vpop.f32.mrf.mxu2  ;;  %v1161_v49 = vpop.f32.mrf.mxu1 }
 0x206   : > { %v1773_v38 = vpop.f32.mrf.mxu3  ;;  %v1371_v6 = vadd.f32 %v1370_v63, %v1158_v19 }
 0x207   : > { %v6002_v52 = vadd.f32 %v1773_v38, %v1368_v56  ;;  %v7072_v38 = vld [vmem:[#allocation42_spill] sm:$0xff] }
 0x208   : > { %4206 = vmatmul.msk.f32.gmra.mxu1 %vm589_vm14, %v7069_v1  ;;  %v7073_v1 = vld [vmem:[#allocation65_spill] sm:$0xff] }
 0x209   : > { %7067 = vst [vmem:[#allocation36_spill] sm:$0xff] %v6002_v52  ;;  %v6011_v37 = vpop.f32.mrf.mxu0 }
 0x20a   : > { %4240 = vmatmul.msk.f32.gmra.mxu2 %vm589_vm14, %v4481_v36  ;;  %v4482_v36 = vld [vmem:[#allocation2 + $0x98] sm:$0xff] }
 0x20b   : > { %4273 = vmatmul.msk.f32.gmra.mxu3 %vm589_vm14, %v7070_v40  ;;  %v7074_v40 = vld [vmem:[#allocation66_spill] sm:$0xff] }
 0x20c   : > { %4300 = vmatmul.msk.f32.gmra.mxu0 %vm589_vm14, %v7072_v38  ;;  %v1284_v38 = vadd.f32 %v5917_v31, %v5761_v9  ;;  %v2753_v9 = vsel %vm7078_vm10, %v5935_v50, 0.0 }
 0x20d   : > { %v1373_v17 = vpop.f32.mrf.mxu2  ;;  %v1996_v63 = vpop.f32.mrf.mxu1 }
 0x20e   : > { %v1776_v20 = vpop.f32.mrf.mxu3  ;;  %v1374_v19 = vadd.f32 %v1373_v17, %v1161_v49 }
 0x20f   : > { %v6013_v56 = vadd.f32 %v1776_v20, %v1371_v6 }
 0x210   : > { %4207 = vmatmul.msk.f32.gmra.mxu1 %vm589_vm14, %v7073_v1 }
 0x211   : > { %7071 = vst [vmem:[#allocation3_spill] sm:$0xff] %v6013_v56  ;;  %v1686_v52 = vpop.f32.mrf.mxu0 }
 0x212   : > { %4241 = vmatmul.msk.f32.gmra.mxu2 %vm589_vm14, %v4482_v36  ;;  %v1782_v17 = vadd.f32 %v1686_v52, %v1281_v12  ;;  %v7076_v36 = vld [vmem:[#allocation67_spill] sm:$0xff]  ;;  %v4483_v52 = vld [vmem:[#allocation2 + $0xa0] sm:$0xff] }
 0x213   : > { %4274 = vmatmul.msk.f32.gmra.mxu3 %vm589_vm14, %v7074_v40 }
 0x214   : > { %v2092_v58 = vadd.f32 %v1996_v63, %v1782_v17  ;;  %4301 = vmatmul.msk.f32.gmra.mxu0 %vm589_vm14, %v2752_v46  ;;  %v4484_v46 = vld [vmem:[#allocation2 + $0xa8] sm:$0xff] }
 0x215   : > { %v2274_v6 = vpop.f32.mrf.mxu2  ;;  %v1999_v56 = vpop.f32.mrf.mxu1 }
 0x216   : > { %v1779_v20 = vpop.f32.mrf.mxu3  ;;  %v2370_v1 = vadd.f32 %v2274_v6, %v2092_v58  ;;  %v7079_v6 = vld [vmem:[#allocation70_spill] sm:$0xff]  ;;  %v7080_v58 = vld [vmem:[#allocation71_spill] sm:$0xff] }
 0x217   : > { %v6024_v49 = vadd.f32 %v1779_v20, %v1374_v19  ;;  %v7077_v19 = vld [vmem:[#allocation68_spill] sm:$0xff] }
 0x218   : > { %4208 = vmatmul.msk.f32.gmra.mxu1 %vm589_vm14, %v7076_v36 }
 0x219   : > { %v1689_v12 = vpop.f32.mrf.mxu0 }
 0x21a   : > { %4242 = vmatmul.msk.f32.gmra.mxu2 %vm589_vm14, %v4483_v52  ;;  %v1783_v40 = vadd.f32 %v1689_v12, %v1284_v38  ;;  %v1287_v38 = vadd.f32 %v5933_v16, %v5776_v23  ;;  %v7082_v23 = vld [vmem:[#allocation74_spill] sm:$0xff]  ;;  %v1290_v16 = vadd.f32 %v5952_v2, %v5799_v10  ;;  %v7085_v10 = vld [vmem:[#allocation76_spill] sm:$0xff]  ;;  %v1293_v2 = vadd.f32 %v5971_v48, %v5818_v35  ;;  %v7089_v35 = vld [vmem:[#allocation79_spill] sm:$0xff] }
 0x21b   : > { %4275 = vmatmul.msk.f32.gmra.mxu3 %vm589_vm14, %v7077_v19  ;;  %v2754_v19 = vsel %vm7041_vm6, %v5954_v53, 0.0  ;;  %v1296_v48 = vadd.f32 %v5985_v25, %v5849_v34  ;;  %v7093_v34 = vld [vmem:[#allocation81_spill] sm:$0xff]  ;;  %v1299_v25 = vadd.f32 %v6000_v44, %v5865_v45  ;;  %v1302_v44 = vadd.f32 %v6011_v37, %v5886_v33  ;;  %v7100_v37 = vld [vmem:[#allocation83_spill] sm:$0xff] }
 0x21c   : > { %v2093_v31 = vadd.f32 %v1999_v56, %v1783_v40  ;;  %4302 = vmatmul.msk.f32.gmra.mxu0 %vm589_vm14, %v2753_v9  ;;  %v2723_v9 = vld [vmem:[#allocation2 + $0x7f] sm:$0xff]  ;;  %v2728_v33 = vld [vmem:[#allocation2 + $0xa7] sm:$0xff] }
 0x21d   : > { %v2277_v21 = vpop.f32.mrf.mxu2  ;;  %v2002_v17 = vpop.f32.mrf.mxu1  ;;  %v2727_v45 = vld [vmem:[#allocation2 + $0x9f] sm:$0xff] }
 0x21e   : > { %v2584_v55 = vpop.f32.mrf.mxu3  ;;  %v2371_v20 = vadd.f32 %v2277_v21, %v2093_v31  ;;  %v7081_v21 = vld [vmem:[#allocation73_spill] sm:$0xff] }
 0x21f   : > { %v6037_v63 = vadd.f32 %v2584_v55, %v2370_v1  ;;  %v4485_v55 = vld [vmem:[#allocation2 + $0xb0] sm:$0xff] }
 0x220   : > { %4209 = vmatmul.msk.f32.gmra.mxu1 %vm589_vm14, %v7079_v6 }
 0x221   : > { %v1692_v1 = vpop.f32.mrf.mxu0 }
 0x222   : > { %4243 = vmatmul.msk.f32.gmra.mxu2 %vm589_vm14, %v4484_v46  ;;  %v1784_v36 = vadd.f32 %v1692_v1, %v1287_v38  ;;  %v2755_v46 = vsel %vm7083_vm13, %v2723_v9, 0.0  ;;  %v7084_v1 = vld [vmem:[#allocation75_spill] sm:$0xff]  ;;  %v7088_v9 = vld [vmem:[#allocation77_spill] sm:$0xff] }
 0x223   : > { %4276 = vmatmul.msk.f32.gmra.mxu3 %vm589_vm14, %v7080_v58 }
 0x224   : > { %v2094_v12 = vadd.f32 %v2002_v17, %v1784_v36  ;;  %4303 = vmatmul.msk.f32.gmra.mxu0 %vm589_vm14, %v2754_v19  ;;  %v4486_v36 = vld [vmem:[#allocation2 + $0xb8] sm:$0xff] }
 0x225   : > { %v2280_v11 = vpop.f32.mrf.mxu2  ;;  %v2005_v52 = vpop.f32.mrf.mxu1 }
 0x226   : > { %v2587_v50 = vpop.f32.mrf.mxu3  ;;  %v2372_v40 = vadd.f32 %v2280_v11, %v2094_v12  ;;  %v2724_v11 = vld [vmem:[#allocation2 + $0x87] sm:$0xff] }
 0x227   : > { %v6050_v56 = vadd.f32 %v2587_v50, %v2371_v20 }
 0x228   : > { %4210 = vmatmul.msk.f32.gmra.mxu1 %vm589_vm14, %v7081_v21  ;;  %v2756_v21 = vsel %vm7086_vm5, %v2724_v11, 0.0 }
 0x229   : > { %v1695_v31 = vpop.f32.mrf.mxu0 }
 0x22a   : > { %4244 = vmatmul.msk.f32.gmra.mxu2 %vm589_vm14, %v4485_v55  ;;  %v1785_v14 = vadd.f32 %v1695_v31, %v1290_v16  ;;  %v7087_v16 = vld [vmem:[#allocation78_spill] sm:$0xff] }
 0x22b   : > { %4277 = vmatmul.msk.f32.gmra.mxu3 %vm589_vm14, %v7082_v23  ;;  %v2725_v31 = vld [vmem:[#allocation2 + $0x8f] sm:$0xff] }
 0x22c   : > { %v2095_v58 = vadd.f32 %v2005_v52, %v1785_v14  ;;  %4304 = vmatmul.msk.f32.gmra.mxu0 %vm589_vm14, %v2755_v46 }
 0x22d   : > { %v2283_v53 = vpop.f32.mrf.mxu2  ;;  %v2008_v6 = vpop.f32.mrf.mxu1 }
 0x22e   : > { %v2590_v17 = vpop.f32.mrf.mxu3  ;;  %v2373_v38 = vadd.f32 %v2283_v53, %v2095_v58  ;;  %v7090_v58 = vld [vmem:[#allocation4_spill] sm:$0xff] }
 0x22f   : > { %v6063_v20 = vadd.f32 %v2590_v17, %v2372_v40  ;;  %vm7091_vm15 = vcmp.eq.s32.totalorder %v7090_v58, 1 }
 0x230   : > { %4211 = vmatmul.msk.f32.gmra.mxu1 %vm589_vm14, %v7084_v1 }
 0x231   : > { %v1698_v50 = vpop.f32.mrf.mxu0 }
 0x232   : > { %4245 = vmatmul.msk.f32.gmra.mxu2 %vm589_vm14, %v4486_v36  ;;  %v1786_v59 = vadd.f32 %v1698_v50, %v1293_v2  ;;  %v2726_v2 = vld [vmem:[#allocation2 + $0x97] sm:$0xff] }
 0x233   : > { %4278 = vmatmul.msk.f32.gmra.mxu3 %vm589_vm14, %v7085_v10  ;;  %v7092_v10 = vld [vmem:[#allocation80_spill] sm:$0xff] }
 0x234   : > { %v2096_v55 = vadd.f32 %v2008_v6, %v1786_v59  ;;  %4305 = vmatmul.msk.f32.gmra.mxu0 %vm589_vm14, %v2756_v21  ;;  %v7094_v21 = vld [vmem:[#allocation13_spill] sm:$0xff] }
 0x235   : > { %v2286_v19 = vpop.f32.mrf.mxu2  ;;  %v2011_v40 = vpop.f32.mrf.mxu1  ;;  %vm7095_vm8 = vcmp.eq.s32.totalorder %v7094_v21, 1  ;;  %v7105_v21 = vld [vmem:[#allocation16_spill] sm:$0xff] }
 0x236   : > { %v2593_v52 = vpop.f32.mrf.mxu3  ;;  %v2374_v23 = vadd.f32 %v2286_v19, %v2096_v55  ;;  %vm7106_vm10 = vcmp.eq.s32.totalorder %v7105_v21, 1 }
 0x237   : > { %v6075_v12 = vadd.f32 %v2593_v52, %v2373_v38  ;;  %v2757_v38 = vsel %vm7091_vm15, %v2725_v31, 0.0 }
 0x238   : > { %4212 = vmatmul.msk.f32.gmra.mxu1 %vm589_vm14, %v7087_v16  ;;  %v7096_v16 = vld [vmem:[#allocation82_spill] sm:$0xff] }
 0x239   : > { %v1701_v14 = vpop.f32.mrf.mxu0 }
 0x23a   : > { %4246 = vmatmul.msk.f32.gmra.mxu2 %vm589_vm14, %v7088_v9  ;;  %v1787_v13 = vadd.f32 %v1701_v14, %v1296_v48 }
 0x23b   : > { %4279 = vmatmul.msk.f32.gmra.mxu3 %vm589_vm14, %v7089_v35 }
 0x23c   : > { %v2097_v1 = vadd.f32 %v2011_v40, %v1787_v13  ;;  %4306 = vmatmul.msk.f32.gmra.mxu0 %vm589_vm14, %v2757_v38 }
 0x23d   : > { %v2289_v53 = vpop.f32.mrf.mxu2  ;;  %v2014_v46 = vpop.f32.mrf.mxu1 }
 0x23e   : > { %v2596_v17 = vpop.f32.mrf.mxu3  ;;  %v2375_v36 = vadd.f32 %v2289_v53, %v2097_v1  ;;  %v7097_v53 = vld [vmem:[#allocation12_spill] sm:$0xff] }
 0x23f   : > { %v6088_v6 = vadd.f32 %v2596_v17, %v2374_v23  ;;  %vm7098_vm9 = vcmp.eq.s32.totalorder %v7097_v53, 1  ;;  %v7112_v53 = vld [vmem:[#allocation6_spill] sm:$0xff] }
 0x240   : > { %4213 = vmatmul.msk.f32.gmra.mxu1 %vm589_vm14, %v5506_v57  ;;  %v2758_v57 = vsel %vm7095_vm8, %v2726_v2, 0.0  ;;  %vm7113_vm13 = vcmp.eq.s32.totalorder %v7112_v53, 1 }
 0x241   : > { %v1704_v11 = vpop.f32.mrf.mxu0 }
 0x242   : > { %4247 = vmatmul.msk.f32.gmra.mxu2 %vm589_vm14, %v7092_v10  ;;  %v1788_v50 = vadd.f32 %v1704_v11, %v1299_v25  ;;  %v7101_v25 = vld [vmem:[#allocation5_spill] sm:$0xff] }
 0x243   : > { %4280 = vmatmul.msk.f32.gmra.mxu3 %vm589_vm14, %v7093_v34  ;;  %vm7102_vm4 = vcmp.eq.s32.totalorder %v7101_v25, 1  ;;  %v7104_v11 = vld [vmem:[#allocation85_spill] sm:$0xff] }
 0x244   : > { %v2098_v55 = vadd.f32 %v2014_v46, %v1788_v50  ;;  %4307 = vmatmul.msk.f32.gmra.mxu0 %vm589_vm14, %v2758_v57  ;;  %v2760_v2 = vsel %vm7102_vm4, %v2728_v33, 0.0  ;;  %v7117_v25 = vld [vmem:[#allocation17_spill] sm:$0xff] }
 0x245   : > { %v2292_v59 = vpop.f32.mrf.mxu2  ;;  %v2017_v40 = vpop.f32.mrf.mxu1  ;;  %vm7118_vm15 = vcmp.eq.s32.totalorder %v7117_v25, 1 }
 0x246   : > { %v2599_v19 = vpop.f32.mrf.mxu3  ;;  %v2376_v23 = vadd.f32 %v2292_v59, %v2098_v55 }
 0x247   : > { %v6101_v52 = vadd.f32 %v2599_v19, %v2375_v36 }
 0x248   : > { %4214 = vmatmul.msk.f32.gmra.mxu1 %vm589_vm14, %v5531_v28  ;;  %v2759_v28 = vsel %vm7098_vm9, %v2727_v45, 0.0  ;;  %v7108_v45 = vld [vmem:[#allocation14_spill] sm:$0xff] }
 0x249   : > { %v1707_v9 = vpop.f32.mrf.mxu0  ;;  %vm7109_vm6 = vcmp.eq.s32.totalorder %v7108_v45, 1 }
 0x24a   : > { %4248 = vmatmul.msk.f32.gmra.mxu2 %vm589_vm14, %v7096_v16  ;;  %v1789_v35 = vadd.f32 %v1707_v9, %v1302_v44 }
 0x24b   : > { %4281 = vmatmul.msk.f32.gmra.mxu3 %vm589_vm14, %v5535_v22  ;;  %v7099_v22 = vld [vmem:[#allocation84_spill] sm:$0xff] }
 0x24c   : > { %v2099_v17 = vadd.f32 %v2017_v40, %v1789_v35  ;;  %4308 = vmatmul.msk.f32.gmra.mxu0 %vm589_vm14, %v2759_v28 }
 0x24d   : > { %v2295_v48 = vpop.f32.mrf.mxu2  ;;  %v2020_v13 = vpop.f32.mrf.mxu1 }
 0x24e   : > { %v2602_v31 = vpop.f32.mrf.mxu3  ;;  %v2377_v46 = vadd.f32 %v2295_v48, %v2099_v17  ;;  %v2100_v58 = vadd.f32 %v2020_v13, %v7100_v37  ;;  %v7115_v37 = vld [vmem:[#allocation19_spill] sm:$0xff] }
 0x24f   : > { %v6114_v14 = vadd.f32 %v2602_v31, %v2376_v23  ;;  %vm7116_vm5 = vcmp.eq.s32.totalorder %v7115_v37, 1  ;;  %v7130_v37 = vld [vmem:[#allocation91_spill] sm:$0xff] }
 0x250   : > { %4215 = vmatmul.msk.f32.gmra.mxu1 %vm589_vm14, %v5558_v24  ;;  %v7103_v24 = vld [vmem:[#allocation86_spill] sm:$0xff] }
 0x252   : > { %4249 = vmatmul.msk.f32.gmra.mxu2 %vm589_vm14, %v7099_v22 }
 0x253   : > { %4282 = vmatmul.msk.f32.gmra.mxu3 %vm589_vm14, %v5562_v27  ;;  %v2729_v27 = vld [vmem:[#allocation2 + $0xaf] sm:$0xff] }
 0x254   : > { %4309 = vmatmul.msk.f32.gmra.mxu0 %vm589_vm14, %v2760_v2  ;;  %v2761_v57 = vsel %vm7106_vm10, %v2729_v27, 0.0 }
 0x255   : > { %v2298_v38 = vpop.f32.mrf.mxu2  ;;  %v2023_v34 = vpop.f32.mrf.mxu1 }
 0x256   : > { %v2605_v1 = vpop.f32.mrf.mxu3  ;;  %v6126_v36 = vadd.f32 %v2298_v38, %v2100_v58  ;;  %v2101_v50 = vadd.f32 %v2023_v34, %v7104_v11  ;;  %v6188_v38 = vld [vmem:[#allocation2 + $0x107] sm:$0xff]  ;;  %v6206_v11 = vld [vmem:[#allocation2 + $0x10f] sm:$0xff] }
 0x257   : > { %v6128_v10 = vadd.f32 %v2605_v1, %v2377_v46 }
 0x258   : > { %4216 = vmatmul.msk.f32.gmra.mxu1 %vm589_vm14, %v5588_v18  ;;  %v7107_v18 = vld [vmem:[#allocation87_spill] sm:$0xff] }
 0x25a   : > { %4250 = vmatmul.msk.f32.gmra.mxu2 %vm589_vm14, %v5577_v54  ;;  %v2730_v54 = vld [vmem:[#allocation2 + $0xb7] sm:$0xff] }
 0x25b   : > { %4283 = vmatmul.msk.f32.gmra.mxu3 %vm589_vm14, %v7103_v24  ;;  %v2762_v9 = vsel %vm7109_vm6, %v2730_v54, 0.0  ;;  %v6216_v54 = vpop.f32.mrf.mxu0 }
 0x25c   : > { %4310 = vmatmul.msk.f32.gmra.mxu0 %vm589_vm14, %v2761_v57  ;;  %v1877_v57 = vsel %vm883_vm11, %v6206_v11, 0.0 }
 0x25d   : > { %v2301_v59 = vpop.f32.mrf.mxu2  ;;  %v2026_v40 = vpop.f32.mrf.mxu1 }
 0x25e   : > { %v6140_v19 = vadd.f32 %v2301_v59, %v2101_v50  ;;  %v2102_v55 = vadd.f32 %v2026_v40, %v7107_v18  ;;  %v7121_v40 = vld [vmem:[#allocation8_spill] sm:$0xff]  ;;  %v2464_v18 = vsel %vm1534_vm2, %v5820_v8, 0.0  ;;  %v2465_v8 = vsel %vm1535_vm7, %v5778_v5, 0.0  ;;  %v3023_v5 = vld [vmem:[#allocation2 + $0x30] sm:$0xff] }
 0x25f   : > { %vm7122_vm9 = vcmp.eq.s32.totalorder %v7121_v40, 1 }
 0x260   : > { %4217 = vmatmul.msk.f32.gmra.mxu1 %vm589_vm14, %v5623_v60  ;;  %v7110_v60 = vld [vmem:[#allocation89_spill] sm:$0xff] }
 0x262   : > { %4251 = vmatmul.msk.f32.gmra.mxu2 %vm589_vm14, %v5612_v42  ;;  %v2731_v42 = vld [vmem:[#allocation2 + $0xbf] sm:$0xff] }
 0x263   : > { %4284 = vmatmul.msk.f32.gmra.mxu3 %vm589_vm14, %v5627_v4  ;;  %v7111_v4 = vld [vmem:[#allocation88_spill] sm:$0xff]  ;;  %v2763_v28 = vsel %vm7113_vm13, %v2731_v42, 0.0 }
 0x264   : > { %4311 = vmatmul.msk.f32.gmra.mxu0 %vm589_vm14, %v2762_v9 }
 0x265   : > { %v2304_v23 = vpop.f32.mrf.mxu2  ;;  %v2029_v44 = vpop.f32.mrf.mxu1 }
 0x266   : > { %v6152_v16 = vadd.f32 %v2304_v23, %v2102_v55  ;;  %v2103_v35 = vadd.f32 %v2029_v44, %v7111_v4  ;;  %v2735_v55 = vld [vmem:[#allocation2 + $0xdf] sm:$0xff]  ;;  %v3022_v4 = vld [vmem:[#allocation2 + $0x28] sm:$0xff] }
 0x268   : > { %4218 = vmatmul.msk.f32.gmra.mxu1 %vm589_vm14, %v5659_v7  ;;  %v2732_v7 = vld [vmem:[#allocation2 + $0xc7] sm:$0xff] }
 0x269   : > { %v2764_v58 = vsel %vm7116_vm5, %v2732_v7, 0.0 }
 0x26a   : > { %4252 = vmatmul.msk.f32.gmra.mxu2 %vm589_vm14, %v7110_v60  ;;  %v7124_v60 = vld [vmem:[#allocation22_spill] sm:$0xff] }
 0x26b   : > { %4285 = vmatmul.msk.f32.gmra.mxu3 %vm589_vm14, %v5663_v0  ;;  %v7114_v0 = vld [vmem:[#allocation90_spill] sm:$0xff]  ;;  %vm7125_vm4 = vcmp.eq.s32.totalorder %v7124_v60, 1  ;;  %v7138_v60 = vld [vmem:[#allocation95_spill] sm:$0xff] }
 0x26c   : > { %4312 = vmatmul.msk.f32.gmra.mxu0 %vm589_vm14, %v2763_v28  ;;  %v2767_v42 = vsel %vm7125_vm4, %v2735_v55, 0.0 }
 0x26d   : > { %v2307_v48 = vpop.f32.mrf.mxu2  ;;  %v2032_v13 = vpop.f32.mrf.mxu1 }
 0x26e   : > { %v6164_v31 = vadd.f32 %v2307_v48, %v2103_v35  ;;  %v2104_v17 = vadd.f32 %v2032_v13, %v7114_v0  ;;  %v7126_v35 = vld [vmem:[#allocation49_spill] sm:$0xff]  ;;  %v7127_v0 = vld [vmem:[#allocation20_spill] sm:$0xff] }
 0x26f   : > { %v2736_v48 = vld [vmem:[#allocation2 + $0xe7] sm:$0xff]  ;;  %vm7128_vm10 = vcmp.eq.s32.totalorder %v7127_v0, 1 }
 0x270   : > { %4219 = vmatmul.msk.f32.gmra.mxu1 %vm589_vm14, %v5687_v43  ;;  %v7141_v0 = vld [vmem:[#allocation101_spill] sm:$0xff] }
 0x272   : > { %4253 = vmatmul.msk.f32.gmra.mxu2 %vm589_vm14, %v5676_v32  ;;  %v2733_v32 = vld [vmem:[#allocation2 + $0xcf] sm:$0xff] }
 0x273   : > { %4286 = vmatmul.msk.f32.gmra.mxu3 %vm589_vm14, %v5691_v62  ;;  %v2765_v2 = vsel %vm7118_vm15, %v2733_v32, 0.0 }
 0x274   : > { %4313 = vmatmul.msk.f32.gmra.mxu0 %vm589_vm14, %v2764_v58 }
 0x275   : > { %v2310_v46 = vpop.f32.mrf.mxu2  ;;  %v2035_v33 = vpop.f32.mrf.mxu1 }
 0x276   : > { %v6176_v22 = vadd.f32 %v2310_v46, %v2104_v17  ;;  %v2105_v43 = vadd.f32 %v2035_v33, %v5701_v15  ;;  %v2734_v15 = vld [vmem:[#allocation2 + $0xd7] sm:$0xff]  ;;  %v2768_v17 = vsel %vm7128_vm10, %v2736_v48, 0.0  ;;  %v2737_v33 = vld [vmem:[#allocation2 + $0xef] sm:$0xff] }
 0x277   : > { %v2766_v21 = vsel %vm7122_vm9, %v2734_v15, 0.0  ;;  %v7129_v46 = vld [vmem:[#allocation72_spill] sm:$0xff]  ;;  %v7139_v48 = vld [vmem:[#allocation26_spill] sm:$0xff] }
 0x278   : > { %4220 = vmatmul.msk.f32.gmra.mxu1 %vm589_vm14, %v5715_v51  ;;  %v7119_v51 = vld [vmem:[#allocation24_spill] sm:$0xff]  ;;  %vm7140_vm5 = vcmp.eq.s32.totalorder %v7139_v48, 1  ;;  %v7151_v48 = vld [vmem:[#allocation102_spill] sm:$0xff] }
 0x279   : > { %vm7120_vm8 = vcmp.eq.s32.totalorder %v7119_v51, 1  ;;  %v2738_v15 = vld [vmem:[#allocation2 + $0xf7] sm:$0xff] }
 0x27a   : > { %4254 = vmatmul.msk.f32.gmra.mxu2 %vm589_vm14, %v5704_v47  ;;  %v1876_v47 = vsel %vm7120_vm8, %v6188_v38, 0.0 }
 0x27b   : > { %4287 = vmatmul.msk.f32.gmra.mxu3 %vm589_vm14, %v5719_v39  ;;  %v6199_v39 = vld [vmem:[#allocation2 + $0x108] sm:$0xff] }
 0x27c   : > { %4314 = vmatmul.msk.f32.gmra.mxu0 %vm589_vm14, %v2765_v2  ;;  %v3024_v2 = vld [vmem:[#allocation2 + $0x38] sm:$0xff] }
 0x27d   : > { %v2313_v62 = vpop.f32.mrf.mxu2  ;;  %v2038_v34 = vpop.f32.mrf.mxu1 }
 0x27e   : > { %v6190_v1 = vadd.f32 %v2313_v62, %v2105_v43  ;;  %v2106_v24 = vadd.f32 %v2038_v34, %v5728_v61  ;;  %v6219_v61 = vld [vmem:[#allocation2 + $0x110] sm:$0xff] }
 0x27f   : > { %v7131_v34 = vld [vmem:[#allocation11_spill] sm:$0xff] }
 0x280   : > { %4221 = vmatmul.msk.f32.gmra.mxu1 %vm589_vm14, %v1876_v47  ;;  %vm7132_vm6 = vcmp.eq.s32.totalorder %v7131_v34, 1  ;;  %v7133_v47 = vld [vmem:[#allocation64_spill] sm:$0xff] }
 0x281   : > { %v2769_v25 = vsel %vm7132_vm6, %v2737_v33, 0.0  ;;  %v7143_v33 = vld [vmem:[#allocation98_spill] sm:$0xff]  ;;  %v7144_v34 = vld [vmem:[#allocation28_spill] sm:$0xff] }
 0x282   : > { %4255 = vmatmul.msk.f32.gmra.mxu2 %vm589_vm14, %v6199_v39  ;;  %vm7145_vm15 = vcmp.eq.s32.totalorder %v7144_v34, 1  ;;  %v2743_v34 = vld [vmem:[#allocation2 + $0x11f] sm:$0xff] }
 0x283   : > { %4288 = vmatmul.msk.f32.gmra.mxu3 %vm589_vm14, %v5740_v29 }
 0x284   : > { %4315 = vmatmul.msk.f32.gmra.mxu0 %vm589_vm14, %v2766_v21 }
 0x285   : > { %v2316_v27 = vpop.f32.mrf.mxu2  ;;  %v2041_v59 = vpop.f32.mrf.mxu1 }
 0x286   : > { %v6208_v50 = vadd.f32 %v2316_v27, %v2106_v24  ;;  %v2107_v23 = vadd.f32 %v2041_v59, %v5749_v26  ;;  %v6240_v26 = vpop.f32.mrf.mxu0  ;;  %v7134_v24 = vld [vmem:[#allocation93_spill] sm:$0xff] }
 0x288   : > { %4222 = vmatmul.msk.f32.gmra.mxu1 %vm589_vm14, %v1877_v57  ;;  %v7135_v57 = vld [vmem:[#allocation23_spill] sm:$0xff] }
 0x289   : > { %vm7136_vm13 = vcmp.eq.s32.totalorder %v7135_v57, 1 }
 0x28a   : > { %4256 = vmatmul.msk.f32.gmra.mxu2 %vm589_vm14, %v6219_v61 }
 0x28b   : > { %4289 = vmatmul.msk.f32.gmra.mxu3 %vm589_vm14, %v2464_v18  ;;  %v2770_v18 = vsel %vm7136_vm13, %v2738_v15, 0.0  ;;  %v2775_v15 = vsel %vm883_vm11, %v2743_v34, 0.0  ;;  %v7161_v34 = vld [vmem:[#allocation18_spill] sm:$0xff] }
 0x28c   : > { %4316 = vmatmul.msk.f32.gmra.mxu0 %vm589_vm14, %v2767_v42  ;;  %vm7162_vm11 = vcmp.eq.s32.totalorder %v7161_v34, 1  ;;  %v7169_v34 = vld [vmem:[#allocation32_spill] sm:$0xff] }
 0x28d   : > { %v2319_v44 = vpop.f32.mrf.mxu2  ;;  %v2044_v9 = vpop.f32.mrf.mxu1 }
 0x28e   : > { %v6228_v45 = vadd.f32 %v2319_v44, %v2107_v23  ;;  %v2108_v13 = vadd.f32 %v2044_v9, %v5765_v30  ;;  %v6252_v32 = vpop.f32.mrf.mxu0  ;;  %v3025_v23 = vld [vmem:[#allocation2 + $0x40] sm:$0xff] }
 0x28f   : > { %v7137_v44 = vld [vmem:[#allocation53_spill] sm:$0xff] }
 0x290   : > { %4327 = vmatmul.msk.f32.vlgmr.msra.gmra.mxu1 %vm589_vm14, %v3022_v4  ;;  %v2739_v9 = vld [vmem:[#allocation2 + $0xff] sm:$0xff] }
 0x292   : > { %4361 = vmatmul.msk.f32.vlgmr.msra.gmra.mxu2 %vm589_vm14, %v7126_v35 }
 0x293   : > { %4290 = vmatmul.msk.f32.gmra.mxu3 %vm589_vm14, %v2465_v8 }
 0x294   : > { %4317 = vmatmul.msk.f32.gmra.mxu0 %vm589_vm14, %v2768_v17 }
 0x295   : > { %v2322_v53 = vpop.f32.mrf.mxu2  ;;  %v2047_v7 = vpop.f32.mrf.mxu1 }
 0x296   : > { %v6243_v28 = vadd.f32 %v2322_v53, %v2108_v13  ;;  %v2109_v58 = vadd.f32 %v2047_v7, %v7130_v37  ;;  %v6267_v55 = vpop.f32.mrf.mxu0  ;;  %v2771_v13 = vsel %vm7140_vm5, %v2739_v9, 0.0  ;;  %v6279_v53 = vpop.f32.mrf.mxu3  ;;  %v3026_v7 = vld [vmem:[#allocation2 + $0x48] sm:$0xff]  ;;  %v2773_v9 = vsel %vm881_vm0, %v6206_v11, 0.0  ;;  %vm7152_vm0 = vmmov %vm7120_vm8 }
 0x298   : > { %4328 = vmatmul.msk.f32.gmra.mxu1 %vm589_vm14, %v3023_v5  ;;  %v3336_v5 = vsel %vm1508_vm12, %v7141_v0, 0.0 }
 0x29a   : > { %4362 = vmatmul.msk.f32.gmra.mxu2 %vm589_vm14, %v7129_v46 }
 0x29c   : > { %4318 = vmatmul.msk.f32.gmra.mxu0 %vm589_vm14, %v2769_v25  ;;  %v2772_v25 = vsel %vm7145_vm15, %v6188_v38, 0.0 }
 0x29d   : > { %v2325_v30 = vpop.f32.mrf.mxu2  ;;  %v2050_v62 = vpop.f32.mrf.mxu1 }
 0x29e   : > { %v6254_v43 = vadd.f32 %v2325_v30, %v2109_v58  ;;  %v2110_v27 = vadd.f32 %v2050_v62, %v7134_v24  ;;  %v6284_v46 = vpop.f32.mrf.mxu0 }
 0x2a0   : > { %4329 = vmatmul.msk.f32.gmra.mxu1 %vm589_vm14, %v3024_v2  ;;  %v3027_v2 = vld [vmem:[#allocation2 + $0x50] sm:$0xff] }
 0x2a2   : > { %4363 = vmatmul.msk.f32.gmra.mxu2 %vm589_vm14, %v7133_v47  ;;  %v7146_v47 = vld [vmem:[#allocation103_spill] sm:$0xff] }
 0x2a3   : > { %v3337_v24 = vsel %vm1509_vm3, %v7146_v47, 0.0  ;;  %vm7170_vm3 = vcmp.eq.s32.totalorder %v7169_v34, 1 }
 0x2a4   : > { %4319 = vmatmul.msk.f32.gmra.mxu0 %vm589_vm14, %v2770_v18 }
 0x2a5   : > { %v2328_v59 = vpop.f32.mrf.mxu2  ;;  %v2053_v21 = vpop.f32.mrf.mxu1 }
 0x2a6   : > { %v6263_v40 = vadd.f32 %v2328_v59, %v2110_v27  ;;  %v2111_v42 = vadd.f32 %v2053_v21, %v7138_v60  ;;  %v6299_v27 = vpop.f32.mrf.mxu3  ;;  %v6302_v59 = vpop.f32.mrf.mxu0  ;;  %v7148_v21 = vld [vmem:[#allocation99_spill] sm:$0xff]  ;;  %v3028_v60 = vld [vmem:[#allocation2 + $0x58] sm:$0xff] }
 0x2a8   : > { %4330 = vmatmul.msk.f32.gmra.mxu1 %vm589_vm14, %v3025_v23 }
 0x2aa   : > { %4364 = vmatmul.msk.f32.gmra.mxu2 %vm589_vm14, %v7137_v44  ;;  %v7156_v44 = vld [vmem:[#allocation31_spill] sm:$0xff] }
 0x2ac   : > { %4320 = vmatmul.msk.f32.gmra.mxu0 %vm589_vm14, %v2771_v13 }
 0x2ad   : > { %v2331_v4 = vpop.f32.mrf.mxu2  ;;  %v2056_v35 = vpop.f32.mrf.mxu1 }
 0x2ae   : > { %v6274_v8 = vadd.f32 %v2331_v4, %v2111_v42  ;;  %v2112_v37 = vadd.f32 %v2056_v35, %v7143_v33  ;;  %v7150_v42 = vld [vmem:[#allocation57_spill] sm:$0xff]  ;;  %v2742_v4 = vld [vmem:[#allocation2 + $0x117] sm:$0xff]  ;;  %v6314_v35 = vpop.f32.mrf.mxu3 }
 0x2af   : > { %v2774_v11 = vsel %vm7152_vm0, %v2742_v4, 0.0  ;;  %v3029_v33 = vld [vmem:[#allocation2 + $0x60] sm:$0xff] }
 0x2b0   : > { %4331 = vmatmul.msk.f32.gmra.mxu1 %vm589_vm14, %v3026_v7  ;;  %v6317_v7 = vpop.f32.mrf.mxu0 }
 0x2b2   : > { %4365 = vmatmul.msk.f32.gmra.mxu2 %vm589_vm14, %v3336_v5 }
 0x2b4   : > { %4321 = vmatmul.msk.f32.gmra.mxu0 %vm589_vm14, %v2772_v25  ;;  %v7154_v25 = vld [vmem:[#allocation104_spill] sm:$0xff] }
 0x2b5   : > { %v2334_v58 = vpop.f32.mrf.mxu2  ;;  %v2059_v62 = vpop.f32.mrf.mxu1 }
 0x2b6   : > { %v6289_v30 = vadd.f32 %v2334_v58, %v2112_v37  ;;  %v2113_v57 = vadd.f32 %v2059_v62, %v7148_v21  ;;  %v4487_v37 = vld [vmem:[#allocation2 + $0x61] sm:$0xff]  ;;  %v6333_v21 = vpop.f32.mrf.mxu3  ;;  %v3310_v58 = vld [vmem:[#allocation2 + $0x79] sm:$0xff] }
 0x2b7   : > { %v3339_v62 = vsel %vm1511_vm1, %v4487_v37, 0.0 }
 0x2b8   : > { %4332 = vmatmul.msk.f32.gmra.mxu1 %vm589_vm14, %v3027_v2 }
 0x2ba   : > { %4366 = vmatmul.msk.f32.gmra.mxu2 %vm589_vm14, %v3337_v24 }
 0x2bc   : > { %4322 = vmatmul.msk.f32.gmra.mxu0 %vm589_vm14, %v2773_v9 }
 0x2bd   : > { %v2337_v18 = vpop.f32.mrf.mxu2  ;;  %v2062_v38 = vpop.f32.mrf.mxu1 }
 0x2be   : > { %v6305_v23 = vadd.f32 %v2337_v18, %v2113_v57  ;;  %v2114_v13 = vadd.f32 %v2062_v38, %v7151_v48  ;;  %v6335_v57 = vpop.f32.mrf.mxu0  ;;  %v3030_v18 = vld [vmem:[#allocation2 + $0x68] sm:$0xff]  ;;  %v7155_v38 = vld [vmem:[#allocation48_spill] sm:$0xff]  ;;  %v6344_v4 = vpop.f32.mrf.mxu3  ;;  %v7157_v48 = vld [vmem:[#allocation25_spill] sm:$0xff] }
 0x2c0   : > { %4333 = vmatmul.msk.f32.gmra.mxu1 %vm589_vm14, %v3028_v60 }
 0x2c2   : > { %4367 = vmatmul.msk.f32.gmra.mxu2 %vm589_vm14, %v7150_v42 }
 0x2c4   : > { %4323 = vmatmul.msk.f32.gmra.mxu0 %vm589_vm14, %v2774_v11 }
 0x2c5   : > { %v2340_v0 = vpop.f32.mrf.mxu2  ;;  %v2065_v5 = vpop.f32.mrf.mxu1 }
 0x2c6   : > { %v6319_v17 = vadd.f32 %v2340_v0, %v2114_v13  ;;  %v2115_v2 = vadd.f32 %v2065_v5, %v7154_v25  ;;  %v7158_v13 = vld [vmem:[#allocation52_spill] sm:$0xff]  ;;  %v7159_v0 = vld [vmem:[#allocation10_spill] sm:$0xff]  ;;  %v3342_v25 = vsel %vm7162_vm11, %v3310_v58, 0.0 }
 0x2c7   : > { %v3312_v58 = vld [vmem:[#allocation2 + $0x89] sm:$0xff] }
 0x2c8   : > { %4334 = vmatmul.msk.f32.gmra.mxu1 %vm589_vm14, %v3029_v33 }
 0x2ca   : > { %4368 = vmatmul.msk.f32.gmra.mxu2 %vm589_vm14, %v3339_v62  ;;  %v7160_v62 = vld [vmem:[#allocation7_spill] sm:$0xff] }
 0x2cc   : > { %4324 = vmatmul.msk.f32.gmra.mxu0 %vm589_vm14, %v2775_v15 }
 0x2cd   : > { %v2343_v47 = vpop.f32.mrf.mxu2  ;;  %v2068_v24 = vpop.f32.mrf.mxu1 }
 0x2ce   : > { %v6331_v51 = vadd.f32 %v2343_v47, %v2115_v2  ;;  %v2116_v9 = vadd.f32 %v2068_v24, %v7156_v44  ;;  %v6358_v2 = vpop.f32.mrf.mxu3  ;;  %v7163_v47 = vld [vmem:[#allocation40_spill] sm:$0xff]  ;;  %v3311_v44 = vld [vmem:[#allocation2 + $0x81] sm:$0xff] }
 0x2d0   : > { %4335 = vmatmul.msk.f32.gmra.mxu1 %vm589_vm14, %v3030_v18 }
 0x2d2   : > { %4369 = vmatmul.msk.f32.gmra.mxu2 %vm589_vm14, %v7155_v38 }
 0x2d5   : > { %v2346_v60 = vpop.f32.mrf.mxu2  ;;  %v2071_v42 = vpop.f32.mrf.mxu1 }
 0x2d6   : > { %v6342_v41 = vadd.f32 %v2346_v60, %v2116_v9  ;;  %v2117_v5 = vadd.f32 %v2071_v42, %v7159_v0  ;;  %v7164_v9 = vld [vmem:[#allocation35_spill] sm:$0xff]  ;;  %v7165_v60 = vld [vmem:[#allocation29_spill] sm:$0xff]  ;;  %v6369_v0 = vpop.f32.mrf.mxu3 }
 0x2d7   : > { %vm7166_vm12 = vcmp.eq.s32.totalorder %v7165_v60, 1 }
 0x2d8   : > { %4336 = vmatmul.msk.f32.gmra.mxu1 %vm589_vm14, %v7157_v48  ;;  %v3343_v42 = vsel %vm7166_vm12, %v3311_v44, 0.0  ;;  %v7167_v48 = vld [vmem:[#allocation15_spill] sm:$0xff] }
 0x2da   : > { %4370 = vmatmul.msk.f32.gmra.mxu2 %vm589_vm14, %v7158_v13 }
 0x2dd   : > { %v2349_v11 = vpop.f32.mrf.mxu2  ;;  %v2074_v37 = vpop.f32.mrf.mxu1 }
 0x2de   : > { %v6351_v33 = vadd.f32 %v2349_v11, %v2117_v5  ;;  %v2118_v15 = vadd.f32 %v2074_v37, %v7163_v47  ;;  %v7171_v47 = vld [vmem:[#allocation9_spill] sm:$0xff]  ;;  %v6380_v60 = vpop.f32.mrf.mxu3 }
 0x2df   : > { %v2695_v29 = vadd.f32 %v6380_v60, %v6228_v45 }
 0x2e0   : > { %4337 = vmatmul.msk.f32.gmra.mxu1 %vm589_vm14, %v7160_v62  ;;  %v3034_v62 = vld [vmem:[#allocation2 + $0x88] sm:$0xff] }
 0x2e2   : > { %4371 = vmatmul.msk.f32.gmra.mxu2 %vm589_vm14, %v3342_v25  ;;  %v3344_v25 = vsel %vm7170_vm3, %v3312_v58, 0.0 }
 0x2e5   : > { %v2352_v24 = vpop.f32.mrf.mxu2  ;;  %v2077_v38 = vpop.f32.mrf.mxu1 }
 0x2e6   : > { %v6361_v18 = vadd.f32 %v2352_v24, %v2118_v15  ;;  %v2119_v13 = vadd.f32 %v2077_v38, %v7167_v48  ;;  %v7173_v48 = vld [vmem:[#allocation30_spill] sm:$0xff] }
 0x2e7   : > { %vm7174_vm1 = vcmp.eq.s32.totalorder %v7173_v48, 1 }
 0x2e8   : > { %4338 = vmatmul.msk.f32.gmra.mxu1 %vm589_vm14, %v7164_v9  ;;  %v3313_v9 = vld [vmem:[#allocation2 + $0x91] sm:$0xff] }
 0x2ea   : > { %4372 = vmatmul.msk.f32.gmra.mxu2 %vm589_vm14, %v3343_v42  ;;  %v3035_v42 = vld [vmem:[#allocation2 + $0x90] sm:$0xff] }
 0x2ed   : > { %v2355_v5 = vpop.f32.mrf.mxu2  ;;  %v2080_v37 = vpop.f32.mrf.mxu1 }
 0x2ee   : > { %v6371_v11 = vadd.f32 %v2355_v5, %v2119_v13  ;;  %v2120_v15 = vadd.f32 %v2080_v37, %v7171_v47  ;;  %v3345_v13 = vsel %vm7174_vm1, %v3313_v9, 0.0  ;;  %v7175_v5 = vld [vmem:[#allocation36_spill] sm:$0xff]  ;;  %v7179_v9 = vld [vmem:[#allocation3_spill] sm:$0xff] }
 0x2ef   : > { %v3036_v47 = vld [vmem:[#allocation2 + $0x98] sm:$0xff] }
 0x2f0   : > { %7168 = vst [vmem:[#allocation39_spill] sm:$0xff] %v6371_v11  ;;  %4339 = vmatmul.msk.f32.gmra.mxu1 %vm589_vm14, %v3034_v62  ;;  %v3040_v11 = vld [vmem:[#allocation2 + $0xb8] sm:$0xff] }
 0x2f2   : > { %4373 = vmatmul.msk.f32.gmra.mxu2 %vm589_vm14, %v3344_v25  ;;  %v3314_v25 = vld [vmem:[#allocation2 + $0x99] sm:$0xff] }
 0x2f5   : > { %v2358_v24 = vpop.f32.mrf.mxu2  ;;  %v2083_v38 = vpop.f32.mrf.mxu1 }
 0x2f6   : > { %v6378_v44 = vadd.f32 %v2358_v24, %v2120_v15  ;;  %v2121_v58 = vadd.f32 %v2083_v38, %v7175_v5  ;;  %v6389_v15 = vpop.f32.mrf.mxu3  ;;  %v7177_v24 = vld [vmem:[#allocation27_spill] sm:$0xff]  ;;  %v3315_v5 = vld [vmem:[#allocation2 + $0xa1] sm:$0xff] }
 0x2f7   : > { %vm7178_vm8 = vcmp.eq.s32.totalorder %v7177_v24, 1  ;;  %v2696_v60 = vadd.f32 %v6389_v15, %v6243_v28 }
 0x2f8   : > { %7172 = vst [vmem:[#allocation54_spill] sm:$0xff] %v6378_v44  ;;  %4340 = vmatmul.msk.f32.gmra.mxu1 %vm589_vm14, %v3035_v42  ;;  %v3346_v42 = vsel %vm7178_vm8, %v3314_v25, 0.0 }
 0x2fa   : > { %4374 = vmatmul.msk.f32.gmra.mxu2 %vm589_vm14, %v3345_v13 }
 0x2fd   : > { %v2361_v62 = vpop.f32.mrf.mxu2  ;;  %v2086_v37 = vpop.f32.mrf.mxu1 }
 0x2fe   : > { %v6387_v34 = vadd.f32 %v2361_v62, %v2121_v58  ;;  %v2122_v48 = vadd.f32 %v2086_v37, %v7179_v9  ;;  %v3037_v58 = vld [vmem:[#allocation2 + $0xa0] sm:$0xff]  ;;  %v3316_v9 = vld [vmem:[#allocation2 + $0xa9] sm:$0xff] }
 0x2ff   : > { %v7181_v62 = vld [vmem:[#allocation37_spill] sm:$0xff] }
 0x300   : > { %7176 = vst [vmem:[#allocation55_spill] sm:$0xff] %v6387_v34  ;;  %4341 = vmatmul.msk.f32.gmra.mxu1 %vm589_vm14, %v3036_v47  ;;  %vm7182_vm9 = vcmp.eq.s32.totalorder %v7181_v62, 1  ;;  %v6402_v47 = vpop.f32.mrf.mxu3 }
 0x301   : > { %v3347_v34 = vsel %vm7182_vm9, %v3315_v5, 0.0  ;;  %v2990_v5 = vadd.f32 %v6216_v54, %v6037_v63  ;;  %v7186_v63 = vld [vmem:[#allocation34_spill] sm:$0xff] }
 0x302   : > { %4375 = vmatmul.msk.f32.gmra.mxu2 %vm589_vm14, %v3346_v42  ;;  %vm7187_vm10 = vcmp.eq.s32.totalorder %v7186_v63, 1  ;;  %v6431_v63 = vpop.f32.mrf.mxu0 }
 0x305   : > { %v2364_v13 = vpop.f32.mrf.mxu2  ;;  %v2089_v38 = vpop.f32.mrf.mxu1 }
 0x306   : > { %v6396_v44 = vadd.f32 %v2364_v13, %v2122_v48  ;;  %v2123_v25 = vadd.f32 %v2089_v38, %v6024_v49  ;;  %v3038_v48 = vld [vmem:[#allocation2 + $0xa8] sm:$0xff]  ;;  %v7184_v13 = vld [vmem:[#allocation33_spill] sm:$0xff] }
 0x307   : > { %vm7185_vm4 = vcmp.eq.s32.totalorder %v7184_v13, 1  ;;  %v6416_v49 = vld [vmem:[%s6800_s4] ss:$0 sm:$0xff] }
 0x308   : > { %7180 = vst [vmem:[#allocation50_spill] sm:$0xff] %v6396_v44  ;;  %4342 = vmatmul.msk.f32.gmra.mxu1 %vm589_vm14, %v3037_v58  ;;  %v3348_v58 = vsel %vm7185_vm4, %v3316_v9, 0.0  ;;  %v6418_v38 = vpop.f32.mrf.mxu3  ;;  %v3039_v9 = vld [vmem:[#allocation2 + $0xb0] sm:$0xff]  ;;  %v3318_v44 = vld [vmem:[#allocation2 + $0xb9] sm:$0xff] }
 0x30a   : > { %4376 = vmatmul.msk.f32.gmra.mxu2 %vm589_vm14, %v3347_v34 }
 0x30d   : > { %v2367_v24 = vpop.f32.mrf.mxu2  ;;  %v3172_v37 = vpop.f32.mrf.mxu1 }
 0x30e   : > { %v6405_v42 = vadd.f32 %v2367_v24, %v2123_v25  ;;  %v3268_v34 = vadd.f32 %v3172_v37, %v2990_v5  ;;  %v2991_v37 = vadd.f32 %v6240_v26, %v6050_v56  ;;  %v7188_v56 = vld [vmem:[#allocation43_spill] sm:$0xff] }
 0x30f   : > { %vm7189_vm6 = vcmp.eq.s32.totalorder %v7188_v56, 1 }
 0x310   : > { %7183 = vst [vmem:[#allocation58_spill] sm:$0xff] %v6405_v42  ;;  %4343 = vmatmul.msk.f32.gmra.mxu1 %vm589_vm14, %v3038_v48  ;;  %v3317_v48 = vld [vmem:[#allocation2 + $0xb1] sm:$0xff]  ;;  %v3350_v26 = vsel %vm7189_vm6, %v3318_v44, 0.0  ;;  %v7190_v44 = vld [vmem:[#allocation46_spill] sm:$0xff] }
 0x311   : > { %v3349_v54 = vsel %vm7187_vm10, %v3317_v48, 0.0  ;;  %vm7191_vm13 = vcmp.eq.s32.totalorder %v7190_v44, 1 }
 0x312   : > { %4377 = vmatmul.msk.f32.gmra.mxu2 %vm589_vm14, %v3348_v58 }
 0x315   : > { %v3482_v62 = vpop.f32.mrf.mxu2  ;;  %v3175_v24 = vpop.f32.mrf.mxu1 }
 0x316   : > { %v3578_v25 = vadd.f32 %v3482_v62, %v3268_v34  ;;  %v3269_v5 = vadd.f32 %v3175_v24, %v2991_v37  ;;  %v2992_v24 = vadd.f32 %v6252_v32, %v6063_v20  ;;  %v2993_v32 = vadd.f32 %v6267_v55, %v6075_v12 }
 0x317   : > { %v2994_v55 = vadd.f32 %v6284_v46, %v6088_v6  ;;  %v7194_v6 = vld [vmem:[#allocation41_spill] sm:$0xff] }
 0x318   : > { %v3614_v13 = vadd.f32 %v6416_v49, %v3578_v25  ;;  %4344 = vmatmul.msk.f32.gmra.mxu1 %vm589_vm14, %v3039_v9  ;;  %v6428_v25 = vpop.f32.mrf.mxu3  ;;  %vm7195_vm15 = vcmp.eq.s32.totalorder %v7194_v6, 1 }
 0x31a   : > { %v3646_v58 = vmax.f32 %v3614_v13, 0.0  ;;  %4378 = vmatmul.msk.f32.gmra.mxu2 %vm589_vm14, %v3349_v54 }
 0x31c   : > { %4394 = vmatmul.msk.f32.vlgmr.msra.gmra.mxu3 %vm589_vm14, %v3646_v58 }
 0x31d   : > { %v3485_v34 = vpop.f32.mrf.mxu2  ;;  %v3178_v42 = vpop.f32.mrf.mxu1 }
 0x31e   : > { %v3579_v62 = vadd.f32 %v3485_v34, %v3269_v5  ;;  %v3270_v13 = vadd.f32 %v3178_v42, %v2992_v24  ;;  %v3319_v5 = vld [vmem:[#allocation2 + $0xc1] sm:$0xff] }
 0x31f   : > { %v3351_v20 = vsel %vm7191_vm13, %v3319_v5, 0.0  ;;  %v7192_v5 = vld [vmem:[#allocation38_spill] sm:$0xff] }
 0x320   : > { %v3615_v9 = vadd.f32 %v6416_v49, %v3579_v62  ;;  %4345 = vmatmul.msk.f32.gmra.mxu1 %vm589_vm14, %v3040_v11  ;;  %v3041_v62 = vld [vmem:[#allocation2 + $0xc0] sm:$0xff]  ;;  %v6441_v11 = vpop.f32.mrf.mxu3  ;;  %vm7193_vm5 = vcmp.eq.s32.totalorder %v7192_v5, 1 }
 0x322   : > { %v3647_v48 = vmax.f32 %v3615_v9, 0.0  ;;  %4379 = vmatmul.msk.f32.gmra.mxu2 %vm589_vm14, %v3350_v26  ;;  %v6449_v9 = vpop.f32.mrf.mxu0 }
 0x324   : > { %4395 = vmatmul.msk.f32.gmra.mxu3 %vm589_vm14, %v3647_v48 }
 0x325   : > { %v3488_v54 = vpop.f32.mrf.mxu2  ;;  %v3181_v58 = vpop.f32.mrf.mxu1 }
 0x326   : > { %v3580_v37 = vadd.f32 %v3488_v54, %v3270_v13  ;;  %v3271_v56 = vadd.f32 %v3181_v58, %v2993_v32  ;;  %v3320_v13 = vld [vmem:[#allocation2 + $0xc9] sm:$0xff] }
 0x327   : > { %v3352_v12 = vsel %vm7193_vm5, %v3320_v13, 0.0  ;;  %v2995_v13 = vadd.f32 %v6302_v59, %v6101_v52  ;;  %v7196_v52 = vld [vmem:[#allocation45_spill] sm:$0xff] }
 0x328   : > { %v3616_v34 = vadd.f32 %v6416_v49, %v3580_v37  ;;  %4346 = vmatmul.msk.f32.gmra.mxu1 %vm589_vm14, %v3041_v62  ;;  %v3042_v37 = vld [vmem:[#allocation2 + $0xc8] sm:$0xff]  ;;  %v6459_v58 = vpop.f32.mrf.mxu3  ;;  %vm7197_vm0 = vcmp.eq.s32.totalorder %v7196_v52, 1 }
 0x32a   : > { %v3648_v42 = vmax.f32 %v3616_v34, 0.0  ;;  %4380 = vmatmul.msk.f32.gmra.mxu2 %vm589_vm14, %v3351_v20  ;;  %v6462_v44 = vpop.f32.mrf.mxu0 }
 0x32c   : > { %4396 = vmatmul.msk.f32.gmra.mxu3 %vm589_vm14, %v3648_v42 }
 0x32d   : > { %v3491_v26 = vpop.f32.mrf.mxu2  ;;  %v3184_v48 = vpop.f32.mrf.mxu1 }
 0x32e   : > { %v3581_v24 = vadd.f32 %v3491_v26, %v3271_v56  ;;  %v3272_v62 = vadd.f32 %v3184_v48, %v2994_v55  ;;  %v3321_v56 = vld [vmem:[#allocation2 + $0xd1] sm:$0xff] }
 0x32f   : > { %v3353_v46 = vsel %vm7195_vm15, %v3321_v56, 0.0 }
 0x330   : > { %v3617_v54 = vadd.f32 %v6416_v49, %v3581_v24  ;;  %4347 = vmatmul.msk.f32.gmra.mxu1 %vm589_vm14, %v3042_v37  ;;  %v3043_v24 = vld [vmem:[#allocation2 + $0xd0] sm:$0xff]  ;;  %v6472_v37 = vpop.f32.mrf.mxu3 }
 0x332   : > { %v3649_v34 = vmax.f32 %v3617_v54, 0.0  ;;  %4381 = vmatmul.msk.f32.gmra.mxu2 %vm589_vm14, %v3352_v12 }
 0x334   : > { %4397 = vmatmul.msk.f32.gmra.mxu3 %vm589_vm14, %v3649_v34  ;;  %v3322_v34 = vld [vmem:[#allocation2 + $0xd9] sm:$0xff] }
 0x335   : > { %v3494_v20 = vpop.f32.mrf.mxu2  ;;  %v3187_v42 = vpop.f32.mrf.mxu1  ;;  %v3354_v59 = vsel %vm7197_vm0, %v3322_v34, 0.0 }
 0x336   : > { %v3582_v32 = vadd.f32 %v3494_v20, %v3272_v62  ;;  %v3273_v54 = vadd.f32 %v3187_v42, %v2995_v13  ;;  %v6474_v62 = vpop.f32.mrf.mxu0  ;;  %v2996_v42 = vadd.f32 %v6317_v7, %v6114_v14  ;;  %v3323_v13 = vld [vmem:[#allocation2 + $0xe1] sm:$0xff]  ;;  %v7198_v14 = vld [vmem:[#allocation60_spill] sm:$0xff] }
 0x337   : > { %vm7199_vm11 = vcmp.eq.s32.totalorder %v7198_v14, 1 }
 0x338   : > { %v3618_v26 = vadd.f32 %v6416_v49, %v3582_v32  ;;  %4348 = vmatmul.msk.f32.gmra.mxu1 %vm589_vm14, %v3043_v24  ;;  %v3044_v32 = vld [vmem:[#allocation2 + $0xd8] sm:$0xff]  ;;  %v3355_v7 = vsel %vm7199_vm11, %v3323_v13, 0.0 }
 0x33a   : > { %v3650_v48 = vmax.f32 %v3618_v26, 0.0  ;;  %4382 = vmatmul.msk.f32.gmra.mxu2 %vm589_vm14, %v3353_v46 }
 0x33c   : > { %4398 = vmatmul.msk.f32.gmra.mxu3 %vm589_vm14, %v3650_v48  ;;  %v6484_v48 = vpop.f32.mrf.mxu3 }
 0x33d   : > { %v3497_v5 = vpop.f32.mrf.mxu2  ;;  %v3190_v55 = vpop.f32.mrf.mxu1 }
 0x33e   : > { %v3583_v12 = vadd.f32 %v3497_v5, %v3273_v54  ;;  %v3274_v26 = vadd.f32 %v3190_v55, %v2996_v42  ;;  %v3045_v5 = vld [vmem:[#allocation2 + $0xe0] sm:$0xff]  ;;  %v2997_v55 = vadd.f32 %v6335_v57, %v6128_v10  ;;  %v3324_v42 = vld [vmem:[#allocation2 + $0xe9] sm:$0xff] }
 0x33f   : > { %v7200_v10 = vld [vmem:[#allocation47_spill] sm:$0xff] }
 0x340   : > { %v3619_v20 = vadd.f32 %v6416_v49, %v3583_v12  ;;  %4349 = vmatmul.msk.f32.gmra.mxu1 %vm589_vm14, %v3044_v32  ;;  %v6487_v12 = vpop.f32.mrf.mxu0  ;;  %vm7201_vm12 = vcmp.eq.s32.totalorder %v7200_v10, 1  ;;  %v3326_v10 = vld [vmem:[#allocation2 + $0xf9] sm:$0xff] }
 0x341   : > { %v3356_v57 = vsel %vm7201_vm12, %v3324_v42, 0.0 }
 0x342   : > { %v3651_v56 = vmax.f32 %v3619_v20, 0.0  ;;  %4383 = vmatmul.msk.f32.gmra.mxu2 %vm589_vm14, %v3354_v59 }
 0x344   : > { %4399 = vmatmul.msk.f32.gmra.mxu3 %vm589_vm14, %v3651_v56  ;;  %v2688_v56 = vadd.f32 %v6279_v53, %v6126_v36 }
 0x345   : > { %v3500_v24 = vpop.f32.mrf.mxu2  ;;  %v3193_v46 = vpop.f32.mrf.mxu1 }
 0x346   : > { %v3584_v6 = vadd.f32 %v3500_v24, %v3274_v26  ;;  %v3275_v20 = vadd.f32 %v3193_v46, %v2997_v55  ;;  %v3046_v24 = vld [vmem:[#allocation2 + $0xe8] sm:$0xff]  ;;  %v2998_v46 = vadd.f32 %v6431_v63, %v2688_v56  ;;  %v2689_v55 = vadd.f32 %v6299_v27, %v6140_v19  ;;  %v7202_v63 = vld [vmem:[#allocation63_spill] sm:$0xff] }
 0x347   : > { %vm7203_vm3 = vcmp.eq.s32.totalorder %v7202_v63, 1  ;;  %v2691_v63 = vadd.f32 %v6333_v21, %v6164_v31  ;;  %v2692_v21 = vadd.f32 %v6344_v4, %v6176_v22  ;;  %v2693_v22 = vadd.f32 %v6358_v2, %v6190_v1 }
 0x348   : > { %v3620_v54 = vadd.f32 %v6416_v49, %v3584_v6  ;;  %4350 = vmatmul.msk.f32.gmra.mxu1 %vm589_vm14, %v3045_v5  ;;  %v6499_v6 = vpop.f32.mrf.mxu3 }
 0x34a   : > { %v3652_v34 = vmax.f32 %v3620_v54, 0.0  ;;  %4384 = vmatmul.msk.f32.gmra.mxu2 %vm589_vm14, %v3355_v7  ;;  %v6506_v54 = vpop.f32.mrf.mxu0  ;;  %v3325_v7 = vld [vmem:[#allocation2 + $0xf1] sm:$0xff] }
 0x34c   : > { %4400 = vmatmul.msk.f32.gmra.mxu3 %vm589_vm14, %v3652_v34 }
 0x34d   : > { %v3503_v32 = vpop.f32.mrf.mxu2  ;;  %v3196_v59 = vpop.f32.mrf.mxu1 }
 0x34e   : > { %v3585_v52 = vadd.f32 %v3503_v32, %v3275_v20  ;;  %v3276_v5 = vadd.f32 %v3196_v59, %v2998_v46  ;;  %v3047_v20 = vld [vmem:[#allocation2 + $0xf0] sm:$0xff]  ;;  %v3357_v32 = vsel %vm7203_vm3, %v3325_v7, 0.0 }
 0x350   : > { %v3621_v26 = vadd.f32 %v6416_v49, %v3585_v52  ;;  %4351 = vmatmul.msk.f32.gmra.mxu1 %vm589_vm14, %v3046_v24  ;;  %v2999_v52 = vadd.f32 %v6449_v9, %v2689_v55  ;;  %v6517_v42 = vpop.f32.mrf.mxu3  ;;  %v3048_v9 = vld [vmem:[#allocation2 + $0xf8] sm:$0xff] }
 0x352   : > { %v3653_v13 = vmax.f32 %v3621_v26, 0.0  ;;  %4385 = vmatmul.msk.f32.gmra.mxu2 %vm589_vm14, %v3356_v57  ;;  %v6520_v26 = vpop.f32.mrf.mxu0  ;;  %v2690_v57 = vadd.f32 %v6314_v35, %v6152_v16 }
 0x354   : > { %4401 = vmatmul.msk.f32.gmra.mxu3 %vm589_vm14, %v3653_v13  ;;  %v7204_v13 = vld [vmem:[#allocation51_spill] sm:$0xff] }
 0x355   : > { %v3506_v36 = vpop.f32.mrf.mxu2  ;;  %v3199_v14 = vpop.f32.mrf.mxu1  ;;  %vm7205_vm1 = vcmp.eq.s32.totalorder %v7204_v13, 1 }
 0x356   : > { %v3586_v53 = vadd.f32 %v3506_v36, %v3276_v5  ;;  %v3277_v56 = vadd.f32 %v3199_v14, %v2999_v52  ;;  %v3358_v5 = vsel %vm7205_vm1, %v3326_v10, 0.0  ;;  %v3000_v36 = vadd.f32 %v6462_v44, %v2690_v57  ;;  %v3049_v52 = vld [vmem:[#allocation2 + $0x100] sm:$0xff]  ;;  %v7206_v44 = vld [vmem:[#allocation44_spill] sm:$0xff] }
 0x357   : > { %vm7207_vm8 = vcmp.eq.s32.totalorder %v7206_v44, 1  ;;  %v3052_v44 = vld [vmem:[#allocation2 + $0x118] sm:$0xff] }
 0x358   : > { %v3622_v34 = vadd.f32 %v6416_v49, %v3586_v53  ;;  %4352 = vmatmul.msk.f32.gmra.mxu1 %vm589_vm14, %v3047_v20  ;;  %v6531_v7 = vpop.f32.mrf.mxu3 }
 0x35a   : > { %v3654_v59 = vmax.f32 %v3622_v34, 0.0  ;;  %4386 = vmatmul.msk.f32.gmra.mxu2 %vm589_vm14, %v3357_v32  ;;  %v3327_v34 = vld [vmem:[#allocation2 + $0x101] sm:$0xff]  ;;  %v2939_v20 = vpop.f32.mrf.mxu0 }
 0x35c   : > { %4402 = vmatmul.msk.f32.gmra.mxu3 %vm589_vm14, %v3654_v59  ;;  %v3359_v59 = vsel %vm7207_vm8, %v3327_v34, 0.0 }
 0x35d   : > { %v3509_v19 = vpop.f32.mrf.mxu2  ;;  %v3202_v24 = vpop.f32.mrf.mxu1 }
 0x35e   : > { %v3587_v27 = vadd.f32 %v3509_v19, %v3277_v56  ;;  %v3278_v14 = vadd.f32 %v3202_v24, %v3000_v36  ;;  %v3001_v56 = vadd.f32 %v6474_v62, %v2691_v63  ;;  %v3002_v62 = vadd.f32 %v6487_v12, %v2692_v21 }
 0x360   : > { %v3623_v46 = vadd.f32 %v6416_v49, %v3587_v27  ;;  %4353 = vmatmul.msk.f32.gmra.mxu1 %vm589_vm14, %v3048_v9  ;;  %v6542_v31 = vpop.f32.mrf.mxu3 }
 0x362   : > { %v3655_v53 = vmax.f32 %v3623_v46, 0.0  ;;  %4387 = vmatmul.msk.f32.gmra.mxu2 %vm589_vm14, %v3358_v5  ;;  %v2942_v9 = vpop.f32.mrf.mxu0  ;;  %v7208_v5 = vld [vmem:[#allocation96_spill] sm:$0xff] }
 0x364   : > { %4403 = vmatmul.msk.f32.gmra.mxu3 %vm589_vm14, %v3655_v53 }
 0x365   : > { %v3512_v55 = vpop.f32.mrf.mxu2  ;;  %v3205_v35 = vpop.f32.mrf.mxu1 }
 0x366   : > { %v3588_v16 = vadd.f32 %v3512_v55, %v3278_v14  ;;  %v3279_v27 = vadd.f32 %v3205_v35, %v3001_v56  ;;  %v7209_v35 = vld [vmem:[#allocation92_spill] sm:$0xff] }
 0x368   : > { %v3624_v32 = vadd.f32 %v6416_v49, %v3588_v16  ;;  %4354 = vmatmul.msk.f32.gmra.mxu1 %vm589_vm14, %v3049_v52  ;;  %v6556_v16 = vpop.f32.mrf.mxu3  ;;  %v3330_v52 = vld [vmem:[#allocation2 + $0x119] sm:$0xff] }
 0x36a   : > { %v3656_v19 = vmax.f32 %v3624_v32, 0.0  ;;  %4388 = vmatmul.msk.f32.gmra.mxu2 %vm589_vm14, %v3359_v59  ;;  %v2945_v34 = vpop.f32.mrf.mxu0  ;;  %v2694_v59 = vadd.f32 %v6369_v0, %v6208_v50  ;;  %v3331_v50 = vld [vmem:[#allocation2 + $0x121] sm:$0xff] }
 0x36c   : > { %4404 = vmatmul.msk.f32.gmra.mxu3 %vm589_vm14, %v3656_v19  ;;  %v3004_v56 = vadd.f32 %v6520_v26, %v2694_v59  ;;  %v3363_v26 = vsel %vm1535_vm7, %v3331_v50, 0.0  ;;  %vm7210_vm7 = vcmask 130048  }
 0x36d   : > { %v3515_v24 = vpop.f32.mrf.mxu2  ;;  %v3208_v57 = vpop.f32.mrf.mxu1 }
 0x36e   : > { %v3589_v10 = vadd.f32 %v3515_v24, %v3279_v27  ;;  %v3280_v36 = vadd.f32 %v3208_v57, %v3002_v62 }
 0x370   : > { %v3625_v46 = vadd.f32 %v6416_v49, %v3589_v10  ;;  %4355 = vmatmul.msk.f32.gmra.mxu1 %vm589_vm14, %v6199_v39  ;;  %v3003_v39 = vadd.f32 %v6506_v54, %v2693_v22  ;;  %v3362_v54 = vsel %vm1534_vm2, %v3330_v52, 0.0  ;;  %v6572_v27 = vpop.f32.mrf.mxu3  ;;  %v2697_v52 = vadd.f32 %v6402_v47, %v6254_v43  ;;  %vm7211_vm2 = vmmov %vm7210_vm7 }
 0x371   : > { %v2698_v43 = vadd.f32 %v6418_v38, %v6263_v40  ;;  %vm7212_vm9 = vmmov %vm7211_vm2 }
 0x372   : > { %v3657_v13 = vmax.f32 %v3625_v46, 0.0  ;;  %4389 = vmatmul.msk.f32.gmra.mxu2 %vm589_vm14, %v7208_v5  ;;  %v2948_v10 = vpop.f32.mrf.mxu0  ;;  %v3053_v46 = vld [vmem:[#allocation2 + $0x120] sm:$0xff]  ;;  %v3007_v28 = vadd.f32 %v2945_v34, %v2697_v52  ;;  %v4490_v52 = vld [vmem:[%s4631_s28 + $0x10] sm:$0xff]  ;;  %vm7213_vm4 = vmmov %vm7211_vm2 }
 0x373   : > { %vm7214_vm10 = vmmov %vm7211_vm2 }
 0x374   : > { %4405 = vmatmul.msk.f32.gmra.mxu3 %vm589_vm14, %v3657_v13  ;;  %v3005_v13 = vadd.f32 %v2939_v20, %v2695_v29  ;;  %vm7215_vm6 = vmmov %vm7211_vm2 }
 0x375   : > { %v3518_v53 = vpop.f32.mrf.mxu2  ;;  %v3211_v55 = vpop.f32.mrf.mxu1  ;;  %vm7216_vm13 = vmmov %vm7211_vm2 }
 0x376   : > { %v3590_v14 = vadd.f32 %v3518_v53, %v3280_v36  ;;  %v3281_v63 = vadd.f32 %v3211_v55, %v3003_v39  ;;  %vm7217_vm5 = vmmov %vm7211_vm2 }
 0x377   : > { %vm7218_vm15 = vmmov %vm7211_vm2 }
 0x378   : > { %v3626_v4 = vadd.f32 %v6416_v49, %v3590_v14  ;;  %4356 = vmatmul.msk.f32.gmra.mxu1 %vm589_vm14, %v6219_v61  ;;  %v6583_v53 = vpop.f32.mrf.mxu3  ;;  %vm7220_vm0 = vmmov %vm7211_vm2 }
 0x379   : > { %vm7222_vm11 = vmmov %vm7220_vm0 }
 0x37a   : > { %v3658_v12 = vmax.f32 %v3626_v4, 0.0  ;;  %4390 = vmatmul.msk.f32.gmra.mxu2 %vm589_vm14, %v7209_v35  ;;  %v2951_v45 = vpop.f32.mrf.mxu0  ;;  %v3006_v4 = vadd.f32 %v2942_v9, %v2696_v60  ;;  %vm7224_vm12 = vmmov %vm7220_vm0 }
 0x37b   : > { %vm7226_vm3 = vmmov %vm7220_vm0 }
 0x37c   : > { %4406 = vmatmul.msk.f32.gmra.mxu3 %vm589_vm14, %v3658_v12  ;;  %vm7228_vm1 = vmmov %vm7220_vm0 }
 0x37d   : > { %v3521_v32 = vpop.f32.mrf.mxu2  ;;  %v3214_v2 = vpop.f32.mrf.mxu1  ;;  %vm7229_vm8 = vmmov %vm7220_vm0 }
 0x37e   : > { %v3591_v1 = vadd.f32 %v3521_v32, %v3281_v63  ;;  %v3282_v24 = vadd.f32 %v3214_v2, %v3004_v56 }
 0x380   : > { %v3627_v61 = vadd.f32 %v6416_v49, %v3591_v1  ;;  %4357 = vmatmul.msk.f32.gmra.mxu1 %vm589_vm14, %v3052_v44  ;;  %v6589_v32 = vpop.f32.mrf.mxu3  ;;  %v6598_v44 = vld [vmem:[%s6802_s6] ss:$0 sm:$0xff] }
 0x382   : > { %v3659_v19 = vmax.f32 %v3627_v61, 0.0  ;;  %4391 = vmatmul.msk.f32.gmra.mxu2 %vm589_vm14, %v3362_v54  ;;  %v2954_v2 = vpop.f32.mrf.mxu0 }
 0x384   : > { %4407 = vmatmul.msk.f32.gmra.mxu3 %vm589_vm14, %v3659_v19  ;;  %v3008_v19 = vadd.f32 %v2948_v10, %v2698_v43 }
 0x385   : > { %v3524_v57 = vpop.f32.mrf.mxu2  ;;  %v3217_v21 = vpop.f32.mrf.mxu1 }
 0x386   : > { %v3592_v0 = vadd.f32 %v3524_v57, %v3282_v24  ;;  %v3283_v36 = vadd.f32 %v3217_v21, %v3005_v13  ;;  %v4488_v57 = vld [vmem:[%s4631_s28] sm:$0xff] }
 0x388   : > { %v3628_v62 = vadd.f32 %v6416_v49, %v3592_v0  ;;  %4358 = vmatmul.msk.f32.gmra.mxu1 %vm589_vm14, %v3053_v46 }
 0x38a   : > { %v3660_v5 = vmax.f32 %v3628_v62, 0.0  ;;  %4392 = vmatmul.msk.f32.gmra.mxu2 %vm589_vm14, %v3363_v26  ;;  %v2957_v0 = vpop.f32.mrf.mxu0  ;;  %v2699_v62 = vadd.f32 %v6428_v25, %v6274_v8 }
 0x38c   : > { %4408 = vmatmul.msk.f32.gmra.mxu3 %vm589_vm14, %v3660_v5  ;;  %v3009_v5 = vadd.f32 %v2951_v45, %v2699_v62  ;;  %v4492_v62 = vld [vmem:[%s4631_s28 + $0x20] sm:$0xff] }
 0x38d   : > { %v3527_v14 = vpop.f32.mrf.mxu2  ;;  %v3220_v22 = vpop.f32.mrf.mxu1 }
 0x38e   : > { %v3593_v55 = vadd.f32 %v3527_v14, %v3283_v36  ;;  %v3284_v20 = vadd.f32 %v3220_v22, %v3006_v4  ;;  %v4489_v14 = vld [vmem:[%s4631_s28 + $0x8] sm:$0xff] }
 0x390   : > { %v3629_v3 = vadd.f32 %v6416_v49, %v3593_v55 }
 0x392   : > { %v3661_v39 = vmax.f32 %v3629_v3, 0.0  ;;  %v2960_v3 = vpop.f32.mrf.mxu0 }
 0x394   : > { %4409 = vmatmul.msk.f32.gmra.mxu3 %vm589_vm14, %v3661_v39 }
 0x395   : > { %v3530_v12 = vpop.f32.mrf.mxu2  ;;  %v3223_v63 = vpop.f32.mrf.mxu1 }
 0x396   : > { %v3594_v35 = vadd.f32 %v3530_v12, %v3284_v20  ;;  %v3285_v9 = vadd.f32 %v3223_v63, %v3007_v28  ;;  %v2700_v20 = vadd.f32 %v6441_v11, %v6289_v30 }
 0x398   : > { %v3630_v1 = vadd.f32 %v6416_v49, %v3594_v35  ;;  %v3010_v35 = vadd.f32 %v2954_v2, %v2700_v20 }
 0x39a   : > { %v3662_v15 = vmax.f32 %v3630_v1, 0.0  ;;  %v2963_v30 = vpop.f32.mrf.mxu0 }
 0x39c   : > { %4410 = vmatmul.msk.f32.gmra.mxu3 %vm589_vm14, %v3662_v15 }
 0x39d   : > { %v3533_v59 = vpop.f32.mrf.mxu2  ;;  %v3226_v54 = vpop.f32.mrf.mxu1 }
 0x39e   : > { %v3595_v61 = vadd.f32 %v3533_v59, %v3285_v9  ;;  %v3286_v21 = vadd.f32 %v3226_v54, %v3008_v19  ;;  %v2701_v54 = vadd.f32 %v6459_v58, %v6305_v23  ;;  %v2702_v58 = vadd.f32 %v6472_v37, %v6319_v17 }
 0x39f   : > { %v3799_v56 = vpop.f32.mrf.mxu3 }
 0x3a0   : > { %v3631_v47 = vadd.f32 %v6416_v49, %v3595_v61  ;;  %v3800_v34 = vadd.f32 %v6598_v44, %v3799_v56  ;;  %v3011_v43 = vadd.f32 %v2957_v0, %v2701_v54 }
 0x3a2   : > { %v3663_v24 = vmax.f32 %v3631_v47, 0.0  ;;  %v3895_v50 = vadd.f32 %v4488_v57, %v3800_v34  ;;  %v4491_v34 = vld [vmem:[%s4631_s28 + $0x18] sm:$0xff] }
 0x3a4   : > { %v3927_v46 = vmax.f32 %v3895_v50, 0.0  ;;  %4411 = vmatmul.msk.f32.gmra.mxu3 %vm589_vm14, %v3663_v24 }
 0x3a5   : > { %v3536_v40 = vpop.f32.mrf.mxu2  ;;  %v3229_v10 = vpop.f32.mrf.mxu1 }
 0x3a6   : > { %3959 = vst.msk [vmem:[%s6610_s18] sm:$0xff] %vm7210_vm7, %v3927_v46  ;;  %v3596_v38 = vadd.f32 %v3536_v40, %v3286_v21  ;;  %v3287_v22 = vadd.f32 %v3229_v10, %v3009_v5  ;;  %v3012_v10 = vadd.f32 %v2960_v3, %v2702_v58  ;;  %vm7230_vm7 = vmmov %vm7220_vm0 }
 0x3a7   : > { %v3802_v29 = vpop.f32.mrf.mxu3 }
 0x3a8   : > { %v3632_v26 = vadd.f32 %v6416_v49, %v3596_v38  ;;  %v3803_v13 = vadd.f32 %v6598_v44, %v3802_v29  ;;  %v2966_v38 = vpop.f32.mrf.mxu0 }
 0x3aa   : > { %v3664_v36 = vmax.f32 %v3632_v26, 0.0  ;;  %v3896_v55 = vadd.f32 %v4489_v14, %v3803_v13 }
 0x3ac   : > { %v3928_v60 = vmax.f32 %v3896_v55, 0.0  ;;  %4412 = vmatmul.msk.f32.gmra.mxu3 %vm589_vm14, %v3664_v36  ;;  %v2703_v55 = vadd.f32 %v6484_v48, %v6331_v51 }
 0x3ad   : > { %v3539_v4 = vpop.f32.mrf.mxu2  ;;  %v3232_v8 = vpop.f32.mrf.mxu1 }
 0x3ae   : > { %3960 = vst.msk [vmem:[%s6610_s18 + $0x8] sm:$0xff] %vm7211_vm2, %v3928_v60  ;;  %v3597_v39 = vadd.f32 %v3539_v4, %v3287_v22  ;;  %v3288_v28 = vadd.f32 %v3232_v8, %v3010_v35  ;;  %v3013_v3 = vadd.f32 %v2963_v30, %v2703_v55  ;;  %vm7232_vm2 = vmmov %vm7220_vm0 }
 0x3af   : > { %v3805_v25 = vpop.f32.mrf.mxu3 }
 0x3b0   : > { %v3633_v45 = vadd.f32 %v6416_v49, %v3597_v39  ;;  %v3806_v12 = vadd.f32 %v6598_v44, %v3805_v25  ;;  %v4493_v39 = vld [vmem:[%s4631_s28 + $0x28] sm:$0xff]  ;;  %v2969_v25 = vpop.f32.mrf.mxu0 }
 0x3b2   : > { %v3665_v63 = vmax.f32 %v3633_v45, 0.0  ;;  %v3897_v1 = vadd.f32 %v4490_v52, %v3806_v12 }
 0x3b4   : > { %v3929_v15 = vmax.f32 %v3897_v1, 0.0  ;;  %4413 = vmatmul.msk.f32.gmra.mxu3 %vm589_vm14, %v3665_v63  ;;  %v2704_v63 = vadd.f32 %v6499_v6, %v6342_v41 }
 0x3b5   : > { %v3542_v9 = vpop.f32.mrf.mxu2  ;;  %v3235_v61 = vpop.f32.mrf.mxu1 }
 0x3b6   : > { %3961 = vst.msk [vmem:[%s6610_s18 + $0x10] sm:$0xff] %vm7212_vm9, %v3929_v15  ;;  %v3598_v59 = vadd.f32 %v3542_v9, %v3288_v28  ;;  %v3289_v24 = vadd.f32 %v3235_v61, %v3011_v43  ;;  %v3014_v28 = vadd.f32 %v2966_v38, %v2704_v63  ;;  %v4494_v9 = vld [vmem:[%s4631_s28 + $0x30] sm:$0xff]  ;;  %vm7233_vm9 = vmmov %vm7220_vm0 }
 0x3b7   : > { %v3808_v11 = vpop.f32.mrf.mxu3 }
 0x3b8   : > { %v3634_v2 = vadd.f32 %v6416_v49, %v3598_v59  ;;  %v3809_v56 = vadd.f32 %v6598_v44, %v3808_v11  ;;  %v2972_v11 = vpop.f32.mrf.mxu0 }
 0x3ba   : > { %v3666_v47 = vmax.f32 %v3634_v2, 0.0  ;;  %v3898_v19 = vadd.f32 %v4491_v34, %v3809_v56  ;;  %v2705_v56 = vadd.f32 %v6517_v42, %v6351_v33 }
 0x3bc   : > { %v3930_v57 = vmax.f32 %v3898_v19, 0.0  ;;  %4414 = vmatmul.msk.f32.gmra.mxu3 %vm589_vm14, %v3666_v47  ;;  %v3015_v34 = vadd.f32 %v2969_v25, %v2705_v56 }
 0x3bd   : > { %v3545_v50 = vpop.f32.mrf.mxu2  ;;  %v3238_v46 = vpop.f32.mrf.mxu1 }
 0x3be   : > { %3962 = vst.msk [vmem:[%s6610_s18 + $0x18] sm:$0xff] %vm7213_vm4, %v3930_v57  ;;  %v3599_v21 = vadd.f32 %v3545_v50, %v3289_v24  ;;  %v3290_v13 = vadd.f32 %v3238_v46, %v3012_v10  ;;  %v4495_v24 = vld [vmem:[%s4631_s28 + $0x38] sm:$0xff]  ;;  %vm7234_vm4 = vmmov %vm7220_vm0 }
 0x3bf   : > { %v3811_v23 = vpop.f32.mrf.mxu3 }
 0x3c0   : > { %v3635_v0 = vadd.f32 %v6416_v49, %v3599_v21  ;;  %v3812_v40 = vadd.f32 %v6598_v44, %v3811_v23  ;;  %v2975_v33 = vpop.f32.mrf.mxu0 }
 0x3c2   : > { %v3667_v29 = vmax.f32 %v3635_v0, 0.0  ;;  %v3899_v26 = vadd.f32 %v4492_v62, %v3812_v40  ;;  %v2706_v0 = vadd.f32 %v6531_v7, %v6361_v18  ;;  %v4496_v62 = vld [vmem:[%s4631_s28 + $0x40] sm:$0xff]  ;;  %v7219_v7 = vld [vmem:[#allocation39_spill] sm:$0xff] }
 0x3c4   : > { %v3931_v5 = vmax.f32 %v3899_v26, 0.0  ;;  %4415 = vmatmul.msk.f32.gmra.mxu3 %vm589_vm14, %v3667_v29  ;;  %v3016_v10 = vadd.f32 %v2972_v11, %v2706_v0 }
 0x3c5   : > { %v3548_v36 = vpop.f32.mrf.mxu2  ;;  %v3241_v17 = vpop.f32.mrf.mxu1 }
 0x3c6   : > { %3963 = vst.msk [vmem:[%s6610_s18 + $0x20] sm:$0xff] %vm7214_vm10, %v3931_v5  ;;  %v3600_v14 = vadd.f32 %v3548_v36, %v3290_v13  ;;  %v3291_v20 = vadd.f32 %v3241_v17, %v3013_v3  ;;  %vm7235_vm10 = vmmov %vm7220_vm0 }
 0x3c7   : > { %v3814_v37 = vpop.f32.mrf.mxu3 }
 0x3c8   : > { %v3636_v22 = vadd.f32 %v6416_v49, %v3600_v14  ;;  %v3815_v60 = vadd.f32 %v6598_v44, %v3814_v37  ;;  %v2707_v37 = vadd.f32 %v6542_v31, %v7219_v7 }
 0x3ca   : > { %v3668_v4 = vmax.f32 %v3636_v22, 0.0  ;;  %v3900_v8 = vadd.f32 %v4493_v39, %v3815_v60  ;;  %v2978_v60 = vpop.f32.mrf.mxu0  ;;  %v3017_v3 = vadd.f32 %v2975_v33, %v2707_v37  ;;  %v4497_v39 = vld [vmem:[%s4631_s28 + $0x48] sm:$0xff] }
 0x3cb   : > { %v7225_v33 = vld [vmem:[#allocation50_spill] sm:$0xff] }
 0x3cc   : > { %v3932_v45 = vmax.f32 %v3900_v8, 0.0  ;;  %4416 = vmatmul.msk.f32.gmra.mxu3 %vm589_vm14, %v3668_v4 }
 0x3cd   : > { %v3551_v12 = vpop.f32.mrf.mxu2  ;;  %v3244_v51 = vpop.f32.mrf.mxu1 }
 0x3ce   : > { %3964 = vst.msk [vmem:[%s6610_s18 + $0x28] sm:$0xff] %vm7215_vm6, %v3932_v45  ;;  %v3601_v35 = vadd.f32 %v3551_v12, %v3291_v20  ;;  %v3292_v61 = vadd.f32 %v3244_v51, %v3014_v28  ;;  %v7221_v51 = vld [vmem:[#allocation54_spill] sm:$0xff]  ;;  %vm7236_vm6 = vmmov %vm7220_vm0 }
 0x3cf   : > { %v3817_v48 = vpop.f32.mrf.mxu3 }
 0x3d0   : > { %v3637_v52 = vadd.f32 %v6416_v49, %v3601_v35  ;;  %v3818_v1 = vadd.f32 %v6598_v44, %v3817_v48  ;;  %v2708_v48 = vadd.f32 %v6556_v16, %v7221_v51 }
 0x3d2   : > { %v3669_v15 = vmax.f32 %v3637_v52, 0.0  ;;  %v3901_v59 = vadd.f32 %v4494_v9, %v3818_v1  ;;  %v3018_v1 = vadd.f32 %v2978_v60, %v2708_v48 }
 0x3d4   : > { %v3933_v30 = vmax.f32 %v3901_v59, 0.0  ;;  %4417 = vmatmul.msk.f32.gmra.mxu3 %vm589_vm14, %v3669_v15  ;;  %v4498_v15 = vld [vmem:[%s4631_s28 + $0x50] sm:$0xff]  ;;  %v2981_v59 = vpop.f32.mrf.mxu0 }
 0x3d5   : > { %v3554_v54 = vpop.f32.mrf.mxu2  ;;  %v3247_v41 = vpop.f32.mrf.mxu1 }
 0x3d6   : > { %3965 = vst.msk [vmem:[%s6610_s18 + $0x30] sm:$0xff] %vm7216_vm13, %v3933_v30  ;;  %v3602_v2 = vadd.f32 %v3554_v54, %v3292_v61  ;;  %v3293_v50 = vadd.f32 %v3247_v41, %v3015_v34  ;;  %v7223_v41 = vld [vmem:[#allocation55_spill] sm:$0xff]  ;;  %vm7237_vm13 = vmmov %vm7220_vm0 }
 0x3d7   : > { %v3820_v6 = vpop.f32.mrf.mxu3 }
 0x3d8   : > { %v3638_v43 = vadd.f32 %v6416_v49, %v3602_v2  ;;  %v3821_v47 = vadd.f32 %v6598_v44, %v3820_v6  ;;  %v2709_v6 = vadd.f32 %v6572_v27, %v7223_v41 }
 0x3da   : > { %v3670_v19 = vmax.f32 %v3638_v43, 0.0  ;;  %v3902_v57 = vadd.f32 %v4495_v24, %v3821_v47  ;;  %v3019_v47 = vadd.f32 %v2981_v59, %v2709_v6  ;;  %v4504_v59 = vld [vmem:[%s4631_s28 + $0x80] sm:$0xff] }
 0x3dc   : > { %v3934_v21 = vmax.f32 %v3902_v57, 0.0  ;;  %4418 = vmatmul.msk.f32.gmra.mxu3 %vm589_vm14, %v3670_v19  ;;  %v4499_v19 = vld [vmem:[%s4631_s28 + $0x58] sm:$0xff] }
 0x3dd   : > { %v3557_v46 = vpop.f32.mrf.mxu2  ;;  %v3250_v58 = vpop.f32.mrf.mxu1 }
 0x3de   : > { %3966 = vst.msk [vmem:[%s6610_s18 + $0x38] sm:$0xff] %vm7217_vm5, %v3934_v21  ;;  %v3603_v23 = vadd.f32 %v3557_v46, %v3293_v50  ;;  %v3294_v13 = vadd.f32 %v3250_v58, %v3016_v10  ;;  %v2984_v21 = vpop.f32.mrf.mxu0  ;;  %vm7238_vm5 = vmmov %vm7220_vm0 }
 0x3df   : > { %v3823_v42 = vpop.f32.mrf.mxu3 }
 0x3e0   : > { %v3639_v40 = vadd.f32 %v6416_v49, %v3603_v23  ;;  %v3824_v38 = vadd.f32 %v6598_v44, %v3823_v42  ;;  %v2710_v42 = vadd.f32 %v6583_v53, %v7225_v33 }
 0x3e2   : > { %v3671_v29 = vmax.f32 %v3639_v40, 0.0  ;;  %v3903_v26 = vadd.f32 %v4496_v62, %v3824_v38  ;;  %v3020_v38 = vadd.f32 %v2984_v21, %v2710_v42 }
 0x3e4   : > { %v3935_v5 = vmax.f32 %v3903_v26, 0.0  ;;  %4419 = vmatmul.msk.f32.gmra.mxu3 %vm589_vm14, %v3671_v29  ;;  %v4500_v29 = vld [vmem:[%s4631_s28 + $0x60] sm:$0xff] }
 0x3e5   : > { %v3560_v36 = vpop.f32.mrf.mxu2  ;;  %v3253_v17 = vpop.f32.mrf.mxu1 }
 0x3e6   : > { %3967 = vst.msk [vmem:[%s6610_s18 + $0x40] sm:$0xff] %vm7218_vm15, %v3935_v5  ;;  %v3604_v14 = vadd.f32 %v3560_v36, %v3294_v13  ;;  %v3295_v25 = vadd.f32 %v3253_v17, %v3017_v3  ;;  %v7227_v17 = vld [vmem:[#allocation58_spill] sm:$0xff]  ;;  %vm7239_vm15 = vmmov %vm7220_vm0 }
 0x3e7   : > { %v3826_v18 = vpop.f32.mrf.mxu3  ;;  %v4501_v3 = vld [vmem:[%s4631_s28 + $0x68] sm:$0xff] }
 0x3e8   : > { %v3640_v55 = vadd.f32 %v6416_v49, %v3604_v14  ;;  %v3827_v22 = vadd.f32 %v6598_v44, %v3826_v18  ;;  %v2987_v14 = vpop.f32.mrf.mxu0  ;;  %v2711_v18 = vadd.f32 %v6589_v32, %v7227_v17 }
 0x3ea   : > { %v3672_v4 = vmax.f32 %v3640_v55, 0.0  ;;  %v3904_v8 = vadd.f32 %v4497_v39, %v3827_v22  ;;  %v3021_v22 = vadd.f32 %v2987_v14, %v2711_v18 }
 0x3ec   : > { %v3936_v20 = vmax.f32 %v3904_v8, 0.0  ;;  %4420 = vmatmul.msk.f32.gmra.mxu3 %vm589_vm14, %v3672_v4 }
 0x3ed   : > { %v3563_v45 = vpop.f32.mrf.mxu2  ;;  %v3256_v31 = vpop.f32.mrf.mxu1 }
 0x3ee   : > { %3968 = vst.msk [vmem:[%s6610_s18 + $0x48] sm:$0xff] %vm7220_vm0, %v3936_v20  ;;  %v3605_v12 = vadd.f32 %v3563_v45, %v3295_v25  ;;  %v3296_v61 = vadd.f32 %v3256_v31, %v3018_v1  ;;  %v4503_v1 = vld [vmem:[%s4631_s28 + $0x78] sm:$0xff] }
 0x3ef   : > { %v3829_v35 = vpop.f32.mrf.mxu3 }
 0x3f0   : > { %v3641_v63 = vadd.f32 %v6416_v49, %v3605_v12  ;;  %v3830_v52 = vadd.f32 %v6598_v44, %v3829_v35  ;;  %v4502_v35 = vld [vmem:[%s4631_s28 + $0x70] sm:$0xff] }
 0x3f2   : > { %v3673_v28 = vmax.f32 %v3641_v63, 0.0  ;;  %v3905_v9 = vadd.f32 %v4498_v15, %v3830_v52 }
 0x3f4   : > { %v3937_v30 = vmax.f32 %v3905_v9, 0.0  ;;  %4421 = vmatmul.msk.f32.gmra.mxu3 %vm589_vm14, %v3673_v28 }
 0x3f5   : > { %v3566_v11 = vpop.f32.mrf.mxu2  ;;  %v3259_v16 = vpop.f32.mrf.mxu1 }
 0x3f6   : > { %3969 = vst.msk [vmem:[%s6610_s18 + $0x50] sm:$0xff] %vm7222_vm11, %v3937_v30  ;;  %v3606_v54 = vadd.f32 %v3566_v11, %v3296_v61  ;;  %v3297_v57 = vadd.f32 %v3259_v16, %v3019_v47  ;;  %v4505_v16 = vld [vmem:[%s4631_s28 + $0x88] sm:$0xff]  ;;  %vm7240_vm11 = vmmov %vm7220_vm0 }
 0x3f7   : > { %v3832_v2 = vpop.f32.mrf.mxu3 }
 0x3f8   : > { %v3642_v56 = vadd.f32 %v6416_v49, %v3606_v54  ;;  %v3833_v43 = vadd.f32 %v6598_v44, %v3832_v2 }
 0x3fa   : > { %v3674_v34 = vmax.f32 %v3642_v56, 0.0  ;;  %v3906_v24 = vadd.f32 %v4499_v19, %v3833_v43  ;;  %v4506_v43 = vld [vmem:[%s4631_s28 + $0x90] sm:$0xff] }
 0x3fc   : > { %v3938_v50 = vmax.f32 %v3906_v24, 0.0  ;;  %4422 = vmatmul.msk.f32.gmra.mxu3 %vm589_vm14, %v3674_v34 }
 0x3fd   : > { %v3569_v46 = vpop.f32.mrf.mxu2  ;;  %v3262_v27 = vpop.f32.mrf.mxu1 }
 0x3fe   : > { %3970 = vst.msk [vmem:[%s6610_s18 + $0x58] sm:$0xff] %vm7224_vm12, %v3938_v50  ;;  %v3607_v23 = vadd.f32 %v3569_v46, %v3297_v57  ;;  %v3298_v26 = vadd.f32 %v3262_v27, %v3020_v38  ;;  %v4507_v57 = vld [vmem:[%s4631_s28 + $0x98] sm:$0xff]  ;;  %v4508_v27 = vld [vmem:[%s4631_s28 + $0xa0] sm:$0xff]  ;;  %vm7241_vm12 = vmmov %vm7220_vm0 }
 0x3ff   : > { %v3835_v58 = vpop.f32.mrf.mxu3 }
 0x400   : > { %v3643_v0 = vadd.f32 %v6416_v49, %v3607_v23  ;;  %v3836_v40 = vadd.f32 %v6598_v44, %v3835_v58 }
 0x402   : > { %v3675_v10 = vmax.f32 %v3643_v0, 0.0  ;;  %v3907_v62 = vadd.f32 %v4500_v29, %v3836_v40  ;;  %v4509_v40 = vld [vmem:[%s4631_s28 + $0xa8] sm:$0xff] }
 0x404   : > { %v3939_v13 = vmax.f32 %v3907_v62, 0.0  ;;  %4423 = vmatmul.msk.f32.gmra.mxu3 %vm589_vm14, %v3675_v10 }
 0x405   : > { %v3572_v5 = vpop.f32.mrf.mxu2  ;;  %v3265_v55 = vpop.f32.mrf.mxu1 }
 0x406   : > { %3971 = vst.msk [vmem:[%s6610_s18 + $0x60] sm:$0xff] %vm7226_vm3, %v3939_v13  ;;  %v3608_v36 = vadd.f32 %v3572_v5, %v3298_v26  ;;  %v3299_v39 = vadd.f32 %v3265_v55, %v3021_v22  ;;  %v4510_v26 = vld [vmem:[%s4631_s28 + $0xb0] sm:$0xff]  ;;  %v4512_v55 = vld [vmem:[%s4631_s28 + $0xc0] sm:$0xff]  ;;  %vm7242_vm3 = vmmov %vm7220_vm0 }
 0x407   : > { %v3838_v53 = vpop.f32.mrf.mxu3 }
 0x408   : > { %v3644_v7 = vadd.f32 %v6416_v49, %v3608_v36  ;;  %v3839_v37 = vadd.f32 %v6598_v44, %v3838_v53  ;;  %v4511_v53 = vld [vmem:[%s4631_s28 + $0xb8] sm:$0xff] }
 0x40a   : > { %v3676_v60 = vmax.f32 %v3644_v7, 0.0  ;;  %v3908_v4 = vadd.f32 %v4501_v3, %v3839_v37 }
 0x40c   : > { %v3940_v8 = vmax.f32 %v3908_v4, 0.0  ;;  %4424 = vmatmul.msk.f32.gmra.mxu3 %vm589_vm14, %v3676_v60 }
 0x40d   : > { %v3575_v25 = vpop.f32.mrf.mxu2 }
 0x40e   : > { %3972 = vst.msk [vmem:[%s6610_s18 + $0x68] sm:$0xff] %vm7228_vm1, %v3940_v8  ;;  %v3609_v32 = vadd.f32 %v3575_v25, %v3299_v39  ;;  %v4513_v39 = vld [vmem:[%s4631_s28 + $0xc8] sm:$0xff]  ;;  %vm7243_vm1 = vmmov %vm7220_vm0 }
 0x40f   : > { %v3841_v20 = vpop.f32.mrf.mxu3 }
 0x410   : > { %v3645_v45 = vadd.f32 %v6416_v49, %v3609_v32  ;;  %v3842_v12 = vadd.f32 %v6598_v44, %v3841_v20 }
 0x412   : > { %v3677_v31 = vmax.f32 %v3645_v45, 0.0  ;;  %v3909_v51 = vadd.f32 %v4502_v35, %v3842_v12  ;;  %v4514_v45 = vld [vmem:[%s4631_s28 + $0xd0] sm:$0xff] }
 0x414   : > { %v3941_v48 = vmax.f32 %v3909_v51, 0.0  ;;  %4425 = vmatmul.msk.f32.gmra.mxu3 %vm589_vm14, %v3677_v31  ;;  %vm7231_vm14 = vmmov %vm7220_vm0 }
 0x416   : > { %3973 = vst.msk [vmem:[%s6610_s18 + $0x70] sm:$0xff] %vm7229_vm8, %v3941_v48  ;;  %v4515_v48 = vld [vmem:[%s4631_s28 + $0xd8] sm:$0xff]  ;;  %vm7244_vm8 = vmmov %vm7220_vm0 }
 0x417   : > { %v3844_v63 = vpop.f32.mrf.mxu3 }
 0x418   : > { %v3845_v52 = vadd.f32 %v6598_v44, %v3844_v63 }
 0x41a   : > { %v3910_v28 = vadd.f32 %v4503_v1, %v3845_v52 }
 0x41c   : > { %v3942_v49 = vmax.f32 %v3910_v28, 0.0 }
 0x41e   : > { %3974 = vst.msk [vmem:[%s6610_s18 + $0x78] sm:$0xff] %vm7230_vm7, %v3942_v49  ;;  %v4516_v49 = vld [vmem:[%s4631_s28 + $0xe0] sm:$0xff]  ;;  %vm7245_vm7 = vmmov %vm7220_vm0 }
 0x41f   : > { %v3847_v15 = vpop.f32.mrf.mxu3 }
 0x420   : > { %v3848_v9 = vadd.f32 %v6598_v44, %v3847_v15 }
 0x422   : > { %v3911_v61 = vadd.f32 %v4504_v59, %v3848_v9 }
 0x424   : > { %v3943_v30 = vmax.f32 %v3911_v61, 0.0 }
 0x426   : > { %3975 = vst.msk [vmem:[%s6610_s18 + $0x80] sm:$0xff] %vm7231_vm14, %v3943_v30  ;;  %v4517_v30 = vld [vmem:[%s4631_s28 + $0xe8] sm:$0xff] }
 0x427   : > { %v3850_v11 = vpop.f32.mrf.mxu3 }
 0x428   : > { %v3851_v54 = vadd.f32 %v6598_v44, %v3850_v11 }
 0x42a   : > { %v3912_v2 = vadd.f32 %v4505_v16, %v3851_v54 }
 0x42c   : > { %v3944_v41 = vmax.f32 %v3912_v2, 0.0 }
 0x42e   : > { %3976 = vst.msk [vmem:[%s6610_s18 + $0x88] sm:$0xff] %vm7232_vm2, %v3944_v41  ;;  %v4518_v41 = vld [vmem:[%s4631_s28 + $0xf0] sm:$0xff] }
 0x42f   : > { %v3853_v6 = vpop.f32.mrf.mxu3 }
 0x430   : > { %v3854_v56 = vadd.f32 %v6598_v44, %v3853_v6 }
 0x432   : > { %v3913_v47 = vadd.f32 %v4506_v43, %v3854_v56 }
 0x434   : > { %v3945_v34 = vmax.f32 %v3913_v47, 0.0 }
 0x436   : > { %3977 = vst.msk [vmem:[%s6610_s18 + $0x90] sm:$0xff] %vm7233_vm9, %v3945_v34  ;;  %v4519_v34 = vld [vmem:[%s4631_s28 + $0xf8] sm:$0xff] }
 0x437   : > { %v3856_v19 = vpop.f32.mrf.mxu3 }
 0x438   : > { %v3857_v24 = vadd.f32 %v6598_v44, %v3856_v19 }
 0x43a   : > { %v3914_v50 = vadd.f32 %v4507_v57, %v3857_v24 }
 0x43c   : > { %v3946_v21 = vmax.f32 %v3914_v50, 0.0 }
 0x43e   : > { %3978 = vst.msk [vmem:[%s6610_s18 + $0x98] sm:$0xff] %vm7234_vm4, %v3946_v21 }
 0x43f   : > { %v3859_v46 = vpop.f32.mrf.mxu3 }
 0x440   : > { %v3860_v23 = vadd.f32 %v6598_v44, %v3859_v46 }
 0x442   : > { %v3915_v58 = vadd.f32 %v4508_v27, %v3860_v23 }
 0x444   : > { %v3947_v33 = vmax.f32 %v3915_v58, 0.0 }
 0x446   : > { %3979 = vst.msk [vmem:[%s6610_s18 + $0xa0] sm:$0xff] %vm7235_vm10, %v3947_v33 }
 0x447   : > { %v3862_v42 = vpop.f32.mrf.mxu3 }
 0x448   : > { %v3863_v0 = vadd.f32 %v6598_v44, %v3862_v42 }
 0x44a   : > { %v3916_v38 = vadd.f32 %v4509_v40, %v3863_v0 }
 0x44c   : > { %v3948_v10 = vmax.f32 %v3916_v38, 0.0 }
 0x44e   : > { %3980 = vst.msk [vmem:[%s6610_s18 + $0xa8] sm:$0xff] %vm7236_vm6, %v3948_v10 }
 0x44f   : > { %v3865_v29 = vpop.f32.mrf.mxu3 }
 0x450   : > { %v3866_v62 = vadd.f32 %v6598_v44, %v3865_v29 }
 0x452   : > { %v3917_v13 = vadd.f32 %v4510_v26, %v3866_v62 }
 0x454   : > { %v3949_v5 = vmax.f32 %v3917_v13, 0.0 }
 0x456   : > { %3981 = vst.msk [vmem:[%s6610_s18 + $0xb0] sm:$0xff] %vm7237_vm13, %v3949_v5 }
 0x457   : > { %v3868_v36 = vpop.f32.mrf.mxu3 }
 0x458   : > { %v3869_v14 = vadd.f32 %v6598_v44, %v3868_v36 }
 0x45a   : > { %v3918_v17 = vadd.f32 %v4511_v53, %v3869_v14 }
 0x45c   : > { %v3950_v18 = vmax.f32 %v3918_v17, 0.0 }
 0x45e   : > { %3982 = vst.msk [vmem:[%s6610_s18 + $0xb8] sm:$0xff] %vm7238_vm5, %v3950_v18 }
 0x45f   : > { %v3871_v7 = vpop.f32.mrf.mxu3 }
 0x460   : > { %v3872_v37 = vadd.f32 %v6598_v44, %v3871_v7 }
 0x462   : > { %v3919_v22 = vadd.f32 %v4512_v55, %v3872_v37 }
 0x464   : > { %v3951_v60 = vmax.f32 %v3919_v22, 0.0 }
 0x466   : > { %3983 = vst.msk [vmem:[%s6610_s18 + $0xc0] sm:$0xff] %vm7239_vm15, %v3951_v60 }
 0x467   : > { %v3874_v3 = vpop.f32.mrf.mxu3 }
 0x468   : > { %v3875_v4 = vadd.f32 %v6598_v44, %v3874_v3 }
 0x46a   : > { %v3920_v8 = vadd.f32 %v4513_v39, %v3875_v4 }
 0x46c   : > { %v3952_v25 = vmax.f32 %v3920_v8, 0.0 }
 0x46e   : > { %3984 = vst.msk [vmem:[%s6610_s18 + $0xc8] sm:$0xff] %vm7220_vm0, %v3952_v25 }
 0x46f   : > { %v3877_v32 = vpop.f32.mrf.mxu3 }
 0x470   : > { %v3878_v20 = vadd.f32 %v6598_v44, %v3877_v32 }
 0x472   : > { %v3921_v12 = vadd.f32 %v4514_v45, %v3878_v20 }
 0x474   : > { %v3953_v31 = vmax.f32 %v3921_v12, 0.0 }
 0x476   : > { %3985 = vst.msk [vmem:[%s6610_s18 + $0xd0] sm:$0xff] %vm7240_vm11, %v3953_v31 }
 0x477   : > { %v3880_v35 = vpop.f32.mrf.mxu3 }
 0x478   : > { %v3881_v51 = vadd.f32 %v6598_v44, %v3880_v35 }
 0x47a   : > { %v3922_v63 = vadd.f32 %v4515_v48, %v3881_v51 }
 0x47c   : > { %v3954_v52 = vmax.f32 %v3922_v63, 0.0 }
 0x47e   : > { %3986 = vst.msk [vmem:[%s6610_s18 + $0xd8] sm:$0xff] %vm7241_vm12, %v3954_v52 }
 0x47f   : > { %v3883_v1 = vpop.f32.mrf.mxu3 }
 0x480   : > { %v3884_v28 = vadd.f32 %v6598_v44, %v3883_v1 }
 0x482   : > { %v3923_v15 = vadd.f32 %v4516_v49, %v3884_v28 }
 0x484   : > { %v3955_v9 = vmax.f32 %v3923_v15, 0.0 }
 0x486   : > { %3987 = vst.msk [vmem:[%s6610_s18 + $0xe0] sm:$0xff] %vm7242_vm3, %v3955_v9 }
 0x487   : > { %v3886_v59 = vpop.f32.mrf.mxu3 }
 0x488   : > { %v3887_v61 = vadd.f32 %v6598_v44, %v3886_v59 }
 0x48a   : > { %v3924_v11 = vadd.f32 %v4517_v30, %v3887_v61 }
 0x48c   : > { %v3956_v54 = vmax.f32 %v3924_v11, 0.0 }
 0x48e   : > { %3988 = vst.msk [vmem:[%s6610_s18 + $0xe8] sm:$0xff] %vm7243_vm1, %v3956_v54 }
 0x48f   : > { %v3889_v16 = vpop.f32.mrf.mxu3 }
 0x490   : > { %v3890_v2 = vadd.f32 %v6598_v44, %v3889_v16 }
 0x492   : > { %v3925_v6 = vadd.f32 %v4518_v41, %v3890_v2 }
 0x494   : > { %v3957_v56 = vmax.f32 %v3925_v6, 0.0 }
 0x496   : > { %3989 = vst.msk [vmem:[%s6610_s18 + $0xf0] sm:$0xff] %vm7244_vm8, %v3957_v56 }
 0x497   : > { %v3892_v43 = vpop.f32.mrf.mxu3 }
 0x498   : > { %v3893_v47 = vadd.f32 %v6598_v44, %v3892_v43 }
 0x49a   : > { %v3926_v19 = vadd.f32 %v4519_v34, %v3893_v47 }
 0x49c   : > { %v3958_v24 = vmax.f32 %v3926_v19, 0.0 }
 0x49e   : > { %3990 = vst.msk [vmem:[%s6610_s18 + $0xf8] sm:$0xff] %vm7245_vm7, %v3958_v24 }
 0x49f PF: > { %s18_s27 = sadd.s32 1, %s4526_s27  }
 0x4a0   : > { %p15_p4 = scmp.ge.s32.totalorder %s18_s27, 4  }
 0x4a2   :  { %17 = sbr.rel (!%p15_p4) target bundleno = 1 (0x1), region = 90 }

</bundles_post_ra>
